<compile_context>
chip_gen: v7x
topology: tpu7x:2x2x1
jax: 0.10.0
libtpu: 0.0.40
codegen_flags: <defaults>
</compile_context>

<pallas_src>
import functools

import jax
import jax.numpy as jnp
from jax.experimental import pallas as pl
from jax.experimental.pallas import tpu as pltpu

D_IN = 32 * 32 * 3      # 3072
D_H1 = 512
D_H2 = 256
D_OUT = 10
D_OUT_PAD = 128         # lane-dense padded class dim
NEG_BIG = -1e30         # padding bias so padded classes never contribute


def mlp_kernel(x_ref, w1_ref, b1_ref, w2_ref, b2_ref, w3_ref, b3_ref, o_ref):
    # x_ref: (TB, 3072) float32 tile of the flattened batch.  Cast to bf16
    # in-kernel (VPU filler under the fc1 matmul) instead of in the wrapper.
    x = x_ref[...].astype(jnp.bfloat16)

    # fc1 + relu   (bf16 x bf16 -> f32 accum on the MXU)
    h1 = jnp.dot(x, w1_ref[...], preferred_element_type=jnp.float32) + b1_ref[...]
    h1 = jnp.maximum(h1, 0.0).astype(jnp.bfloat16)

    # fc2 + relu
    h2 = jnp.dot(h1, w2_ref[...], preferred_element_type=jnp.float32) + b2_ref[...]
    h2 = jnp.maximum(h2, 0.0).astype(jnp.bfloat16)

    # fc3 (padded to 128 classes; padded columns have zero weight, -1e30 bias)
    logits = jnp.dot(h2, w3_ref[...], preferred_element_type=jnp.float32) + b3_ref[...]

    # log_softmax over the (padded) class dim, in f32
    m = jnp.max(logits, axis=-1, keepdims=True)
    shifted = logits - m
    lse = jnp.log(jnp.sum(jnp.exp(shifted), axis=-1, keepdims=True))
    o_ref[...] = (shifted - lse).astype(o_ref.dtype)


def _round_up(n, m):
    return ((n + m - 1) // m) * m


def _pick_tile(batch, block_b):
    # Clamp tiny batches (multiple of 16: bf16 sublane packing of h1/h2 and
    # the (8,128) rule for the f32 x / output blocks).
    tile = min(block_b, _round_up(batch, 16))
    # Guarantee >= 2 grid steps when the batch allows it, so the "parallel"
    # batch axis actually shards across both TensorCores on v7x.
    if batch >= 32:
        tile = min(tile, _round_up(-(-batch // 2), 16))
    return tile


@functools.partial(jax.jit, static_argnames=("block_b",))
def mlp_forward(x_nchw, params, *, block_b=512):
    """x_nchw: (B, 3, 32, 32) float32. Returns (B, 10) log-probabilities (f32)."""
    w1, b1, w2, b2, w3, b3 = params
    B = x_nchw.shape[0]

    # Same row-major flatten as torch's x.view(-1, 32*32*3).  Stays float32:
    # the bf16 cast happens inside the kernel.
    x = x_nchw.reshape(B, D_IN)

    tile = _pick_tile(B, block_b)
    B_pad = pl.cdiv(B, tile) * tile
    if B_pad != B:
        x = jnp.pad(x, ((0, B_pad - B), (0, 0)))

    # bf16 weight operands for the MXU (f32 accumulation inside the kernel)
    w1b = w1.astype(jnp.bfloat16)
    w2b = w2.astype(jnp.bfloat16)
    # Lane-dense fc3: pad to 128 output columns (zero weights, -1e30 bias).
    w3p = jnp.zeros((D_H2, D_OUT_PAD), jnp.bfloat16).at[:, :D_OUT].set(
        w3.astype(jnp.bfloat16))
    b3p = jnp.full((1, D_OUT_PAD), NEG_BIG, jnp.float32).at[:, :D_OUT].set(b3)

    grid = (B_pad // tile,)

    out = pl.pallas_call(
        mlp_kernel,
        out_shape=jax.ShapeDtypeStruct((B_pad, D_OUT_PAD), jnp.float32),
        grid_spec=pltpu.PrefetchScalarGridSpec(
            num_scalar_prefetch=0,
            grid=grid,
            in_specs=[
                pl.BlockSpec((tile, D_IN), lambda i: (i, 0)),       # x tile (f32, streamed)
                pl.BlockSpec((D_IN, D_H1), lambda i: (0, 0)),       # W1 (resident)
                pl.BlockSpec((1, D_H1), lambda i: (0, 0)),          # b1
                pl.BlockSpec((D_H1, D_H2), lambda i: (0, 0)),       # W2
                pl.BlockSpec((1, D_H2), lambda i: (0, 0)),          # b2
                pl.BlockSpec((D_H2, D_OUT_PAD), lambda i: (0, 0)),  # W3 (padded)
                pl.BlockSpec((1, D_OUT_PAD), lambda i: (0, 0)),     # b3 (padded)
            ],
            out_specs=pl.BlockSpec((tile, D_OUT_PAD), lambda i: (i, 0)),
        ),
        compiler_params=pltpu.CompilerParams(
            dimension_semantics=("parallel",),
            vmem_limit_bytes=32 * 1024 * 1024,
        ),
    )(x, w1b, b1, w2b, b2, w3p, b3p)

    # Drop padded batch rows and padded class columns.
    return out[:B, :D_OUT]


def init_params(key):
    """Deterministic init matching the PyTorch module's shapes.
    Weights are stored transposed: (in_features, out_features), f32."""
    ks = jax.random.split(key, 6)

    def lin(kw, kb, fan_in, fan_out):
        bound = 1.0 / jnp.sqrt(fan_in)
        w = jax.random.uniform(kw, (fan_in, fan_out), jnp.float32, -bound, bound)
        b = jax.random.uniform(kb, (1, fan_out), jnp.float32, -bound, bound)
        return w, b

    w1, b1 = lin(ks[0], ks[1], D_IN, D_H1)
    w2, b2 = lin(ks[2], ks[3], D_H1, D_H2)
    w3, b3 = lin(ks[4], ks[5], D_H2, D_OUT)
    return (w1, b1, w2, b2, w3, b3)


def _reference(x_nchw, params):
    """Pure-JAX reference using the same bf16-operand / f32-accum recipe."""
    w1, b1, w2, b2, w3, b3 = params
    xf = x_nchw.reshape(x_nchw.shape[0], D_IN).astype(jnp.bfloat16)
    h1 = jnp.dot(xf, w1.astype(jnp.bfloat16),
                 preferred_element_type=jnp.float32) + b1
    h1 = jnp.maximum(h1, 0.0).astype(jnp.bfloat16)
    h2 = jnp.dot(h1, w2.astype(jnp.bfloat16),
                 preferred_element_type=jnp.float32) + b2
    h2 = jnp.maximum(h2, 0.0).astype(jnp.bfloat16)
    logits = jnp.dot(h2, w3.astype(jnp.bfloat16),
                     preferred_element_type=jnp.float32) + b3
    return jax.nn.log_softmax(logits, axis=-1)


if __name__ == "__main__":
    key = jax.random.PRNGKey(0)
    k_x, k_p = jax.random.split(key)
    params = init_params(k_p)

    # CIFAR-like input implied by fc1: (B, 3, 32, 32) NCHW
    x_small = jax.random.normal(k_x, (8, 3, 32, 32), dtype=jnp.float32)
    out_small = jax.block_until_ready(mlp_forward(x_small, params))
    ref_small = _reference(x_small, params)
    assert out_small.shape == (8, 10)
    assert jnp.allclose(out_small, ref_small, atol=2e-3, rtol=2e-3), (
        float(jnp.max(jnp.abs(out_small - ref_small))))

    # Exercise batch padding + the >=2-grid-step (dual TensorCore) path.
    x_mid = jax.random.normal(k_x, (40, 3, 32, 32), dtype=jnp.float32)
    out_mid = jax.block_until_ready(mlp_forward(x_mid, params))
    ref_mid = _reference(x_mid, params)
    assert out_mid.shape == (40, 10)
    assert jnp.allclose(out_mid, ref_mid, atol=2e-3, rtol=2e-3), (
        float(jnp.max(jnp.abs(out_mid - ref_mid))))

    print("KERNEL_OK")
</pallas_src>

<mosaic_0001>
module attributes {stable_mosaic.version = 11 : i64} {
  func.func @mlp_kernel(%arg0: i32, %arg1: memref<16x3072xf32, #tpu.memory_space<vmem>>, %arg2: memref<3072x512xbf16, #tpu.memory_space<vmem>>, %arg3: memref<1x512xf32, #tpu.memory_space<vmem>>, %arg4: memref<512x256xbf16, #tpu.memory_space<vmem>>, %arg5: memref<1x256xf32, #tpu.memory_space<vmem>>, %arg6: memref<256x128xbf16, #tpu.memory_space<vmem>>, %arg7: memref<1x128xf32, #tpu.memory_space<vmem>>, %arg8: memref<16x128xf32, #tpu.memory_space<vmem>>) attributes {dimension_semantics = [#tpu.dimension_semantics<parallel>], iteration_bounds = array<i64: 1>, scalar_prefetch = 0 : i64, scratch_operands = 0 : i64, tpu.core_type = #tpu.core_type<tc>, window_params = [{transform_indices = @transform_0, window_bounds = array<i64: 16, 3072>}, {pipeline_mode = #tpu.pipeline_mode<synchronous>, transform_indices = @transform_1, window_bounds = array<i64: 3072, 512>}, {pipeline_mode = #tpu.pipeline_mode<synchronous>, transform_indices = @transform_2, window_bounds = array<i64: 1, 512>}, {pipeline_mode = #tpu.pipeline_mode<synchronous>, transform_indices = @transform_3, window_bounds = array<i64: 512, 256>}, {pipeline_mode = #tpu.pipeline_mode<synchronous>, transform_indices = @transform_4, window_bounds = array<i64: 1, 256>}, {pipeline_mode = #tpu.pipeline_mode<synchronous>, transform_indices = @transform_5, window_bounds = array<i64: 256, 128>}, {pipeline_mode = #tpu.pipeline_mode<synchronous>, transform_indices = @transform_6, window_bounds = array<i64: 1, 128>}, {transform_indices = @transform_7, window_bounds = array<i64: 16, 128>}]} {
    %c0 = arith.constant 0 : index
    %c0_0 = arith.constant 0 : index
    %0 = vector.load %arg1[%c0, %c0_0] : memref<16x3072xf32, #tpu.memory_space<vmem>>, vector<16x3072xf32>
    %1 = arith.truncf %0 : vector<16x3072xf32> to vector<16x3072xbf16>
    %c0_1 = arith.constant 0 : index
    %c0_2 = arith.constant 0 : index
    %2 = vector.load %arg2[%c0_1, %c0_2] : memref<3072x512xbf16, #tpu.memory_space<vmem>>, vector<3072x512xbf16>
    %cst = arith.constant dense<0.000000e+00> : vector<16x512xf32>
    %3 = tpu.matmul %1, %2, %cst {dimension_numbers = #tpu.dot_dimension_numbers<[1], [0], [0], [1], [0, 0, 1, 1], [], []>} : vector<16x3072xbf16>, vector<3072x512xbf16>, vector<16x512xf32> -> vector<16x512xf32>
    %c0_3 = arith.constant 0 : index
    %c0_4 = arith.constant 0 : index
    %4 = vector.load %arg3[%c0_3, %c0_4] : memref<1x512xf32, #tpu.memory_space<vmem>>, vector<1x512xf32>
    %5 = vector.broadcast %4 : vector<1x512xf32> to vector<16x512xf32>
    %6 = arith.addf %3, %5 : vector<16x512xf32>
    %cst_5 = arith.constant 0.000000e+00 : f32
    %7 = vector.broadcast %cst_5 : f32 to vector<16x512xf32>
    %8 = arith.maximumf %6, %7 : vector<16x512xf32>
    %9 = arith.truncf %8 : vector<16x512xf32> to vector<16x512xbf16>
    %c0_6 = arith.constant 0 : index
    %c0_7 = arith.constant 0 : index
    %10 = vector.load %arg4[%c0_6, %c0_7] : memref<512x256xbf16, #tpu.memory_space<vmem>>, vector<512x256xbf16>
    %cst_8 = arith.constant dense<0.000000e+00> : vector<16x256xf32>
    %11 = tpu.matmul %9, %10, %cst_8 {dimension_numbers = #tpu.dot_dimension_numbers<[1], [0], [0], [1], [0, 0, 1, 1], [], []>} : vector<16x512xbf16>, vector<512x256xbf16>, vector<16x256xf32> -> vector<16x256xf32>
    %c0_9 = arith.constant 0 : index
    %c0_10 = arith.constant 0 : index
    %12 = vector.load %arg5[%c0_9, %c0_10] : memref<1x256xf32, #tpu.memory_space<vmem>>, vector<1x256xf32>
    %13 = vector.broadcast %12 : vector<1x256xf32> to vector<16x256xf32>
    %14 = arith.addf %11, %13 : vector<16x256xf32>
    %cst_11 = arith.constant 0.000000e+00 : f32
    %15 = vector.broadcast %cst_11 : f32 to vector<16x256xf32>
    %16 = arith.maximumf %14, %15 : vector<16x256xf32>
    %17 = arith.truncf %16 : vector<16x256xf32> to vector<16x256xbf16>
    %c0_12 = arith.constant 0 : index
    %c0_13 = arith.constant 0 : index
    %18 = vector.load %arg6[%c0_12, %c0_13] : memref<256x128xbf16, #tpu.memory_space<vmem>>, vector<256x128xbf16>
    %cst_14 = arith.constant dense<0.000000e+00> : vector<16x128xf32>
    %19 = tpu.matmul %17, %18, %cst_14 {dimension_numbers = #tpu.dot_dimension_numbers<[1], [0], [0], [1], [0, 0, 1, 1], [], []>} : vector<16x256xbf16>, vector<256x128xbf16>, vector<16x128xf32> -> vector<16x128xf32>
    %c0_15 = arith.constant 0 : index
    %c0_16 = arith.constant 0 : index
    %20 = vector.load %arg7[%c0_15, %c0_16] : memref<1x128xf32, #tpu.memory_space<vmem>>, vector<1x128xf32>
    %21 = vector.broadcast %20 : vector<1x128xf32> to vector<16x128xf32>
    %22 = arith.addf %19, %21 : vector<16x128xf32>
    %cst_17 = arith.constant dense<0xFF800000> : vector<16xf32>
    %23 = vector.multi_reduction <maximumf>, %22, %cst_17 [1] : vector<16x128xf32> to vector<16xf32>
    %24 = vector.shape_cast %23 : vector<16xf32> to vector<16x1xf32>
    %25 = vector.broadcast %24 : vector<16x1xf32> to vector<16x128xf32>
    %26 = arith.subf %22, %25 : vector<16x128xf32>
    %27 = math.exp %26 : vector<16x128xf32>
    %cst_18 = arith.constant dense<0.000000e+00> : vector<16xf32>
    %28 = vector.multi_reduction <add>, %27, %cst_18 [1] : vector<16x128xf32> to vector<16xf32>
    %29 = vector.shape_cast %28 : vector<16xf32> to vector<16x1xf32>
    %30 = math.log %29 : vector<16x1xf32>
    %31 = vector.broadcast %30 : vector<16x1xf32> to vector<16x128xf32>
    %32 = arith.subf %26, %31 : vector<16x128xf32>
    %c0_19 = arith.constant 0 : index
    %c0_20 = arith.constant 0 : index
    %33 = vector.load %arg8[%c0_19, %c0_20] : memref<16x128xf32, #tpu.memory_space<vmem>>, vector<16x128xf32>
    tpu.vector_store %arg8[%c0_19, %c0_20], %32 {strides = array<i32>} : memref<16x128xf32, #tpu.memory_space<vmem>>, vector<16x128xf32>,
    return
  }
  func.func @transform_0(%arg0: i32) -> (i32, i32) {
    %c0_i32 = arith.constant 0 : i32
    %c0_i32_0 = arith.constant 0 : i32
    return %arg0, %c0_i32 : i32, i32
  }
  func.func @transform_1(%arg0: i32) -> (i32, i32) {
    %c0_i32 = arith.constant 0 : i32
    %c0_i32_0 = arith.constant 0 : i32
    %c0_i32_1 = arith.constant 0 : i32
    return %c0_i32, %c0_i32_0 : i32, i32
  }
  func.func @transform_2(%arg0: i32) -> (i32, i32) {
    %c0_i32 = arith.constant 0 : i32
    %c0_i32_0 = arith.constant 0 : i32
    %c0_i32_1 = arith.constant 0 : i32
    return %c0_i32, %c0_i32_0 : i32, i32
  }
  func.func @transform_3(%arg0: i32) -> (i32, i32) {
    %c0_i32 = arith.constant 0 : i32
    %c0_i32_0 = arith.constant 0 : i32
    %c0_i32_1 = arith.constant 0 : i32
    return %c0_i32, %c0_i32_0 : i32, i32
  }
  func.func @transform_4(%arg0: i32) -> (i32, i32) {
    %c0_i32 = arith.constant 0 : i32
    %c0_i32_0 = arith.constant 0 : i32
    %c0_i32_1 = arith.constant 0 : i32
    return %c0_i32, %c0_i32_0 : i32, i32
  }
  func.func @transform_5(%arg0: i32) -> (i32, i32) {
    %c0_i32 = arith.constant 0 : i32
    %c0_i32_0 = arith.constant 0 : i32
    %c0_i32_1 = arith.constant 0 : i32
    return %c0_i32, %c0_i32_0 : i32, i32
  }
  func.func @transform_6(%arg0: i32) -> (i32, i32) {
    %c0_i32 = arith.constant 0 : i32
    %c0_i32_0 = arith.constant 0 : i32
    %c0_i32_1 = arith.constant 0 : i32
    return %c0_i32, %c0_i32_0 : i32, i32
  }
  func.func @transform_7(%arg0: i32) -> (i32, i32) {
    %c0_i32 = arith.constant 0 : i32
    %c0_i32_0 = arith.constant 0 : i32
    return %arg0, %c0_i32 : i32, i32
  }
}

</mosaic_0001>

<bundles_post_ra>
// kernel: mlp_forward.1
= control target key start
LH: loop header
LB: loop body
LE: loop exit
PB: predicated region body
PF: predicated region fallthrough
CT: control target
= control target key end

     0   :  { %s11581_s1 = inlined_call_operand.vmem [shape: bf16[3072,512], index: 1, kind: input, shape index: {}]   ;;  %s11582_s0 = inlined_call_operand.vmem [shape: f32[16,3072], index: 0, kind: input, shape index: {}]   ;;  %s11583_s3 = inlined_call_operand.vmem [shape: bf16[512,256], index: 3, kind: input, shape index: {}]   ;;  %s11584_s2 = inlined_call_operand.vmem [shape: f32[1,512], index: 2, kind: input, shape index: {}]   ;;  %s11585_s5 = inlined_call_operand.vmem [shape: bf16[256,128], index: 5, kind: input, shape index: {}]   ;;  %s11586_s4 = inlined_call_operand.vmem [shape: f32[1,256], index: 4, kind: input, shape index: {}]   ;;  %s11587_s6 = inlined_call_operand.vmem [shape: f32[1,128], index: 6, kind: input, shape index: {}]   ;;  %s11588_s7 = inlined_call_operand.vmem [shape: f32[16,128], index: 7, kind: output, shape index: {}]  }
   0x1   :  { %v7438_v0 = vld [vmem:[%s11581_s1 + $0x4] ss:$16 sps:$4 sm:$0xff]   ;;  %v7442_v2 = vld [vmem:[%s11581_s1] ss:$16 sps:$4 sm:$0xff]   ;;  %v28_v46 = vld [vmem:[%s11582_s0 + $0x8] sm:$0xff] }
   0x2   :  { %v7440_v1 = vld [vmem:[%s11581_s1 + $0x204] ss:$16 sps:$4 sm:$0xff]   ;;  %4729 = vmatprep.subr.bf16.mxu1 %v7438_v0  ;;  %v7443_v3 = vld [vmem:[%s11581_s1 + $0x200] ss:$16 sps:$4 sm:$0xff]   ;;  %v52_v49 = vld [vmem:[%s11582_s0 + $0xc8] sm:$0xff] }
   0x3   :  { %4772 = vmatprep.subr.bf16.mxu0 %v7440_v1  ;;  %v7444_v4 = vld [vmem:[%s11581_s1 + $0x24] ss:$16 sps:$4 sm:$0xff]   ;;  %4730 = vmatpush1.bf16.msra.mxu1 %v7442_v2  ;;  %v7448_v6 = vld [vmem:[%s11581_s1 + $0x20] ss:$16 sps:$4 sm:$0xff]   ;;  %v8900_v50 = vpack.c.bf16 %v52_v49, %v28_v46  ;;  %v30_v51 = vld [vmem:[%s11582_s0 + $0x18] sm:$0xff] }
   0x4   :  { %4773 = vmatpush1.bf16.msra.mxu0 %v7443_v3  ;;  %v7446_v5 = vld [vmem:[%s11581_s1 + $0x224] ss:$16 sps:$4 sm:$0xff]   ;;  %4731 = vmatprep.subr.bf16.mxu1 %v7444_v4  ;;  %v7449_v7 = vld [vmem:[%s11581_s1 + $0x220] ss:$16 sps:$4 sm:$0xff]   ;;  %v54_v52 = vld [vmem:[%s11582_s0 + $0xd8] sm:$0xff] }
   0x5   :  { %4774 = vmatprep.subr.bf16.mxu0 %v7446_v5  ;;  %v7450_v8 = vld [vmem:[%s11581_s1 + $0x44] ss:$16 sps:$4 sm:$0xff]   ;;  %v7454_v10 = vld [vmem:[%s11581_s1 + $0x40] ss:$16 sps:$4 sm:$0xff]   ;;  %v8914_v55 = vpack.c.bf16 %v54_v52, %v30_v51  ;;  %4761 = vmatprep.mubr.bf16.mxu1 %v8900_v50  ;;  %v7579_v46 = vld [vmem:[%s11581_s1 + $0xe8] ss:$16 sps:$4 sm:$0xff]  }
   0x6   :  { %v7452_v9 = vld [vmem:[%s11581_s1 + $0x244] ss:$16 sps:$4 sm:$0xff]   ;;  %v7455_v11 = vld [vmem:[%s11581_s1 + $0x240] ss:$16 sps:$4 sm:$0xff]   ;;  %v7593_v52 = vld [vmem:[%s11581_s1 + $0x12c] ss:$16 sps:$4 sm:$0xff]  }
   0x7   :  { %4732 = vmatpush1.bf16.msra.mxu1 %v7448_v6  ;;  %v7456_v12 = vld [vmem:[%s11581_s1 + $0x64] ss:$16 sps:$4 sm:$0xff]   ;;  %v7460_v14 = vld [vmem:[%s11581_s1 + $0x60] ss:$16 sps:$4 sm:$0xff]   ;;  %4804 = vmatprep.mubr.bf16.mxu0 %v8914_v55 }
   0x8   :  { %4775 = vmatpush1.bf16.msra.mxu0 %v7449_v7  ;;  %4733 = vmatprep.subr.bf16.mxu1 %v7450_v8  ;;  %v7458_v13 = vld [vmem:[%s11581_s1 + $0x264] ss:$16 sps:$4 sm:$0xff]   ;;  %v7461_v15 = vld [vmem:[%s11581_s1 + $0x260] ss:$16 sps:$4 sm:$0xff]  }
   0x9   :  { %4776 = vmatprep.subr.bf16.mxu0 %v7452_v9  ;;  %v7462_v16 = vld [vmem:[%s11581_s1 + $0x84] ss:$16 sps:$4 sm:$0xff]   ;;  %v7466_v18 = vld [vmem:[%s11581_s1 + $0x80] ss:$16 sps:$4 sm:$0xff]  }
   0xa   :  { %v7464_v17 = vld [vmem:[%s11581_s1 + $0x284] ss:$16 sps:$4 sm:$0xff]   ;;  %v7467_v19 = vld [vmem:[%s11581_s1 + $0x280] ss:$16 sps:$4 sm:$0xff]  }
   0xb   :  { %4734 = vmatpush1.bf16.msra.mxu1 %v7454_v10  ;;  %v7468_v20 = vld [vmem:[%s11581_s1 + $0xa4] ss:$16 sps:$4 sm:$0xff]   ;;  %v7472_v22 = vld [vmem:[%s11581_s1 + $0xa0] ss:$16 sps:$4 sm:$0xff]  }
   0xc   :  { %4777 = vmatpush1.bf16.msra.mxu0 %v7455_v11  ;;  %4735 = vmatprep.subr.bf16.mxu1 %v7456_v12  ;;  %v7470_v21 = vld [vmem:[%s11581_s1 + $0x2a4] ss:$16 sps:$4 sm:$0xff]   ;;  %v7473_v23 = vld [vmem:[%s11581_s1 + $0x2a0] ss:$16 sps:$4 sm:$0xff]   ;;  %v7539_v11 = vld [vmem:[%s11581_s1 + $0xc] ss:$16 sps:$4 sm:$0xff]  }
   0xd   :  { %4778 = vmatprep.subr.bf16.mxu0 %v7458_v13  ;;  %v7474_v24 = vld [vmem:[%s11581_s1 + $0xc4] ss:$16 sps:$4 sm:$0xff]   ;;  %v7478_v26 = vld [vmem:[%s11581_s1 + $0xc0] ss:$16 sps:$4 sm:$0xff]  }
   0xe   :  { %v7476_v25 = vld [vmem:[%s11581_s1 + $0x2c4] ss:$16 sps:$4 sm:$0xff]   ;;  %v7479_v27 = vld [vmem:[%s11581_s1 + $0x2c0] ss:$16 sps:$4 sm:$0xff]  }
   0xf   :  { %4736 = vmatpush1.bf16.msra.mxu1 %v7460_v14  ;;  %v7480_v28 = vld [vmem:[%s11581_s1 + $0xe4] ss:$16 sps:$4 sm:$0xff]   ;;  %v7484_v30 = vld [vmem:[%s11581_s1 + $0xe0] ss:$16 sps:$4 sm:$0xff]   ;;  %v7537_v14 = vld [vmem:[%s11581_s1 + $0x8] ss:$16 sps:$4 sm:$0xff]  }
  0x10   :  { %4779 = vmatpush1.bf16.msra.mxu0 %v7461_v15  ;;  %4737 = vmatprep.subr.bf16.mxu1 %v7462_v16  ;;  %v7482_v29 = vld [vmem:[%s11581_s1 + $0x2e4] ss:$16 sps:$4 sm:$0xff]   ;;  %v7485_v31 = vld [vmem:[%s11581_s1 + $0x2e0] ss:$16 sps:$4 sm:$0xff]  }
  0x11   :  { %4780 = vmatprep.subr.bf16.mxu0 %v7464_v17  ;;  %v7486_v32 = vld [vmem:[%s11581_s1 + $0x104] ss:$16 sps:$4 sm:$0xff]   ;;  %v7490_v34 = vld [vmem:[%s11581_s1 + $0x100] ss:$16 sps:$4 sm:$0xff]   ;;  %v7545_v17 = vld [vmem:[%s11581_s1 + $0x2c] ss:$16 sps:$4 sm:$0xff]  }
  0x12   :  { %v7488_v33 = vld [vmem:[%s11581_s1 + $0x304] ss:$16 sps:$4 sm:$0xff]   ;;  %v7491_v35 = vld [vmem:[%s11581_s1 + $0x300] ss:$16 sps:$4 sm:$0xff]  }
  0x13   :  { %4738 = vmatpush1.bf16.msra.mxu1 %v7466_v18  ;;  %v7492_v36 = vld [vmem:[%s11581_s1 + $0x124] ss:$16 sps:$4 sm:$0xff]   ;;  %v7496_v38 = vld [vmem:[%s11581_s1 + $0x120] ss:$16 sps:$4 sm:$0xff]  }
  0x14   :  { %4781 = vmatpush1.bf16.msra.mxu0 %v7467_v19  ;;  %4739 = vmatprep.subr.bf16.mxu1 %v7468_v20  ;;  %v7494_v37 = vld [vmem:[%s11581_s1 + $0x324] ss:$16 sps:$4 sm:$0xff]   ;;  %v7497_v39 = vld [vmem:[%s11581_s1 + $0x320] ss:$16 sps:$4 sm:$0xff]   ;;  %v7543_v19 = vld [vmem:[%s11581_s1 + $0x28] ss:$16 sps:$4 sm:$0xff]  }
  0x15   :  { %4782 = vmatprep.subr.bf16.mxu0 %v7470_v21  ;;  %v7498_v40 = vld [vmem:[%s11581_s1 + $0x144] ss:$16 sps:$4 sm:$0xff]   ;;  %v7502_v42 = vld [vmem:[%s11581_s1 + $0x140] ss:$16 sps:$4 sm:$0xff]   ;;  %v7551_v21 = vld [vmem:[%s11581_s1 + $0x4c] ss:$16 sps:$4 sm:$0xff]  }
  0x16   :  { %v7500_v41 = vld [vmem:[%s11581_s1 + $0x344] ss:$16 sps:$4 sm:$0xff]   ;;  %v7503_v43 = vld [vmem:[%s11581_s1 + $0x340] ss:$16 sps:$4 sm:$0xff]  }
  0x17   :  { %4740 = vmatpush1.bf16.msra.mxu1 %v7472_v22  ;;  %v7504_v44 = vld [vmem:[%s11581_s1 + $0x164] ss:$16 sps:$4 sm:$0xff]   ;;  %v7508_v47 = vld [vmem:[%s11581_s1 + $0x160] ss:$16 sps:$4 sm:$0xff]  }
  0x18   :  { %4783 = vmatpush1.bf16.msra.mxu0 %v7473_v23  ;;  %4741 = vmatprep.subr.bf16.mxu1 %v7474_v24  ;;  %v7506_v45 = vld [vmem:[%s11581_s1 + $0x364] ss:$16 sps:$4 sm:$0xff]   ;;  %v7509_v48 = vld [vmem:[%s11581_s1 + $0x360] ss:$16 sps:$4 sm:$0xff]   ;;  %v7549_v23 = vld [vmem:[%s11581_s1 + $0x48] ss:$16 sps:$4 sm:$0xff]  }
  0x19   :  { %4784 = vmatprep.subr.bf16.mxu0 %v7476_v25  ;;  %v7510_v53 = vld [vmem:[%s11581_s1 + $0x184] ss:$16 sps:$4 sm:$0xff]   ;;  %v7514_v56 = vld [vmem:[%s11581_s1 + $0x180] ss:$16 sps:$4 sm:$0xff]   ;;  %v7557_v25 = vld [vmem:[%s11581_s1 + $0x6c] ss:$16 sps:$4 sm:$0xff]  }
  0x1a   :  { %v7512_v54 = vld [vmem:[%s11581_s1 + $0x384] ss:$16 sps:$4 sm:$0xff]   ;;  %v7515_v57 = vld [vmem:[%s11581_s1 + $0x380] ss:$16 sps:$4 sm:$0xff]  }
  0x1b   :  { %4742 = vmatpush1.bf16.msra.mxu1 %v7478_v26  ;;  %v7516_v58 = vld [vmem:[%s11581_s1 + $0x1a4] ss:$16 sps:$4 sm:$0xff]   ;;  %v7520_v60 = vld [vmem:[%s11581_s1 + $0x1a0] ss:$16 sps:$4 sm:$0xff]  }
  0x1c   :  { %4785 = vmatpush1.bf16.msra.mxu0 %v7479_v27  ;;  %4743 = vmatprep.subr.bf16.mxu1 %v7480_v28  ;;  %v7518_v59 = vld [vmem:[%s11581_s1 + $0x3a4] ss:$16 sps:$4 sm:$0xff]   ;;  %v7521_v61 = vld [vmem:[%s11581_s1 + $0x3a0] ss:$16 sps:$4 sm:$0xff]   ;;  %v7555_v27 = vld [vmem:[%s11581_s1 + $0x68] ss:$16 sps:$4 sm:$0xff]  }
  0x1d   :  { %4786 = vmatprep.subr.bf16.mxu0 %v7482_v29  ;;  %v7522_v62 = vld [vmem:[%s11581_s1 + $0x1c4] ss:$16 sps:$4 sm:$0xff]   ;;  %v7526_v0 = vld [vmem:[%s11581_s1 + $0x1c0] ss:$16 sps:$4 sm:$0xff]   ;;  %v7563_v29 = vld [vmem:[%s11581_s1 + $0x8c] ss:$16 sps:$4 sm:$0xff]  }
  0x1e   :  { %v7524_v63 = vld [vmem:[%s11581_s1 + $0x3c4] ss:$16 sps:$4 sm:$0xff]   ;;  %v7527_v1 = vld [vmem:[%s11581_s1 + $0x3c0] ss:$16 sps:$4 sm:$0xff]  }
  0x1f   :  { %4744 = vmatpush1.bf16.msra.mxu1 %v7484_v30  ;;  %v7528_v2 = vld [vmem:[%s11581_s1 + $0x1e4] ss:$16 sps:$4 sm:$0xff]   ;;  %v7532_v4 = vld [vmem:[%s11581_s1 + $0x1e0] ss:$16 sps:$4 sm:$0xff]  }
  0x20   :  { %4787 = vmatpush1.bf16.msra.mxu0 %v7485_v31  ;;  %4745 = vmatprep.subr.bf16.mxu1 %v7486_v32  ;;  %v7530_v3 = vld [vmem:[%s11581_s1 + $0x3e4] ss:$16 sps:$4 sm:$0xff]   ;;  %v7533_v5 = vld [vmem:[%s11581_s1 + $0x3e0] ss:$16 sps:$4 sm:$0xff]   ;;  %v7561_v31 = vld [vmem:[%s11581_s1 + $0x88] ss:$16 sps:$4 sm:$0xff]  }
  0x21   :  { %4788 = vmatprep.subr.bf16.mxu0 %v7488_v33  ;;  %v27_v6 = vld [vmem:[%s11582_s0] sm:$0xff]  ;;  %v29_v9 = vld [vmem:[%s11582_s0 + $0x10] sm:$0xff]  ;;  %v7569_v33 = vld [vmem:[%s11581_s1 + $0xac] ss:$16 sps:$4 sm:$0xff]  }
  0x22   :  { %v51_v7 = vld [vmem:[%s11582_s0 + $0xc0] sm:$0xff]  ;;  %v53_v10 = vld [vmem:[%s11582_s0 + $0xd0] sm:$0xff] }
  0x23   :  { %4746 = vmatpush1.bf16.msra.mxu1 %v7490_v34  ;;  %v7536_v8 = vld [vmem:[%s11581_s1 + $0x404] ss:$16 sps:$4 sm:$0xff]   ;;  %v8978_v12 = vpack.c.bf16 %v51_v7, %v27_v6  ;;  %v7534_v13 = vld [vmem:[%s11581_s1 + $0x400] ss:$16 sps:$4 sm:$0xff]   ;;  %v8986_v15 = vpack.c.bf16 %v53_v10, %v29_v9  ;;  %v7615_v7 = vld [vmem:[%s11581_s1 + $0x1a8] ss:$16 sps:$4 sm:$0xff]  }
  0x24   :  { %4789 = vmatpush1.bf16.msra.mxu0 %v7491_v35  ;;  %4747 = vmatprep.subr.bf16.mxu1 %v7492_v36  ;;  %v7542_v16 = vld [vmem:[%s11581_s1 + $0x424] ss:$16 sps:$4 sm:$0xff]   ;;  %v7540_v18 = vld [vmem:[%s11581_s1 + $0x420] ss:$16 sps:$4 sm:$0xff]   ;;  %v7567_v35 = vld [vmem:[%s11581_s1 + $0xa8] ss:$16 sps:$4 sm:$0xff]  }
  0x25   :  { %4790 = vmatprep.subr.bf16.mxu0 %v7494_v37  ;;  %v7548_v20 = vld [vmem:[%s11581_s1 + $0x444] ss:$16 sps:$4 sm:$0xff]   ;;  %v7546_v22 = vld [vmem:[%s11581_s1 + $0x440] ss:$16 sps:$4 sm:$0xff]   ;;  %v7575_v37 = vld [vmem:[%s11581_s1 + $0xcc] ss:$16 sps:$4 sm:$0xff]  }
  0x26   :  { %v7554_v24 = vld [vmem:[%s11581_s1 + $0x464] ss:$16 sps:$4 sm:$0xff]   ;;  %v7552_v26 = vld [vmem:[%s11581_s1 + $0x460] ss:$16 sps:$4 sm:$0xff]   ;;  %v7623_v9 = vld [vmem:[%s11581_s1 + $0x1cc] ss:$16 sps:$4 sm:$0xff]  }
  0x27   :  { %4748 = vmatpush1.bf16.msra.mxu1 %v7496_v38  ;;  %v7560_v28 = vld [vmem:[%s11581_s1 + $0x484] ss:$16 sps:$4 sm:$0xff]   ;;  %v7558_v30 = vld [vmem:[%s11581_s1 + $0x480] ss:$16 sps:$4 sm:$0xff]  }
  0x28   :  { %4791 = vmatpush1.bf16.msra.mxu0 %v7497_v39  ;;  %4749 = vmatprep.subr.bf16.mxu1 %v7498_v40  ;;  %v7566_v32 = vld [vmem:[%s11581_s1 + $0x4a4] ss:$16 sps:$4 sm:$0xff]   ;;  %v7564_v34 = vld [vmem:[%s11581_s1 + $0x4a0] ss:$16 sps:$4 sm:$0xff]   ;;  %v7573_v39 = vld [vmem:[%s11581_s1 + $0xc8] ss:$16 sps:$4 sm:$0xff]  }
  0x29   :  { %4792 = vmatprep.subr.bf16.mxu0 %v7500_v41  ;;  %v7572_v36 = vld [vmem:[%s11581_s1 + $0x4c4] ss:$16 sps:$4 sm:$0xff]   ;;  %v7570_v38 = vld [vmem:[%s11581_s1 + $0x4c0] ss:$16 sps:$4 sm:$0xff]   ;;  %v32_v40 = vld [vmem:[%s11582_s0 + $0x28] sm:$0xff] }
  0x2a   :  { %v56_v41 = vld [vmem:[%s11582_s0 + $0xe8] sm:$0xff]  ;;  %v7582_v49 = vld [vmem:[%s11581_s1 + $0x500] ss:$16 sps:$4 sm:$0xff]   ;;  %v7590_v51 = vld [vmem:[%s11581_s1 + $0x524] ss:$16 sps:$4 sm:$0xff]  }
  0x2b   :  { %4750 = vmatpush1.bf16.msra.mxu1 %v7502_v42  ;;  %v7578_v42 = vld [vmem:[%s11581_s1 + $0x4e4] ss:$16 sps:$4 sm:$0xff]   ;;  %v7612_v6 = vld [vmem:[%s11581_s1 + $0x5a0] ss:$16 sps:$4 sm:$0xff]  }
  0x2c   :  { %4793 = vmatpush1.bf16.msra.mxu0 %v7503_v43  ;;  %4751 = vmatprep.subr.bf16.mxu1 %v7504_v44  ;;  %v7581_v43 = vld [vmem:[%s11581_s1 + $0xec] ss:$16 sps:$4 sm:$0xff]   ;;  %v9075_v44 = vpack.c.bf16 %v56_v41, %v32_v40  ;;  %v7618_v10 = vld [vmem:[%s11581_s1 + $0x5c0] ss:$16 sps:$4 sm:$0xff]   ;;  %v7657_v41 = vld [vmem:[%s11581_s1 + $0x288] ss:$16 sps:$4 sm:$0xff]  }
  0x2d   :  { %4794 = vmatprep.subr.bf16.mxu0 %v7506_v45  ;;  %v7576_v45 = vld [vmem:[%s11581_s1 + $0x4e0] ss:$16 sps:$4 sm:$0xff]  }
  0x2e   :  { %v7654_v40 = vld [vmem:[%s11581_s1 + $0x680] ss:$16 sps:$4 sm:$0xff]  }
  0x2f   :  { %4752 = vmatpush1.bf16.msra.mxu1 %v7508_v47  ;;  %v7584_v47 = vld [vmem:[%s11581_s1 + $0x504] ss:$16 sps:$4 sm:$0xff]  }
  0x30   :  { %4795 = vmatpush1.bf16.msra.mxu0 %v7509_v48  ;;  %4753 = vmatprep.subr.bf16.mxu1 %v7510_v53  ;;  %v7587_v48 = vld [vmem:[%s11581_s1 + $0x10c] ss:$16 sps:$4 sm:$0xff]   ;;  %v7588_v53 = vld [vmem:[%s11581_s1 + $0x520] ss:$16 sps:$4 sm:$0xff]  }
  0x31   :  { %4796 = vmatprep.subr.bf16.mxu0 %v7512_v54  ;;  %v7591_v54 = vld [vmem:[%s11581_s1 + $0x128] ss:$16 sps:$4 sm:$0xff]  }
  0x33   :  { %4754 = vmatpush1.bf16.msra.mxu1 %v7514_v56  ;;  %v7596_v56 = vld [vmem:[%s11581_s1 + $0x544] ss:$16 sps:$4 sm:$0xff]  }
  0x34   :  { %4797 = vmatpush1.bf16.msra.mxu0 %v7515_v57  ;;  %4755 = vmatprep.subr.bf16.mxu1 %v7516_v58  ;;  %v7599_v57 = vld [vmem:[%s11581_s1 + $0x14c] ss:$16 sps:$4 sm:$0xff]   ;;  %v7594_v58 = vld [vmem:[%s11581_s1 + $0x540] ss:$16 sps:$4 sm:$0xff]  }
  0x35   :  { %4798 = vmatprep.subr.bf16.mxu0 %v7518_v59  ;;  %v7597_v59 = vld [vmem:[%s11581_s1 + $0x148] ss:$16 sps:$4 sm:$0xff]  }
  0x37   :  { %4756 = vmatpush1.bf16.msra.mxu1 %v7520_v60  ;;  %v7602_v60 = vld [vmem:[%s11581_s1 + $0x564] ss:$16 sps:$4 sm:$0xff]  }
  0x38   :  { %4799 = vmatpush1.bf16.msra.mxu0 %v7521_v61  ;;  %4757 = vmatprep.subr.bf16.mxu1 %v7522_v62  ;;  %v7605_v61 = vld [vmem:[%s11581_s1 + $0x16c] ss:$16 sps:$4 sm:$0xff]   ;;  %v7600_v62 = vld [vmem:[%s11581_s1 + $0x560] ss:$16 sps:$4 sm:$0xff]  }
  0x39   :  { %4800 = vmatprep.subr.bf16.mxu0 %v7524_v63  ;;  %v7603_v63 = vld [vmem:[%s11581_s1 + $0x168] ss:$16 sps:$4 sm:$0xff]  }
  0x3b   :  { %4758 = vmatpush1.bf16.msra.mxu1 %v7526_v0  ;;  %v7608_v0 = vld [vmem:[%s11581_s1 + $0x584] ss:$16 sps:$4 sm:$0xff]  }
  0x3c   :  { %4801 = vmatpush1.bf16.msra.mxu0 %v7527_v1  ;;  %4759 = vmatprep.subr.bf16.mxu1 %v7528_v2  ;;  %v7611_v1 = vld [vmem:[%s11581_s1 + $0x18c] ss:$16 sps:$4 sm:$0xff]   ;;  %v7606_v2 = vld [vmem:[%s11581_s1 + $0x580] ss:$16 sps:$4 sm:$0xff]  }
  0x3d   :  { %4802 = vmatprep.subr.bf16.mxu0 %v7530_v3  ;;  %v7609_v3 = vld [vmem:[%s11581_s1 + $0x188] ss:$16 sps:$4 sm:$0xff]  }
  0x3f   :  { %4760 = vmatpush1.bf16.msra.mxu1 %v7532_v4  ;;  %v7614_v4 = vld [vmem:[%s11581_s1 + $0x5a4] ss:$16 sps:$4 sm:$0xff]  }
  0x40   :  { %4803 = vmatpush1.bf16.msra.mxu0 %v7533_v5  ;;  %5245 = vmatprep.subr.bf16.mxu1 %v7539_v11  ;;  %v7617_v5 = vld [vmem:[%s11581_s1 + $0x1ac] ss:$16 sps:$4 sm:$0xff]   ;;  %v7621_v11 = vld [vmem:[%s11581_s1 + $0x1c8] ss:$16 sps:$4 sm:$0xff]  }
  0x41   :  { %4815 = vmatprep.subr.bf16.mxu0 %v7536_v8  ;;  %v7620_v8 = vld [vmem:[%s11581_s1 + $0x5c4] ss:$16 sps:$4 sm:$0xff]  }
  0x42   :  { %4762 = vmatmul.mubr.bf16.vlgmr.msra.gmra.mrb[0].mxu1 %v8978_v12 }
  0x43   :  { %4805 = vmatmul.mubr.bf16.vlgmr.msra.gmra.mrb[0].mxu0 %v8986_v15  ;;  %5246 = vmatpush1.bf16.msra.mxu1 %v7537_v14  ;;  %v7629_v14 = vld [vmem:[%s11581_s1 + $0x1ec] ss:$16 sps:$4 sm:$0xff]  }
  0x44   :  { %4816 = vmatpush1.bf16.msra.mxu0 %v7534_v13  ;;  %5247 = vmatprep.subr.bf16.mxu1 %v7545_v17  ;;  %v7626_v13 = vld [vmem:[%s11581_s1 + $0x5e4] ss:$16 sps:$4 sm:$0xff]   ;;  %v7627_v17 = vld [vmem:[%s11581_s1 + $0x1e8] ss:$16 sps:$4 sm:$0xff]  }
  0x45   :  { %4817 = vmatprep.subr.bf16.mxu0 %v7542_v16  ;;  %5277 = vmatprep.mubr.bf16.mxu1 %v8900_v50  ;;  %v7585_v50 = vld [vmem:[%s11581_s1 + $0x108] ss:$16 sps:$4 sm:$0xff]   ;;  %v7624_v16 = vld [vmem:[%s11581_s1 + $0x5e0] ss:$16 sps:$4 sm:$0xff]  }
  0x46   :  { %4847 = vmatprep.mubr.bf16.mxu0 %v9075_v44 }
  0x47   :  { %5248 = vmatpush1.bf16.msra.mxu1 %v7543_v19  ;;  %v31_v19 = vld [vmem:[%s11582_s0 + $0x20] sm:$0xff] }
  0x48   :  { %4818 = vmatpush1.bf16.msra.mxu0 %v7540_v18  ;;  %5249 = vmatprep.subr.bf16.mxu1 %v7551_v21  ;;  %v7632_v18 = vld [vmem:[%s11581_s1 + $0x604] ss:$16 sps:$4 sm:$0xff]   ;;  %v7635_v21 = vld [vmem:[%s11581_s1 + $0x20c] ss:$16 sps:$4 sm:$0xff]  }
  0x49   :  { %4819 = vmatprep.subr.bf16.mxu0 %v7548_v20  ;;  %v55_v20 = vld [vmem:[%s11582_s0 + $0xe0] sm:$0xff] }
  0x4b   :  { %5250 = vmatpush1.bf16.msra.mxu1 %v7549_v23  ;;  %v7633_v23 = vld [vmem:[%s11581_s1 + $0x208] ss:$16 sps:$4 sm:$0xff]  }
  0x4c   :  { %4820 = vmatpush1.bf16.msra.mxu0 %v7546_v22  ;;  %5251 = vmatprep.subr.bf16.mxu1 %v7557_v25  ;;  %v7630_v22 = vld [vmem:[%s11581_s1 + $0x600] ss:$16 sps:$4 sm:$0xff]   ;;  %v7638_v25 = vld [vmem:[%s11581_s1 + $0x624] ss:$16 sps:$4 sm:$0xff]  }
  0x4d   :  { %4821 = vmatprep.subr.bf16.mxu0 %v7554_v24  ;;  %v9198_v24 = vpack.c.bf16 %v55_v20, %v31_v19  ;;  %v7719_v19 = vld [vmem:[%s11581_s1 + $0x3cc] ss:$16 sps:$4 sm:$0xff]   ;;  %v7714_v20 = vld [vmem:[%s11581_s1 + $0x7c0] ss:$16 sps:$4 sm:$0xff]  }
  0x4f   :  { %5252 = vmatpush1.bf16.msra.mxu1 %v7555_v27  ;;  %v7636_v27 = vld [vmem:[%s11581_s1 + $0x620] ss:$16 sps:$4 sm:$0xff]  }
  0x50   :  { %4822 = vmatpush1.bf16.msra.mxu0 %v7552_v26  ;;  %5253 = vmatprep.subr.bf16.mxu1 %v7563_v29  ;;  %v7641_v26 = vld [vmem:[%s11581_s1 + $0x22c] ss:$16 sps:$4 sm:$0xff]  }
  0x51   :  { %4823 = vmatprep.subr.bf16.mxu0 %v7560_v28  ;;  %v7639_v28 = vld [vmem:[%s11581_s1 + $0x228] ss:$16 sps:$4 sm:$0xff]  }
  0x52   :  { %v34_v29 = vld [vmem:[%s11582_s0 + $0x38] sm:$0xff] }
  0x53   :  { %5254 = vmatpush1.bf16.msra.mxu1 %v7561_v31  ;;  %v7647_v31 = vld [vmem:[%s11581_s1 + $0x24c] ss:$16 sps:$4 sm:$0xff]  }
  0x54   :  { %4824 = vmatpush1.bf16.msra.mxu0 %v7558_v30  ;;  %5255 = vmatprep.subr.bf16.mxu1 %v7569_v33  ;;  %v58_v30 = vld [vmem:[%s11582_s0 + $0xf8] sm:$0xff]  ;;  %v7642_v33 = vld [vmem:[%s11581_s1 + $0x640] ss:$16 sps:$4 sm:$0xff]  }
  0x55   :  { %4825 = vmatprep.subr.bf16.mxu0 %v7566_v32  ;;  %v9226_v32 = vpack.c.bf16 %v58_v30, %v34_v29  ;;  %v57_v29 = vld [vmem:[%s11582_s0 + $0xf0] sm:$0xff]  ;;  %v7731_v30 = vld [vmem:[%s11581_s1 + $0x40c] ss:$16 sps:$4 sm:$0xff]  }
  0x57   :  { %5256 = vmatpush1.bf16.msra.mxu1 %v7567_v35  ;;  %v7650_v35 = vld [vmem:[%s11581_s1 + $0x664] ss:$16 sps:$4 sm:$0xff]  }
  0x58   :  { %4826 = vmatpush1.bf16.msra.mxu0 %v7564_v34  ;;  %5257 = vmatprep.subr.bf16.mxu1 %v7575_v37  ;;  %v7645_v34 = vld [vmem:[%s11581_s1 + $0x248] ss:$16 sps:$4 sm:$0xff]  }
  0x59   :  { %4827 = vmatprep.subr.bf16.mxu0 %v7572_v36  ;;  %v7648_v36 = vld [vmem:[%s11581_s1 + $0x660] ss:$16 sps:$4 sm:$0xff]   ;;  %v7651_v37 = vld [vmem:[%s11581_s1 + $0x268] ss:$16 sps:$4 sm:$0xff]  }
  0x5b   :  { %5258 = vmatpush1.bf16.msra.mxu1 %v7573_v39  ;;  %v7659_v39 = vld [vmem:[%s11581_s1 + $0x28c] ss:$16 sps:$4 sm:$0xff]  }
  0x5c   :  { %4828 = vmatpush1.bf16.msra.mxu0 %v7570_v38  ;;  %5259 = vmatprep.subr.bf16.mxu1 %v7581_v43  ;;  %v7656_v38 = vld [vmem:[%s11581_s1 + $0x684] ss:$16 sps:$4 sm:$0xff]   ;;  %v7665_v43 = vld [vmem:[%s11581_s1 + $0x2ac] ss:$16 sps:$4 sm:$0xff]  }
  0x5d   :  { %4829 = vmatprep.subr.bf16.mxu0 %v7578_v42  ;;  %v7662_v42 = vld [vmem:[%s11581_s1 + $0x6a4] ss:$16 sps:$4 sm:$0xff]  }
  0x5f   :  { %5260 = vmatpush1.bf16.msra.mxu1 %v7579_v46  ;;  %v7663_v46 = vld [vmem:[%s11581_s1 + $0x2a8] ss:$16 sps:$4 sm:$0xff]  }
  0x60   :  { %4830 = vmatpush1.bf16.msra.mxu0 %v7576_v45  ;;  %5261 = vmatprep.subr.bf16.mxu1 %v7587_v48  ;;  %v7660_v45 = vld [vmem:[%s11581_s1 + $0x6a0] ss:$16 sps:$4 sm:$0xff]   ;;  %v7671_v48 = vld [vmem:[%s11581_s1 + $0x2cc] ss:$16 sps:$4 sm:$0xff]  }
  0x61   :  { %4831 = vmatprep.subr.bf16.mxu0 %v7584_v47  ;;  %v7668_v47 = vld [vmem:[%s11581_s1 + $0x6c4] ss:$16 sps:$4 sm:$0xff]  }
  0x63   :  { %5262 = vmatpush1.bf16.msra.mxu1 %v7585_v50  ;;  %v7669_v50 = vld [vmem:[%s11581_s1 + $0x2c8] ss:$16 sps:$4 sm:$0xff]  }
  0x64   :  { %4832 = vmatpush1.bf16.msra.mxu0 %v7582_v49  ;;  %5263 = vmatprep.subr.bf16.mxu1 %v7593_v52  ;;  %v7666_v49 = vld [vmem:[%s11581_s1 + $0x6c0] ss:$16 sps:$4 sm:$0xff]   ;;  %v7677_v52 = vld [vmem:[%s11581_s1 + $0x2ec] ss:$16 sps:$4 sm:$0xff]  }
  0x65   :  { %4833 = vmatprep.subr.bf16.mxu0 %v7590_v51  ;;  %v7674_v51 = vld [vmem:[%s11581_s1 + $0x6e4] ss:$16 sps:$4 sm:$0xff]  }
  0x67   :  { %5264 = vmatpush1.bf16.msra.mxu1 %v7591_v54  ;;  %v7675_v54 = vld [vmem:[%s11581_s1 + $0x2e8] ss:$16 sps:$4 sm:$0xff]  }
  0x68   :  { %4834 = vmatpush1.bf16.msra.mxu0 %v7588_v53  ;;  %5265 = vmatprep.subr.bf16.mxu1 %v7599_v57  ;;  %v7672_v53 = vld [vmem:[%s11581_s1 + $0x6e0] ss:$16 sps:$4 sm:$0xff]   ;;  %v7683_v57 = vld [vmem:[%s11581_s1 + $0x30c] ss:$16 sps:$4 sm:$0xff]  }
  0x69   :  { %4835 = vmatprep.subr.bf16.mxu0 %v7596_v56  ;;  %v7680_v56 = vld [vmem:[%s11581_s1 + $0x704] ss:$16 sps:$4 sm:$0xff]  }
  0x6b   :  { %5266 = vmatpush1.bf16.msra.mxu1 %v7597_v59  ;;  %v7681_v59 = vld [vmem:[%s11581_s1 + $0x308] ss:$16 sps:$4 sm:$0xff]  }
  0x6c   :  { %4836 = vmatpush1.bf16.msra.mxu0 %v7594_v58  ;;  %5267 = vmatprep.subr.bf16.mxu1 %v7605_v61  ;;  %v7678_v58 = vld [vmem:[%s11581_s1 + $0x700] ss:$16 sps:$4 sm:$0xff]   ;;  %v7689_v61 = vld [vmem:[%s11581_s1 + $0x32c] ss:$16 sps:$4 sm:$0xff]  }
  0x6d   :  { %4837 = vmatprep.subr.bf16.mxu0 %v7602_v60  ;;  %v7686_v60 = vld [vmem:[%s11581_s1 + $0x724] ss:$16 sps:$4 sm:$0xff]  }
  0x6f   :  { %5268 = vmatpush1.bf16.msra.mxu1 %v7603_v63  ;;  %v7687_v63 = vld [vmem:[%s11581_s1 + $0x328] ss:$16 sps:$4 sm:$0xff]  }
  0x70   :  { %4838 = vmatpush1.bf16.msra.mxu0 %v7600_v62  ;;  %5269 = vmatprep.subr.bf16.mxu1 %v7611_v1  ;;  %v7684_v62 = vld [vmem:[%s11581_s1 + $0x720] ss:$16 sps:$4 sm:$0xff]   ;;  %v7695_v1 = vld [vmem:[%s11581_s1 + $0x34c] ss:$16 sps:$4 sm:$0xff]  }
  0x71   :  { %4839 = vmatprep.subr.bf16.mxu0 %v7608_v0  ;;  %v7692_v0 = vld [vmem:[%s11581_s1 + $0x744] ss:$16 sps:$4 sm:$0xff]  }
  0x73   :  { %5270 = vmatpush1.bf16.msra.mxu1 %v7609_v3  ;;  %v7693_v3 = vld [vmem:[%s11581_s1 + $0x348] ss:$16 sps:$4 sm:$0xff]  }
  0x74   :  { %4840 = vmatpush1.bf16.msra.mxu0 %v7606_v2  ;;  %5271 = vmatprep.subr.bf16.mxu1 %v7617_v5  ;;  %v7690_v2 = vld [vmem:[%s11581_s1 + $0x740] ss:$16 sps:$4 sm:$0xff]   ;;  %v7701_v5 = vld [vmem:[%s11581_s1 + $0x36c] ss:$16 sps:$4 sm:$0xff]  }
  0x75   :  { %4841 = vmatprep.subr.bf16.mxu0 %v7614_v4  ;;  %v7698_v4 = vld [vmem:[%s11581_s1 + $0x764] ss:$16 sps:$4 sm:$0xff]  }
  0x77   :  { %5272 = vmatpush1.bf16.msra.mxu1 %v7615_v7  ;;  %v7699_v7 = vld [vmem:[%s11581_s1 + $0x368] ss:$16 sps:$4 sm:$0xff]  }
  0x78   :  { %4842 = vmatpush1.bf16.msra.mxu0 %v7612_v6  ;;  %5273 = vmatprep.subr.bf16.mxu1 %v7623_v9  ;;  %v7696_v6 = vld [vmem:[%s11581_s1 + $0x760] ss:$16 sps:$4 sm:$0xff]   ;;  %v7707_v9 = vld [vmem:[%s11581_s1 + $0x38c] ss:$16 sps:$4 sm:$0xff]  }
  0x79   :  { %4843 = vmatprep.subr.bf16.mxu0 %v7620_v8  ;;  %v7704_v8 = vld [vmem:[%s11581_s1 + $0x784] ss:$16 sps:$4 sm:$0xff]  }
  0x7b   :  { %5274 = vmatpush1.bf16.msra.mxu1 %v7621_v11  ;;  %v7705_v11 = vld [vmem:[%s11581_s1 + $0x388] ss:$16 sps:$4 sm:$0xff]  }
  0x7c   :  { %4844 = vmatpush1.bf16.msra.mxu0 %v7618_v10  ;;  %5275 = vmatprep.subr.bf16.mxu1 %v7629_v14  ;;  %v7702_v10 = vld [vmem:[%s11581_s1 + $0x780] ss:$16 sps:$4 sm:$0xff]   ;;  %v7713_v14 = vld [vmem:[%s11581_s1 + $0x3ac] ss:$16 sps:$4 sm:$0xff]  }
  0x7d   :  { %4845 = vmatprep.subr.bf16.mxu0 %v7626_v13  ;;  %v7710_v13 = vld [vmem:[%s11581_s1 + $0x7a4] ss:$16 sps:$4 sm:$0xff]  }
  0x7f   :  { %5276 = vmatpush1.bf16.msra.mxu1 %v7627_v17  ;;  %v7711_v17 = vld [vmem:[%s11581_s1 + $0x3a8] ss:$16 sps:$4 sm:$0xff]  }
  0x80   :  { %4846 = vmatpush1.bf16.msra.mxu0 %v7624_v16  ;;  %5288 = vmatprep.subr.bf16.mxu1 %v7635_v21  ;;  %v7708_v16 = vld [vmem:[%s11581_s1 + $0x7a0] ss:$16 sps:$4 sm:$0xff]   ;;  %v7717_v21 = vld [vmem:[%s11581_s1 + $0x3c8] ss:$16 sps:$4 sm:$0xff]  }
  0x81   :  { %4858 = vmatprep.subr.bf16.mxu0 %v7632_v18  ;;  %v7716_v18 = vld [vmem:[%s11581_s1 + $0x7c4] ss:$16 sps:$4 sm:$0xff]  }
  0x82   :  { %5278 = vmatmul.mubr.bf16.vlgmr.msra.gmra.mrb[4].mxu1 %v8978_v12  ;;  %v7644_v12 = vld [vmem:[%s11581_s1 + $0x644] ss:$16 sps:$4 sm:$0xff]  }
  0x83   :  { %4848 = vmatmul.mubr.bf16.vlgmr.msra.gmra.mrb[0].mxu0 %v9198_v24  ;;  %5289 = vmatpush1.bf16.msra.mxu1 %v7633_v23  ;;  %v7725_v23 = vld [vmem:[%s11581_s1 + $0x3ec] ss:$16 sps:$4 sm:$0xff]  }
  0x84   :  { %4859 = vmatpush1.bf16.msra.mxu0 %v7630_v22  ;;  %5290 = vmatprep.subr.bf16.mxu1 %v7641_v26  ;;  %v7722_v22 = vld [vmem:[%s11581_s1 + $0x7e4] ss:$16 sps:$4 sm:$0xff]   ;;  %v7723_v26 = vld [vmem:[%s11581_s1 + $0x3e8] ss:$16 sps:$4 sm:$0xff]  }
  0x85   :  { %4860 = vmatprep.subr.bf16.mxu0 %v7638_v25  ;;  %5320 = vmatprep.mubr.bf16.mxu1 %v8914_v55  ;;  %v7653_v55 = vld [vmem:[%s11581_s1 + $0x26c] ss:$16 sps:$4 sm:$0xff]   ;;  %v7720_v25 = vld [vmem:[%s11581_s1 + $0x7e0] ss:$16 sps:$4 sm:$0xff]  }
  0x86   :  { %4890 = vmatprep.mubr.bf16.mxu0 %v9226_v32 }
  0x87   :  { %5291 = vmatpush1.bf16.msra.mxu1 %v7639_v28  ;;  %v33_v28 = vld [vmem:[%s11582_s0 + $0x30] sm:$0xff] }
  0x88   :  { %4861 = vmatpush1.bf16.msra.mxu0 %v7636_v27  ;;  %5292 = vmatprep.subr.bf16.mxu1 %v7647_v31  ;;  %v7728_v27 = vld [vmem:[%s11581_s1 + $0x804] ss:$16 sps:$4 sm:$0xff]   ;;  %v36_v31 = vld [vmem:[%s11582_s0 + $0x48] sm:$0xff] }
  0x89   :  { %4862 = vmatprep.subr.bf16.mxu0 %v7644_v12  ;;  %v7726_v12 = vld [vmem:[%s11581_s1 + $0x800] ss:$16 sps:$4 sm:$0xff]  }
  0x8b   :  { %5293 = vmatpush1.bf16.msra.mxu1 %v7645_v34  ;;  %v60_v34 = vld [vmem:[%s11582_s0 + $0x108] sm:$0xff] }
  0x8c   :  { %4863 = vmatpush1.bf16.msra.mxu0 %v7642_v33  ;;  %5294 = vmatprep.subr.bf16.mxu1 %v7653_v55  ;;  %v9410_v33 = vpack.c.bf16 %v57_v29, %v33_v28  ;;  %v7734_v55 = vld [vmem:[%s11581_s1 + $0x824] ss:$16 sps:$4 sm:$0xff]   ;;  %v7815_v28 = vld [vmem:[%s11581_s1 + $0x5cc] ss:$16 sps:$4 sm:$0xff]   ;;  %v7810_v29 = vld [vmem:[%s11581_s1 + $0x9c0] ss:$16 sps:$4 sm:$0xff]  }
  0x8d   :  { %4864 = vmatprep.subr.bf16.mxu0 %v7650_v35  ;;  %v7729_v35 = vld [vmem:[%s11581_s1 + $0x408] ss:$16 sps:$4 sm:$0xff]  }
  0x8f   :  { %5295 = vmatpush1.bf16.msra.mxu1 %v7651_v37  ;;  %v9424_v37 = vpack.c.bf16 %v60_v34, %v36_v31  ;;  %v7821_v31 = vld [vmem:[%s11581_s1 + $0x5ec] ss:$16 sps:$4 sm:$0xff]   ;;  %v7816_v34 = vld [vmem:[%s11581_s1 + $0x9e0] ss:$16 sps:$4 sm:$0xff]  }
  0x90   :  { %4865 = vmatpush1.bf16.msra.mxu0 %v7648_v36  ;;  %5296 = vmatprep.subr.bf16.mxu1 %v7659_v39  ;;  %v7737_v36 = vld [vmem:[%s11581_s1 + $0x42c] ss:$16 sps:$4 sm:$0xff]   ;;  %v7735_v39 = vld [vmem:[%s11581_s1 + $0x428] ss:$16 sps:$4 sm:$0xff]  }
  0x91   :  { %4866 = vmatprep.subr.bf16.mxu0 %v7656_v38  ;;  %v7732_v38 = vld [vmem:[%s11581_s1 + $0x820] ss:$16 sps:$4 sm:$0xff]  }
  0x93   :  { %5297 = vmatpush1.bf16.msra.mxu1 %v7657_v41  ;;  %v7738_v41 = vld [vmem:[%s11581_s1 + $0x840] ss:$16 sps:$4 sm:$0xff]  }
  0x94   :  { %4867 = vmatpush1.bf16.msra.mxu0 %v7654_v40  ;;  %5298 = vmatprep.subr.bf16.mxu1 %v7665_v43  ;;  %v7740_v40 = vld [vmem:[%s11581_s1 + $0x844] ss:$16 sps:$4 sm:$0xff]  }
  0x95   :  { %4868 = vmatprep.subr.bf16.mxu0 %v7662_v42  ;;  %v7741_v42 = vld [vmem:[%s11581_s1 + $0x448] ss:$16 sps:$4 sm:$0xff]   ;;  %v7746_v43 = vld [vmem:[%s11581_s1 + $0x864] ss:$16 sps:$4 sm:$0xff]  }
  0x97   :  { %5299 = vmatpush1.bf16.msra.mxu1 %v7663_v46  ;;  %v7747_v46 = vld [vmem:[%s11581_s1 + $0x468] ss:$16 sps:$4 sm:$0xff]  }
  0x98   :  { %4869 = vmatpush1.bf16.msra.mxu0 %v7660_v45  ;;  %5300 = vmatprep.subr.bf16.mxu1 %v7671_v48  ;;  %v7744_v45 = vld [vmem:[%s11581_s1 + $0x860] ss:$16 sps:$4 sm:$0xff]   ;;  %v7755_v48 = vld [vmem:[%s11581_s1 + $0x48c] ss:$16 sps:$4 sm:$0xff]  }
  0x99   :  { %4870 = vmatprep.subr.bf16.mxu0 %v7668_v47  ;;  %v7752_v47 = vld [vmem:[%s11581_s1 + $0x884] ss:$16 sps:$4 sm:$0xff]  }
  0x9b   :  { %5301 = vmatpush1.bf16.msra.mxu1 %v7669_v50  ;;  %v7753_v50 = vld [vmem:[%s11581_s1 + $0x488] ss:$16 sps:$4 sm:$0xff]  }
  0x9c   :  { %4871 = vmatpush1.bf16.msra.mxu0 %v7666_v49  ;;  %5302 = vmatprep.subr.bf16.mxu1 %v7677_v52  ;;  %v7750_v49 = vld [vmem:[%s11581_s1 + $0x880] ss:$16 sps:$4 sm:$0xff]   ;;  %v7761_v52 = vld [vmem:[%s11581_s1 + $0x4ac] ss:$16 sps:$4 sm:$0xff]  }
  0x9d   :  { %4872 = vmatprep.subr.bf16.mxu0 %v7674_v51  ;;  %v7758_v51 = vld [vmem:[%s11581_s1 + $0x8a4] ss:$16 sps:$4 sm:$0xff]  }
  0x9f   :  { %5303 = vmatpush1.bf16.msra.mxu1 %v7675_v54  ;;  %v7759_v54 = vld [vmem:[%s11581_s1 + $0x4a8] ss:$16 sps:$4 sm:$0xff]  }
  0xa0   :  { %4873 = vmatpush1.bf16.msra.mxu0 %v7672_v53  ;;  %5304 = vmatprep.subr.bf16.mxu1 %v7683_v57  ;;  %v7756_v53 = vld [vmem:[%s11581_s1 + $0x8a0] ss:$16 sps:$4 sm:$0xff]   ;;  %v7767_v57 = vld [vmem:[%s11581_s1 + $0x4cc] ss:$16 sps:$4 sm:$0xff]  }
  0xa1   :  { %4874 = vmatprep.subr.bf16.mxu0 %v7680_v56  ;;  %v7764_v56 = vld [vmem:[%s11581_s1 + $0x8c4] ss:$16 sps:$4 sm:$0xff]  }
  0xa3   :  { %5305 = vmatpush1.bf16.msra.mxu1 %v7681_v59  ;;  %v7765_v59 = vld [vmem:[%s11581_s1 + $0x4c8] ss:$16 sps:$4 sm:$0xff]  }
  0xa4   :  { %4875 = vmatpush1.bf16.msra.mxu0 %v7678_v58  ;;  %5306 = vmatprep.subr.bf16.mxu1 %v7689_v61  ;;  %v7762_v58 = vld [vmem:[%s11581_s1 + $0x8c0] ss:$16 sps:$4 sm:$0xff]   ;;  %v7773_v61 = vld [vmem:[%s11581_s1 + $0x4ec] ss:$16 sps:$4 sm:$0xff]  }
  0xa5   :  { %4876 = vmatprep.subr.bf16.mxu0 %v7686_v60  ;;  %v7770_v60 = vld [vmem:[%s11581_s1 + $0x8e4] ss:$16 sps:$4 sm:$0xff]  }
  0xa7   :  { %5307 = vmatpush1.bf16.msra.mxu1 %v7687_v63  ;;  %v7771_v63 = vld [vmem:[%s11581_s1 + $0x4e8] ss:$16 sps:$4 sm:$0xff]  }
  0xa8   :  { %4877 = vmatpush1.bf16.msra.mxu0 %v7684_v62  ;;  %5308 = vmatprep.subr.bf16.mxu1 %v7695_v1  ;;  %v7768_v62 = vld [vmem:[%s11581_s1 + $0x8e0] ss:$16 sps:$4 sm:$0xff]   ;;  %v7779_v1 = vld [vmem:[%s11581_s1 + $0x50c] ss:$16 sps:$4 sm:$0xff]  }
  0xa9   :  { %4878 = vmatprep.subr.bf16.mxu0 %v7692_v0  ;;  %v7776_v0 = vld [vmem:[%s11581_s1 + $0x904] ss:$16 sps:$4 sm:$0xff]  }
  0xab   :  { %5309 = vmatpush1.bf16.msra.mxu1 %v7693_v3  ;;  %v7777_v3 = vld [vmem:[%s11581_s1 + $0x508] ss:$16 sps:$4 sm:$0xff]  }
  0xac   :  { %4879 = vmatpush1.bf16.msra.mxu0 %v7690_v2  ;;  %5310 = vmatprep.subr.bf16.mxu1 %v7701_v5  ;;  %v7774_v2 = vld [vmem:[%s11581_s1 + $0x900] ss:$16 sps:$4 sm:$0xff]   ;;  %v7785_v5 = vld [vmem:[%s11581_s1 + $0x52c] ss:$16 sps:$4 sm:$0xff]  }
  0xad   :  { %4880 = vmatprep.subr.bf16.mxu0 %v7698_v4  ;;  %v7782_v4 = vld [vmem:[%s11581_s1 + $0x924] ss:$16 sps:$4 sm:$0xff]  }
  0xaf   :  { %5311 = vmatpush1.bf16.msra.mxu1 %v7699_v7  ;;  %v7783_v7 = vld [vmem:[%s11581_s1 + $0x528] ss:$16 sps:$4 sm:$0xff]  }
  0xb0   :  { %4881 = vmatpush1.bf16.msra.mxu0 %v7696_v6  ;;  %5312 = vmatprep.subr.bf16.mxu1 %v7707_v9  ;;  %v7780_v6 = vld [vmem:[%s11581_s1 + $0x920] ss:$16 sps:$4 sm:$0xff]   ;;  %v7791_v9 = vld [vmem:[%s11581_s1 + $0x54c] ss:$16 sps:$4 sm:$0xff]  }
  0xb1   :  { %4882 = vmatprep.subr.bf16.mxu0 %v7704_v8  ;;  %v7788_v8 = vld [vmem:[%s11581_s1 + $0x944] ss:$16 sps:$4 sm:$0xff]  }
  0xb3   :  { %5313 = vmatpush1.bf16.msra.mxu1 %v7705_v11  ;;  %v7789_v11 = vld [vmem:[%s11581_s1 + $0x548] ss:$16 sps:$4 sm:$0xff]  }
  0xb4   :  { %4883 = vmatpush1.bf16.msra.mxu0 %v7702_v10  ;;  %5314 = vmatprep.subr.bf16.mxu1 %v7713_v14  ;;  %v7786_v10 = vld [vmem:[%s11581_s1 + $0x940] ss:$16 sps:$4 sm:$0xff]   ;;  %v7797_v14 = vld [vmem:[%s11581_s1 + $0x56c] ss:$16 sps:$4 sm:$0xff]  }
  0xb5   :  { %4884 = vmatprep.subr.bf16.mxu0 %v7710_v13  ;;  %v7794_v13 = vld [vmem:[%s11581_s1 + $0x964] ss:$16 sps:$4 sm:$0xff]  }
  0xb7   :  { %5315 = vmatpush1.bf16.msra.mxu1 %v7711_v17  ;;  %v7795_v17 = vld [vmem:[%s11581_s1 + $0x568] ss:$16 sps:$4 sm:$0xff]  }
  0xb8   :  { %4885 = vmatpush1.bf16.msra.mxu0 %v7708_v16  ;;  %5316 = vmatprep.subr.bf16.mxu1 %v7719_v19  ;;  %v7792_v16 = vld [vmem:[%s11581_s1 + $0x960] ss:$16 sps:$4 sm:$0xff]   ;;  %v7803_v19 = vld [vmem:[%s11581_s1 + $0x58c] ss:$16 sps:$4 sm:$0xff]  }
  0xb9   :  { %4886 = vmatprep.subr.bf16.mxu0 %v7716_v18  ;;  %v7800_v18 = vld [vmem:[%s11581_s1 + $0x984] ss:$16 sps:$4 sm:$0xff]  }
  0xbb   :  { %5317 = vmatpush1.bf16.msra.mxu1 %v7717_v21  ;;  %v7801_v21 = vld [vmem:[%s11581_s1 + $0x588] ss:$16 sps:$4 sm:$0xff]  }
  0xbc   :  { %4887 = vmatpush1.bf16.msra.mxu0 %v7714_v20  ;;  %5318 = vmatprep.subr.bf16.mxu1 %v7725_v23  ;;  %v7798_v20 = vld [vmem:[%s11581_s1 + $0x980] ss:$16 sps:$4 sm:$0xff]   ;;  %v7809_v23 = vld [vmem:[%s11581_s1 + $0x5ac] ss:$16 sps:$4 sm:$0xff]  }
  0xbd   :  { %4888 = vmatprep.subr.bf16.mxu0 %v7722_v22  ;;  %v7806_v22 = vld [vmem:[%s11581_s1 + $0x9a4] ss:$16 sps:$4 sm:$0xff]  }
  0xbf   :  { %5319 = vmatpush1.bf16.msra.mxu1 %v7723_v26  ;;  %v7807_v26 = vld [vmem:[%s11581_s1 + $0x5a8] ss:$16 sps:$4 sm:$0xff]  }
  0xc0   :  { %4889 = vmatpush1.bf16.msra.mxu0 %v7720_v25  ;;  %5331 = vmatprep.subr.bf16.mxu1 %v7731_v30  ;;  %v7804_v25 = vld [vmem:[%s11581_s1 + $0x9a0] ss:$16 sps:$4 sm:$0xff]   ;;  %v7813_v30 = vld [vmem:[%s11581_s1 + $0x5c8] ss:$16 sps:$4 sm:$0xff]  }
  0xc1   :  { %4901 = vmatprep.subr.bf16.mxu0 %v7728_v27  ;;  %v7812_v27 = vld [vmem:[%s11581_s1 + $0x9c4] ss:$16 sps:$4 sm:$0xff]  }
  0xc2   :  { %5321 = vmatmul.mubr.bf16.vlgmr.msra.gmra.mrb[4].mxu1 %v8986_v15  ;;  %v7743_v15 = vld [vmem:[%s11581_s1 + $0x44c] ss:$16 sps:$4 sm:$0xff]  }
  0xc3   :  { %4891 = vmatmul.mubr.bf16.vlgmr.msra.gmra.mrb[0].mxu0 %v9410_v33  ;;  %5332 = vmatpush1.bf16.msra.mxu1 %v7729_v35  ;;  %v7819_v35 = vld [vmem:[%s11581_s1 + $0x5e8] ss:$16 sps:$4 sm:$0xff]  }
  0xc4   :  { %4902 = vmatpush1.bf16.msra.mxu0 %v7726_v12  ;;  %5333 = vmatprep.subr.bf16.mxu1 %v7737_v36  ;;  %v7818_v12 = vld [vmem:[%s11581_s1 + $0x9e4] ss:$16 sps:$4 sm:$0xff]  }
  0xc5   :  { %4903 = vmatprep.subr.bf16.mxu0 %v7734_v55  ;;  %4933 = vmatprep.mubr.bf16.mxu0 %v9424_v37  ;;  %v35_v55 = vld [vmem:[%s11582_s0 + $0x40] sm:$0xff] }
  0xc6   :  { %5363 = vmatprep.mubr.bf16.mxu1 %v9075_v44  ;;  %v7749_v44 = vld [vmem:[%s11581_s1 + $0x46c] ss:$16 sps:$4 sm:$0xff]   ;;  %v59_v36 = vld [vmem:[%s11582_s0 + $0x100] sm:$0xff] }
  0xc7   :  { %5334 = vmatpush1.bf16.msra.mxu1 %v7735_v39  ;;  %v7827_v39 = vld [vmem:[%s11581_s1 + $0x60c] ss:$16 sps:$4 sm:$0xff]  }
  0xc8   :  { %4904 = vmatpush1.bf16.msra.mxu0 %v7732_v38  ;;  %5335 = vmatprep.subr.bf16.mxu1 %v7743_v15  ;;  %v7824_v38 = vld [vmem:[%s11581_s1 + $0xa04] ss:$16 sps:$4 sm:$0xff]   ;;  %v38_v15 = vld [vmem:[%s11582_s0 + $0x58] sm:$0xff] }
  0xc9   :  { %4905 = vmatprep.subr.bf16.mxu0 %v7740_v40  ;;  %v7822_v40 = vld [vmem:[%s11581_s1 + $0xa00] ss:$16 sps:$4 sm:$0xff]  }
  0xcb   :  { %5336 = vmatpush1.bf16.msra.mxu1 %v7741_v42  ;;  %v62_v42 = vld [vmem:[%s11582_s0 + $0x118] sm:$0xff] }
  0xcc   :  { %4906 = vmatpush1.bf16.msra.mxu0 %v7738_v41  ;;  %5337 = vmatprep.subr.bf16.mxu1 %v7749_v44  ;;  %v9622_v41 = vpack.c.bf16 %v59_v36, %v35_v55  ;;  %v7830_v44 = vld [vmem:[%s11581_s1 + $0xa24] ss:$16 sps:$4 sm:$0xff]   ;;  %v7905_v36 = vld [vmem:[%s11581_s1 + $0x7ac] ss:$16 sps:$4 sm:$0xff]  }
  0xcd   :  { %4907 = vmatprep.subr.bf16.mxu0 %v7746_v43  ;;  %v7825_v43 = vld [vmem:[%s11581_s1 + $0x608] ss:$16 sps:$4 sm:$0xff]   ;;  %v7902_v55 = vld [vmem:[%s11581_s1 + $0xba4] ss:$16 sps:$4 sm:$0xff]  }
  0xcf   :  { %5338 = vmatpush1.bf16.msra.mxu1 %v7747_v46  ;;  %v9636_v46 = vpack.c.bf16 %v62_v42, %v38_v15  ;;  %v7911_v15 = vld [vmem:[%s11581_s1 + $0x7cc] ss:$16 sps:$4 sm:$0xff]   ;;  %v7906_v42 = vld [vmem:[%s11581_s1 + $0xbc0] ss:$16 sps:$4 sm:$0xff]  }
  0xd0   :  { %4908 = vmatpush1.bf16.msra.mxu0 %v7744_v45  ;;  %5339 = vmatprep.subr.bf16.mxu1 %v7755_v48  ;;  %v7833_v45 = vld [vmem:[%s11581_s1 + $0x62c] ss:$16 sps:$4 sm:$0xff]   ;;  %v7831_v48 = vld [vmem:[%s11581_s1 + $0x628] ss:$16 sps:$4 sm:$0xff]  }
  0xd1   :  { %4909 = vmatprep.subr.bf16.mxu0 %v7752_v47  ;;  %v7828_v47 = vld [vmem:[%s11581_s1 + $0xa20] ss:$16 sps:$4 sm:$0xff]  }
  0xd3   :  { %5340 = vmatpush1.bf16.msra.mxu1 %v7753_v50  ;;  %v7834_v50 = vld [vmem:[%s11581_s1 + $0xa40] ss:$16 sps:$4 sm:$0xff]  }
  0xd4   :  { %4910 = vmatpush1.bf16.msra.mxu0 %v7750_v49  ;;  %5341 = vmatprep.subr.bf16.mxu1 %v7761_v52  ;;  %v7836_v49 = vld [vmem:[%s11581_s1 + $0xa44] ss:$16 sps:$4 sm:$0xff]  }
  0xd5   :  { %4911 = vmatprep.subr.bf16.mxu0 %v7758_v51  ;;  %v7837_v51 = vld [vmem:[%s11581_s1 + $0x648] ss:$16 sps:$4 sm:$0xff]   ;;  %v7842_v52 = vld [vmem:[%s11581_s1 + $0xa64] ss:$16 sps:$4 sm:$0xff]  }
  0xd7   :  { %5342 = vmatpush1.bf16.msra.mxu1 %v7759_v54  ;;  %v7843_v54 = vld [vmem:[%s11581_s1 + $0x668] ss:$16 sps:$4 sm:$0xff]  }
  0xd8   :  { %4912 = vmatpush1.bf16.msra.mxu0 %v7756_v53  ;;  %5343 = vmatprep.subr.bf16.mxu1 %v7767_v57  ;;  %v7840_v53 = vld [vmem:[%s11581_s1 + $0xa60] ss:$16 sps:$4 sm:$0xff]   ;;  %v7851_v57 = vld [vmem:[%s11581_s1 + $0x68c] ss:$16 sps:$4 sm:$0xff]  }
  0xd9   :  { %4913 = vmatprep.subr.bf16.mxu0 %v7764_v56  ;;  %v7848_v56 = vld [vmem:[%s11581_s1 + $0xa84] ss:$16 sps:$4 sm:$0xff]  }
  0xdb   :  { %5344 = vmatpush1.bf16.msra.mxu1 %v7765_v59  ;;  %v7849_v59 = vld [vmem:[%s11581_s1 + $0x688] ss:$16 sps:$4 sm:$0xff]  }
  0xdc   :  { %4914 = vmatpush1.bf16.msra.mxu0 %v7762_v58  ;;  %5345 = vmatprep.subr.bf16.mxu1 %v7773_v61  ;;  %v7846_v58 = vld [vmem:[%s11581_s1 + $0xa80] ss:$16 sps:$4 sm:$0xff]   ;;  %v7857_v61 = vld [vmem:[%s11581_s1 + $0x6ac] ss:$16 sps:$4 sm:$0xff]  }
  0xdd   :  { %4915 = vmatprep.subr.bf16.mxu0 %v7770_v60  ;;  %v7854_v60 = vld [vmem:[%s11581_s1 + $0xaa4] ss:$16 sps:$4 sm:$0xff]  }
  0xdf   :  { %5346 = vmatpush1.bf16.msra.mxu1 %v7771_v63  ;;  %v7855_v63 = vld [vmem:[%s11581_s1 + $0x6a8] ss:$16 sps:$4 sm:$0xff]  }
  0xe0   :  { %4916 = vmatpush1.bf16.msra.mxu0 %v7768_v62  ;;  %5347 = vmatprep.subr.bf16.mxu1 %v7779_v1  ;;  %v7852_v62 = vld [vmem:[%s11581_s1 + $0xaa0] ss:$16 sps:$4 sm:$0xff]   ;;  %v7863_v1 = vld [vmem:[%s11581_s1 + $0x6cc] ss:$16 sps:$4 sm:$0xff]  }
  0xe1   :  { %4917 = vmatprep.subr.bf16.mxu0 %v7776_v0  ;;  %v7860_v0 = vld [vmem:[%s11581_s1 + $0xac4] ss:$16 sps:$4 sm:$0xff]  }
  0xe3   :  { %5348 = vmatpush1.bf16.msra.mxu1 %v7777_v3 }
  0xe4   :  { %4918 = vmatpush1.bf16.msra.mxu0 %v7774_v2  ;;  %5349 = vmatprep.subr.bf16.mxu1 %v7785_v5 }
  0xe5   :  { %4919 = vmatprep.subr.bf16.mxu0 %v7782_v4  ;;  %v7858_v4 = vld [vmem:[%s11581_s1 + $0xac0] ss:$16 sps:$4 sm:$0xff]  }
  0xe7   :  { %5350 = vmatpush1.bf16.msra.mxu1 %v7783_v7 }
  0xe8   :  { %4920 = vmatpush1.bf16.msra.mxu0 %v7780_v6  ;;  %5351 = vmatprep.subr.bf16.mxu1 %v7791_v9  ;;  %v7861_v6 = vld [vmem:[%s11581_s1 + $0x6c8] ss:$16 sps:$4 sm:$0xff]   ;;  %v7869_v9 = vld [vmem:[%s11581_s1 + $0x6ec] ss:$16 sps:$4 sm:$0xff]  }
  0xe9   :  { %4921 = vmatprep.subr.bf16.mxu0 %v7788_v8  ;;  %v7866_v8 = vld [vmem:[%s11581_s1 + $0xae4] ss:$16 sps:$4 sm:$0xff]  }
  0xeb   :  { %5352 = vmatpush1.bf16.msra.mxu1 %v7789_v11  ;;  %v7867_v11 = vld [vmem:[%s11581_s1 + $0x6e8] ss:$16 sps:$4 sm:$0xff]  }
  0xec   :  { %4922 = vmatpush1.bf16.msra.mxu0 %v7786_v10  ;;  %5353 = vmatprep.subr.bf16.mxu1 %v7797_v14  ;;  %v7864_v10 = vld [vmem:[%s11581_s1 + $0xae0] ss:$16 sps:$4 sm:$0xff]   ;;  %v7875_v14 = vld [vmem:[%s11581_s1 + $0x70c] ss:$16 sps:$4 sm:$0xff]  }
  0xed   :  { %4923 = vmatprep.subr.bf16.mxu0 %v7794_v13  ;;  %v7872_v13 = vld [vmem:[%s11581_s1 + $0xb04] ss:$16 sps:$4 sm:$0xff]  }
  0xef   :  { %5354 = vmatpush1.bf16.msra.mxu1 %v7795_v17  ;;  %v7873_v17 = vld [vmem:[%s11581_s1 + $0x708] ss:$16 sps:$4 sm:$0xff]  }
  0xf0   :  { %4924 = vmatpush1.bf16.msra.mxu0 %v7792_v16  ;;  %5355 = vmatprep.subr.bf16.mxu1 %v7803_v19  ;;  %v7870_v16 = vld [vmem:[%s11581_s1 + $0xb00] ss:$16 sps:$4 sm:$0xff]   ;;  %v7881_v19 = vld [vmem:[%s11581_s1 + $0x72c] ss:$16 sps:$4 sm:$0xff]  }
  0xf1   :  { %4925 = vmatprep.subr.bf16.mxu0 %v7800_v18  ;;  %v7878_v18 = vld [vmem:[%s11581_s1 + $0xb24] ss:$16 sps:$4 sm:$0xff]  }
  0xf3   :  { %5356 = vmatpush1.bf16.msra.mxu1 %v7801_v21  ;;  %v7879_v21 = vld [vmem:[%s11581_s1 + $0x728] ss:$16 sps:$4 sm:$0xff]  }
  0xf4   :  { %4926 = vmatpush1.bf16.msra.mxu0 %v7798_v20  ;;  %5357 = vmatprep.subr.bf16.mxu1 %v7809_v23  ;;  %v7876_v20 = vld [vmem:[%s11581_s1 + $0xb20] ss:$16 sps:$4 sm:$0xff]   ;;  %v7887_v23 = vld [vmem:[%s11581_s1 + $0x74c] ss:$16 sps:$4 sm:$0xff]  }
  0xf5   :  { %4927 = vmatprep.subr.bf16.mxu0 %v7806_v22  ;;  %v7884_v22 = vld [vmem:[%s11581_s1 + $0xb44] ss:$16 sps:$4 sm:$0xff]  }
  0xf7   :  { %5358 = vmatpush1.bf16.msra.mxu1 %v7807_v26  ;;  %v7885_v26 = vld [vmem:[%s11581_s1 + $0x748] ss:$16 sps:$4 sm:$0xff]  }
  0xf8   :  { %4928 = vmatpush1.bf16.msra.mxu0 %v7804_v25  ;;  %5359 = vmatprep.subr.bf16.mxu1 %v7815_v28  ;;  %v7882_v25 = vld [vmem:[%s11581_s1 + $0xb40] ss:$16 sps:$4 sm:$0xff]   ;;  %v7893_v28 = vld [vmem:[%s11581_s1 + $0x76c] ss:$16 sps:$4 sm:$0xff]  }
  0xf9   :  { %4929 = vmatprep.subr.bf16.mxu0 %v7812_v27  ;;  %v7890_v27 = vld [vmem:[%s11581_s1 + $0xb64] ss:$16 sps:$4 sm:$0xff]  }
  0xfb   :  { %5360 = vmatpush1.bf16.msra.mxu1 %v7813_v30  ;;  %v7891_v30 = vld [vmem:[%s11581_s1 + $0x768] ss:$16 sps:$4 sm:$0xff]  }
  0xfc   :  { %4930 = vmatpush1.bf16.msra.mxu0 %v7810_v29  ;;  %5361 = vmatprep.subr.bf16.mxu1 %v7821_v31  ;;  %v7888_v29 = vld [vmem:[%s11581_s1 + $0xb60] ss:$16 sps:$4 sm:$0xff]   ;;  %v7899_v31 = vld [vmem:[%s11581_s1 + $0x78c] ss:$16 sps:$4 sm:$0xff]  }
  0xfd   :  { %4931 = vmatprep.subr.bf16.mxu0 %v7818_v12  ;;  %v7896_v12 = vld [vmem:[%s11581_s1 + $0xb84] ss:$16 sps:$4 sm:$0xff]  }
  0xff   :  { %5362 = vmatpush1.bf16.msra.mxu1 %v7819_v35  ;;  %v7897_v35 = vld [vmem:[%s11581_s1 + $0x788] ss:$16 sps:$4 sm:$0xff]  }
 0x100   :  { %4932 = vmatpush1.bf16.msra.mxu0 %v7816_v34  ;;  %5374 = vmatprep.subr.bf16.mxu1 %v7827_v39  ;;  %v7894_v34 = vld [vmem:[%s11581_s1 + $0xb80] ss:$16 sps:$4 sm:$0xff]   ;;  %v7903_v39 = vld [vmem:[%s11581_s1 + $0x7a8] ss:$16 sps:$4 sm:$0xff]  }
 0x101   :  { %4944 = vmatprep.subr.bf16.mxu0 %v7824_v38  ;;  %v7900_v38 = vld [vmem:[%s11581_s1 + $0xba0] ss:$16 sps:$4 sm:$0xff]  }
 0x102   :  { %5364 = vmatmul.mubr.bf16.vlgmr.msra.gmra.mrb[4].mxu1 %v9198_v24  ;;  %v7839_v24 = vld [vmem:[%s11581_s1 + $0x64c] ss:$16 sps:$4 sm:$0xff]  }
 0x103   :  { %4934 = vmatmul.mubr.bf16.vlgmr.msra.gmra.mrb[0].mxu0 %v9622_v41  ;;  %5375 = vmatpush1.bf16.msra.mxu1 %v7825_v43  ;;  %v7909_v43 = vld [vmem:[%s11581_s1 + $0x7c8] ss:$16 sps:$4 sm:$0xff]  }
 0x104   :  { %4945 = vmatpush1.bf16.msra.mxu0 %v7822_v40  ;;  %5376 = vmatprep.subr.bf16.mxu1 %v7833_v45  ;;  %v7908_v40 = vld [vmem:[%s11581_s1 + $0xbc4] ss:$16 sps:$4 sm:$0xff]   ;;  %v7917_v45 = vld [vmem:[%s11581_s1 + $0x7ec] ss:$16 sps:$4 sm:$0xff]  }
 0x105   :  { %4946 = vmatprep.subr.bf16.mxu0 %v7830_v44  ;;  %4976 = vmatprep.mubr.bf16.mxu0 %v9636_v46  ;;  %v7914_v44 = vld [vmem:[%s11581_s1 + $0xbe4] ss:$16 sps:$4 sm:$0xff]  }
 0x106   :  { %5406 = vmatprep.mubr.bf16.mxu1 %v9226_v32  ;;  %v7845_v32 = vld [vmem:[%s11581_s1 + $0x66c] ss:$16 sps:$4 sm:$0xff]  }
 0x107   :  { %5377 = vmatpush1.bf16.msra.mxu1 %v7831_v48  ;;  %v7915_v48 = vld [vmem:[%s11581_s1 + $0x7e8] ss:$16 sps:$4 sm:$0xff]  }
 0x108   :  { %4947 = vmatpush1.bf16.msra.mxu0 %v7828_v47  ;;  %5378 = vmatprep.subr.bf16.mxu1 %v7839_v24  ;;  %v7912_v47 = vld [vmem:[%s11581_s1 + $0xbe0] ss:$16 sps:$4 sm:$0xff]   ;;  %v7923_v24 = vld [vmem:[%s11581_s1 + $0x80c] ss:$16 sps:$4 sm:$0xff]  }
 0x109   :  { %4948 = vmatprep.subr.bf16.mxu0 %v7836_v49  ;;  %v7920_v49 = vld [vmem:[%s11581_s1 + $0xc04] ss:$16 sps:$4 sm:$0xff]  }
 0x10b   :  { %5379 = vmatpush1.bf16.msra.mxu1 %v7837_v51  ;;  %v61_v51 = vld [vmem:[%s11582_s0 + $0x110] sm:$0xff] }
 0x10c   :  { %4949 = vmatpush1.bf16.msra.mxu0 %v7834_v50  ;;  %5380 = vmatprep.subr.bf16.mxu1 %v7845_v32  ;;  %v37_v50 = vld [vmem:[%s11582_s0 + $0x50] sm:$0xff]  ;;  %v64_v32 = vld [vmem:[%s11582_s0 + $0x128] sm:$0xff] }
 0x10d   :  { %4950 = vmatprep.subr.bf16.mxu0 %v7842_v52  ;;  %v40_v52 = vld [vmem:[%s11582_s0 + $0x68] sm:$0xff] }
 0x10f   :  { %5381 = vmatpush1.bf16.msra.mxu1 %v7843_v54  ;;  %v7918_v54 = vld [vmem:[%s11581_s1 + $0xc00] ss:$16 sps:$4 sm:$0xff]  }
 0x110   :  { %4951 = vmatpush1.bf16.msra.mxu0 %v7840_v53  ;;  %5382 = vmatprep.subr.bf16.mxu1 %v7851_v57  ;;  %v9842_v53 = vpack.c.bf16 %v61_v51, %v37_v50  ;;  %v7926_v57 = vld [vmem:[%s11581_s1 + $0xc24] ss:$16 sps:$4 sm:$0xff]   ;;  %v7996_v50 = vld [vmem:[%s11581_s1 + $0xda0] ss:$16 sps:$4 sm:$0xff]   ;;  %v7999_v51 = vld [vmem:[%s11581_s1 + $0x9a8] ss:$16 sps:$4 sm:$0xff]  }
 0x111   :  { %4952 = vmatprep.subr.bf16.mxu0 %v7848_v56  ;;  %v7921_v56 = vld [vmem:[%s11581_s1 + $0x808] ss:$16 sps:$4 sm:$0xff]  }
 0x113   :  { %5383 = vmatpush1.bf16.msra.mxu1 %v7849_v59  ;;  %v9856_v59 = vpack.c.bf16 %v64_v32, %v40_v52  ;;  %v8004_v52 = vld [vmem:[%s11581_s1 + $0xdc4] ss:$16 sps:$4 sm:$0xff]   ;;  %v8007_v32 = vld [vmem:[%s11581_s1 + $0x9cc] ss:$16 sps:$4 sm:$0xff]  }
 0x114   :  { %4953 = vmatpush1.bf16.msra.mxu0 %v7846_v58  ;;  %5384 = vmatprep.subr.bf16.mxu1 %v7857_v61  ;;  %v7929_v58 = vld [vmem:[%s11581_s1 + $0x82c] ss:$16 sps:$4 sm:$0xff]   ;;  %v7927_v61 = vld [vmem:[%s11581_s1 + $0x828] ss:$16 sps:$4 sm:$0xff]  }
 0x115   :  { %4954 = vmatprep.subr.bf16.mxu0 %v7854_v60  ;;  %v9702_v2 = vpop.f32.mrb[0].mxu1  ;;  %v7924_v60 = vld [vmem:[%s11581_s1 + $0xc20] ss:$16 sps:$4 sm:$0xff]  }
 0x116   :  { %v9704_v3 = vpop.f32.mrb[1].mxu1 }
 0x117   :  { %v9709_v5 = vpop.f32.mrb[2].mxu1  ;;  %5385 = vmatpush1.bf16.msra.mxu1 %v7855_v63  ;;  %v7930_v63 = vld [vmem:[%s11581_s1 + $0xc40] ss:$16 sps:$4 sm:$0xff]  }
 0x118   :  { %4955 = vmatpush1.bf16.msra.mxu0 %v7852_v62  ;;  %v9714_v7 = vpop.f32.mrb[3].mxu1  ;;  %5386 = vmatprep.subr.bf16.mxu1 %v7863_v1  ;;  %v7932_v62 = vld [vmem:[%s11581_s1 + $0xc44] ss:$16 sps:$4 sm:$0xff]  }
 0x119   :  { %4956 = vmatprep.subr.bf16.mxu0 %v7860_v0  ;;  %v7933_v0 = vld [vmem:[%s11581_s1 + $0x848] ss:$16 sps:$4 sm:$0xff]   ;;  %v7938_v1 = vld [vmem:[%s11581_s1 + $0xc64] ss:$16 sps:$4 sm:$0xff]  }
 0x11b   :  { %5387 = vmatpush1.bf16.msra.mxu1 %v7861_v6  ;;  %v7939_v6 = vld [vmem:[%s11581_s1 + $0x868] ss:$16 sps:$4 sm:$0xff]  }
 0x11c   :  { %4957 = vmatpush1.bf16.msra.mxu0 %v7858_v4  ;;  %5388 = vmatprep.subr.bf16.mxu1 %v7869_v9  ;;  %v7936_v4 = vld [vmem:[%s11581_s1 + $0xc60] ss:$16 sps:$4 sm:$0xff]   ;;  %v7947_v9 = vld [vmem:[%s11581_s1 + $0x88c] ss:$16 sps:$4 sm:$0xff]  }
 0x11d   :  { %4958 = vmatprep.subr.bf16.mxu0 %v7866_v8  ;;  %v7944_v8 = vld [vmem:[%s11581_s1 + $0xc84] ss:$16 sps:$4 sm:$0xff]  }
 0x11f   :  { %5389 = vmatpush1.bf16.msra.mxu1 %v7867_v11  ;;  %v7945_v11 = vld [vmem:[%s11581_s1 + $0x888] ss:$16 sps:$4 sm:$0xff]  }
 0x120   :  { %4959 = vmatpush1.bf16.msra.mxu0 %v7864_v10  ;;  %5390 = vmatprep.subr.bf16.mxu1 %v7875_v14  ;;  %v7942_v10 = vld [vmem:[%s11581_s1 + $0xc80] ss:$16 sps:$4 sm:$0xff]   ;;  %v7953_v14 = vld [vmem:[%s11581_s1 + $0x8ac] ss:$16 sps:$4 sm:$0xff]  }
 0x121   :  { %4960 = vmatprep.subr.bf16.mxu0 %v7872_v13  ;;  %v7950_v13 = vld [vmem:[%s11581_s1 + $0xca4] ss:$16 sps:$4 sm:$0xff]  }
 0x123   :  { %5391 = vmatpush1.bf16.msra.mxu1 %v7873_v17  ;;  %v7951_v17 = vld [vmem:[%s11581_s1 + $0x8a8] ss:$16 sps:$4 sm:$0xff]  }
 0x124   :  { %4961 = vmatpush1.bf16.msra.mxu0 %v7870_v16  ;;  %5392 = vmatprep.subr.bf16.mxu1 %v7881_v19  ;;  %v7948_v16 = vld [vmem:[%s11581_s1 + $0xca0] ss:$16 sps:$4 sm:$0xff]   ;;  %v7959_v19 = vld [vmem:[%s11581_s1 + $0x8cc] ss:$16 sps:$4 sm:$0xff]  }
 0x125   :  { %4962 = vmatprep.subr.bf16.mxu0 %v7878_v18  ;;  %v7956_v18 = vld [vmem:[%s11581_s1 + $0xcc4] ss:$16 sps:$4 sm:$0xff]  }
 0x127   :  { %5393 = vmatpush1.bf16.msra.mxu1 %v7879_v21  ;;  %v7957_v21 = vld [vmem:[%s11581_s1 + $0x8c8] ss:$16 sps:$4 sm:$0xff]  }
 0x128   :  { %4963 = vmatpush1.bf16.msra.mxu0 %v7876_v20  ;;  %5394 = vmatprep.subr.bf16.mxu1 %v7887_v23  ;;  %v7954_v20 = vld [vmem:[%s11581_s1 + $0xcc0] ss:$16 sps:$4 sm:$0xff]   ;;  %v7965_v23 = vld [vmem:[%s11581_s1 + $0x8ec] ss:$16 sps:$4 sm:$0xff]  }
 0x129   :  { %4964 = vmatprep.subr.bf16.mxu0 %v7884_v22  ;;  %v7962_v22 = vld [vmem:[%s11581_s1 + $0xce4] ss:$16 sps:$4 sm:$0xff]  }
 0x12b   :  { %5395 = vmatpush1.bf16.msra.mxu1 %v7885_v26  ;;  %v7963_v26 = vld [vmem:[%s11581_s1 + $0x8e8] ss:$16 sps:$4 sm:$0xff]  }
 0x12c   :  { %4965 = vmatpush1.bf16.msra.mxu0 %v7882_v25  ;;  %5396 = vmatprep.subr.bf16.mxu1 %v7893_v28  ;;  %v7960_v25 = vld [vmem:[%s11581_s1 + $0xce0] ss:$16 sps:$4 sm:$0xff]   ;;  %v7971_v28 = vld [vmem:[%s11581_s1 + $0x90c] ss:$16 sps:$4 sm:$0xff]  }
 0x12d   :  { %4966 = vmatprep.subr.bf16.mxu0 %v7890_v27  ;;  %v7968_v27 = vld [vmem:[%s11581_s1 + $0xd04] ss:$16 sps:$4 sm:$0xff]  }
 0x12f   :  { %5397 = vmatpush1.bf16.msra.mxu1 %v7891_v30  ;;  %v7969_v30 = vld [vmem:[%s11581_s1 + $0x908] ss:$16 sps:$4 sm:$0xff]  }
 0x130   :  { %4967 = vmatpush1.bf16.msra.mxu0 %v7888_v29  ;;  %5398 = vmatprep.subr.bf16.mxu1 %v7899_v31  ;;  %v7966_v29 = vld [vmem:[%s11581_s1 + $0xd00] ss:$16 sps:$4 sm:$0xff]   ;;  %v7977_v31 = vld [vmem:[%s11581_s1 + $0x92c] ss:$16 sps:$4 sm:$0xff]  }
 0x131   :  { %4968 = vmatprep.subr.bf16.mxu0 %v7896_v12  ;;  %v7974_v12 = vld [vmem:[%s11581_s1 + $0xd24] ss:$16 sps:$4 sm:$0xff]  }
 0x133   :  { %5399 = vmatpush1.bf16.msra.mxu1 %v7897_v35  ;;  %v7975_v35 = vld [vmem:[%s11581_s1 + $0x928] ss:$16 sps:$4 sm:$0xff]  }
 0x134   :  { %4969 = vmatpush1.bf16.msra.mxu0 %v7894_v34  ;;  %5400 = vmatprep.subr.bf16.mxu1 %v7905_v36  ;;  %v7972_v34 = vld [vmem:[%s11581_s1 + $0xd20] ss:$16 sps:$4 sm:$0xff]   ;;  %v7983_v36 = vld [vmem:[%s11581_s1 + $0x94c] ss:$16 sps:$4 sm:$0xff]  }
 0x135   :  { %4970 = vmatprep.subr.bf16.mxu0 %v7902_v55  ;;  %v7980_v55 = vld [vmem:[%s11581_s1 + $0xd44] ss:$16 sps:$4 sm:$0xff]  }
 0x137   :  { %5401 = vmatpush1.bf16.msra.mxu1 %v7903_v39  ;;  %v7981_v39 = vld [vmem:[%s11581_s1 + $0x948] ss:$16 sps:$4 sm:$0xff]  }
 0x138   :  { %4971 = vmatpush1.bf16.msra.mxu0 %v7900_v38  ;;  %5402 = vmatprep.subr.bf16.mxu1 %v7911_v15  ;;  %v7978_v38 = vld [vmem:[%s11581_s1 + $0xd40] ss:$16 sps:$4 sm:$0xff]   ;;  %v7989_v15 = vld [vmem:[%s11581_s1 + $0x96c] ss:$16 sps:$4 sm:$0xff]  }
 0x139   :  { %4972 = vmatprep.subr.bf16.mxu0 %v7908_v40  ;;  %v7986_v40 = vld [vmem:[%s11581_s1 + $0xd64] ss:$16 sps:$4 sm:$0xff]  }
 0x13b   :  { %5403 = vmatpush1.bf16.msra.mxu1 %v7909_v43  ;;  %v7987_v43 = vld [vmem:[%s11581_s1 + $0x968] ss:$16 sps:$4 sm:$0xff]  }
 0x13c   :  { %4973 = vmatpush1.bf16.msra.mxu0 %v7906_v42  ;;  %5404 = vmatprep.subr.bf16.mxu1 %v7917_v45  ;;  %v7984_v42 = vld [vmem:[%s11581_s1 + $0xd60] ss:$16 sps:$4 sm:$0xff]   ;;  %v7995_v45 = vld [vmem:[%s11581_s1 + $0x98c] ss:$16 sps:$4 sm:$0xff]  }
 0x13d   :  { %4974 = vmatprep.subr.bf16.mxu0 %v7914_v44  ;;  %v7992_v44 = vld [vmem:[%s11581_s1 + $0xd84] ss:$16 sps:$4 sm:$0xff]  }
 0x13f   :  { %5405 = vmatpush1.bf16.msra.mxu1 %v7915_v48  ;;  %v7993_v48 = vld [vmem:[%s11581_s1 + $0x988] ss:$16 sps:$4 sm:$0xff]  }
 0x140   :  { %4975 = vmatpush1.bf16.msra.mxu0 %v7912_v47  ;;  %5417 = vmatprep.subr.bf16.mxu1 %v7923_v24  ;;  %v7990_v47 = vld [vmem:[%s11581_s1 + $0xd80] ss:$16 sps:$4 sm:$0xff]   ;;  %v8001_v24 = vld [vmem:[%s11581_s1 + $0x9ac] ss:$16 sps:$4 sm:$0xff]  }
 0x141   :  { %4987 = vmatprep.subr.bf16.mxu0 %v7920_v49  ;;  %v7998_v49 = vld [vmem:[%s11581_s1 + $0xda4] ss:$16 sps:$4 sm:$0xff]  }
 0x142   :  { %5407 = vmatmul.mubr.bf16.vlgmr.msra.gmra.mrb[4].mxu1 %v9410_v33  ;;  %v7935_v33 = vld [vmem:[%s11581_s1 + $0x84c] ss:$16 sps:$4 sm:$0xff]  }
 0x143   :  { %4977 = vmatmul.mubr.bf16.vlgmr.msra.gmra.mrb[0].mxu0 %v9842_v53  ;;  %5418 = vmatpush1.bf16.msra.mxu1 %v7921_v56  ;;  %v8005_v56 = vld [vmem:[%s11581_s1 + $0x9c8] ss:$16 sps:$4 sm:$0xff]  }
 0x144   :  { %4988 = vmatpush1.bf16.msra.mxu0 %v7918_v54  ;;  %5419 = vmatprep.subr.bf16.mxu1 %v7929_v58  ;;  %v8002_v54 = vld [vmem:[%s11581_s1 + $0xdc0] ss:$16 sps:$4 sm:$0xff]   ;;  %v8013_v58 = vld [vmem:[%s11581_s1 + $0x9ec] ss:$16 sps:$4 sm:$0xff]  }
 0x145   :  { %4989 = vmatprep.subr.bf16.mxu0 %v7926_v57  ;;  %5019 = vmatprep.mubr.bf16.mxu0 %v9856_v59  ;;  %v8010_v57 = vld [vmem:[%s11581_s1 + $0xde4] ss:$16 sps:$4 sm:$0xff]  }
 0x146   :  { %5449 = vmatprep.mubr.bf16.mxu1 %v9424_v37  ;;  %v7941_v37 = vld [vmem:[%s11581_s1 + $0x86c] ss:$16 sps:$4 sm:$0xff]  }
 0x147   :  { %5420 = vmatpush1.bf16.msra.mxu1 %v7927_v61  ;;  %v8011_v61 = vld [vmem:[%s11581_s1 + $0x9e8] ss:$16 sps:$4 sm:$0xff]  }
 0x148   :  { %4990 = vmatpush1.bf16.msra.mxu0 %v7924_v60  ;;  %5421 = vmatprep.subr.bf16.mxu1 %v7935_v33  ;;  %v8008_v60 = vld [vmem:[%s11581_s1 + $0xde0] ss:$16 sps:$4 sm:$0xff]   ;;  %v8019_v33 = vld [vmem:[%s11581_s1 + $0xa0c] ss:$16 sps:$4 sm:$0xff]  }
 0x149   :  { %4991 = vmatprep.subr.bf16.mxu0 %v7932_v62  ;;  %v8016_v62 = vld [vmem:[%s11581_s1 + $0xe04] ss:$16 sps:$4 sm:$0xff]  }
 0x14b   :  { %5422 = vmatpush1.bf16.msra.mxu1 %v7933_v0  ;;  %v63_v0 = vld [vmem:[%s11582_s0 + $0x120] sm:$0xff] }
 0x14c   :  { %4992 = vmatpush1.bf16.msra.mxu0 %v7930_v63  ;;  %5423 = vmatprep.subr.bf16.mxu1 %v7941_v37  ;;  %v39_v63 = vld [vmem:[%s11582_s0 + $0x60] sm:$0xff]  ;;  %v66_v37 = vld [vmem:[%s11582_s0 + $0x138] sm:$0xff] }
 0x14d   :  { %4993 = vmatprep.subr.bf16.mxu0 %v7938_v1  ;;  %v42_v1 = vld [vmem:[%s11582_s0 + $0x78] sm:$0xff] }
 0x14f   :  { %5424 = vmatpush1.bf16.msra.mxu1 %v7939_v6  ;;  %v8014_v6 = vld [vmem:[%s11581_s1 + $0xe00] ss:$16 sps:$4 sm:$0xff]  }
 0x150   :  { %4994 = vmatpush1.bf16.msra.mxu0 %v7936_v4  ;;  %5425 = vmatprep.subr.bf16.mxu1 %v7947_v9  ;;  %v10054_v4 = vpack.c.bf16 %v63_v0, %v39_v63  ;;  %v8022_v9 = vld [vmem:[%s11581_s1 + $0xe24] ss:$16 sps:$4 sm:$0xff]   ;;  %v8092_v63 = vld [vmem:[%s11581_s1 + $0xfa0] ss:$16 sps:$4 sm:$0xff]   ;;  %v8095_v0 = vld [vmem:[%s11581_s1 + $0xba8] ss:$16 sps:$4 sm:$0xff]  }
 0x151   :  { %4995 = vmatprep.subr.bf16.mxu0 %v7944_v8  ;;  %v8017_v8 = vld [vmem:[%s11581_s1 + $0xa08] ss:$16 sps:$4 sm:$0xff]  }
 0x153   :  { %5426 = vmatpush1.bf16.msra.mxu1 %v7945_v11  ;;  %v10068_v11 = vpack.c.bf16 %v66_v37, %v42_v1  ;;  %v8100_v1 = vld [vmem:[%s11581_s1 + $0xfc4] ss:$16 sps:$4 sm:$0xff]   ;;  %v8103_v37 = vld [vmem:[%s11581_s1 + $0xbcc] ss:$16 sps:$4 sm:$0xff]  }
 0x154   :  { %4996 = vmatpush1.bf16.msra.mxu0 %v7942_v10  ;;  %5427 = vmatprep.subr.bf16.mxu1 %v7953_v14  ;;  %v8025_v10 = vld [vmem:[%s11581_s1 + $0xa2c] ss:$16 sps:$4 sm:$0xff]   ;;  %v8023_v14 = vld [vmem:[%s11581_s1 + $0xa28] ss:$16 sps:$4 sm:$0xff]  }
 0x155   :  { %4997 = vmatprep.subr.bf16.mxu0 %v7950_v13  ;;  %v8020_v13 = vld [vmem:[%s11581_s1 + $0xe20] ss:$16 sps:$4 sm:$0xff]  }
 0x157   :  { %5428 = vmatpush1.bf16.msra.mxu1 %v7951_v17  ;;  %v8026_v17 = vld [vmem:[%s11581_s1 + $0xe40] ss:$16 sps:$4 sm:$0xff]  }
 0x158   :  { %4998 = vmatpush1.bf16.msra.mxu0 %v7948_v16  ;;  %5429 = vmatprep.subr.bf16.mxu1 %v7959_v19  ;;  %v8028_v16 = vld [vmem:[%s11581_s1 + $0xe44] ss:$16 sps:$4 sm:$0xff]  }
 0x159   :  { %4999 = vmatprep.subr.bf16.mxu0 %v7956_v18  ;;  %v8029_v18 = vld [vmem:[%s11581_s1 + $0xa48] ss:$16 sps:$4 sm:$0xff]   ;;  %v8034_v19 = vld [vmem:[%s11581_s1 + $0xe64] ss:$16 sps:$4 sm:$0xff]  }
 0x15b   :  { %5430 = vmatpush1.bf16.msra.mxu1 %v7957_v21  ;;  %v8035_v21 = vld [vmem:[%s11581_s1 + $0xa68] ss:$16 sps:$4 sm:$0xff]  }
 0x15c   :  { %5000 = vmatpush1.bf16.msra.mxu0 %v7954_v20  ;;  %5431 = vmatprep.subr.bf16.mxu1 %v7965_v23  ;;  %v8032_v20 = vld [vmem:[%s11581_s1 + $0xe60] ss:$16 sps:$4 sm:$0xff]   ;;  %v8043_v23 = vld [vmem:[%s11581_s1 + $0xa8c] ss:$16 sps:$4 sm:$0xff]  }
 0x15d   :  { %5001 = vmatprep.subr.bf16.mxu0 %v7962_v22  ;;  %v8040_v22 = vld [vmem:[%s11581_s1 + $0xe84] ss:$16 sps:$4 sm:$0xff]  }
 0x15f   :  { %5432 = vmatpush1.bf16.msra.mxu1 %v7963_v26  ;;  %v8041_v26 = vld [vmem:[%s11581_s1 + $0xa88] ss:$16 sps:$4 sm:$0xff]  }
 0x160   :  { %5002 = vmatpush1.bf16.msra.mxu0 %v7960_v25  ;;  %5433 = vmatprep.subr.bf16.mxu1 %v7971_v28  ;;  %v8038_v25 = vld [vmem:[%s11581_s1 + $0xe80] ss:$16 sps:$4 sm:$0xff]   ;;  %v8049_v28 = vld [vmem:[%s11581_s1 + $0xaac] ss:$16 sps:$4 sm:$0xff]  }
 0x161   :  { %5003 = vmatprep.subr.bf16.mxu0 %v7968_v27  ;;  %v8046_v27 = vld [vmem:[%s11581_s1 + $0xea4] ss:$16 sps:$4 sm:$0xff]  }
 0x163   :  { %5434 = vmatpush1.bf16.msra.mxu1 %v7969_v30  ;;  %v8047_v30 = vld [vmem:[%s11581_s1 + $0xaa8] ss:$16 sps:$4 sm:$0xff]  }
 0x164   :  { %5004 = vmatpush1.bf16.msra.mxu0 %v7966_v29  ;;  %5435 = vmatprep.subr.bf16.mxu1 %v7977_v31  ;;  %v8044_v29 = vld [vmem:[%s11581_s1 + $0xea0] ss:$16 sps:$4 sm:$0xff]   ;;  %v8055_v31 = vld [vmem:[%s11581_s1 + $0xacc] ss:$16 sps:$4 sm:$0xff]  }
 0x165   :  { %5005 = vmatprep.subr.bf16.mxu0 %v7974_v12  ;;  %v8052_v12 = vld [vmem:[%s11581_s1 + $0xec4] ss:$16 sps:$4 sm:$0xff]  }
 0x167   :  { %5436 = vmatpush1.bf16.msra.mxu1 %v7975_v35  ;;  %v8053_v35 = vld [vmem:[%s11581_s1 + $0xac8] ss:$16 sps:$4 sm:$0xff]  }
 0x168   :  { %5006 = vmatpush1.bf16.msra.mxu0 %v7972_v34  ;;  %5437 = vmatprep.subr.bf16.mxu1 %v7983_v36  ;;  %v8050_v34 = vld [vmem:[%s11581_s1 + $0xec0] ss:$16 sps:$4 sm:$0xff]   ;;  %v8061_v36 = vld [vmem:[%s11581_s1 + $0xaec] ss:$16 sps:$4 sm:$0xff]  }
 0x169   :  { %5007 = vmatprep.subr.bf16.mxu0 %v7980_v55  ;;  %v8058_v55 = vld [vmem:[%s11581_s1 + $0xee4] ss:$16 sps:$4 sm:$0xff]  }
 0x16b   :  { %5438 = vmatpush1.bf16.msra.mxu1 %v7981_v39  ;;  %v8059_v39 = vld [vmem:[%s11581_s1 + $0xae8] ss:$16 sps:$4 sm:$0xff]  }
 0x16c   :  { %5008 = vmatpush1.bf16.msra.mxu0 %v7978_v38  ;;  %5439 = vmatprep.subr.bf16.mxu1 %v7989_v15  ;;  %v8056_v38 = vld [vmem:[%s11581_s1 + $0xee0] ss:$16 sps:$4 sm:$0xff]   ;;  %v8067_v15 = vld [vmem:[%s11581_s1 + $0xb0c] ss:$16 sps:$4 sm:$0xff]  }
 0x16d   :  { %5009 = vmatprep.subr.bf16.mxu0 %v7986_v40  ;;  %v8064_v40 = vld [vmem:[%s11581_s1 + $0xf04] ss:$16 sps:$4 sm:$0xff]  }
 0x16f   :  { %5440 = vmatpush1.bf16.msra.mxu1 %v7987_v43  ;;  %v8065_v43 = vld [vmem:[%s11581_s1 + $0xb08] ss:$16 sps:$4 sm:$0xff]  }
 0x170   :  { %5010 = vmatpush1.bf16.msra.mxu0 %v7984_v42  ;;  %5441 = vmatprep.subr.bf16.mxu1 %v7995_v45  ;;  %v8062_v42 = vld [vmem:[%s11581_s1 + $0xf00] ss:$16 sps:$4 sm:$0xff]   ;;  %v8073_v45 = vld [vmem:[%s11581_s1 + $0xb2c] ss:$16 sps:$4 sm:$0xff]  }
 0x171   :  { %5011 = vmatprep.subr.bf16.mxu0 %v7992_v44  ;;  %v8070_v44 = vld [vmem:[%s11581_s1 + $0xf24] ss:$16 sps:$4 sm:$0xff]  }
 0x173   :  { %5442 = vmatpush1.bf16.msra.mxu1 %v7993_v48  ;;  %v8071_v48 = vld [vmem:[%s11581_s1 + $0xb28] ss:$16 sps:$4 sm:$0xff]  }
 0x174   :  { %5012 = vmatpush1.bf16.msra.mxu0 %v7990_v47  ;;  %5443 = vmatprep.subr.bf16.mxu1 %v8001_v24  ;;  %v8068_v47 = vld [vmem:[%s11581_s1 + $0xf20] ss:$16 sps:$4 sm:$0xff]   ;;  %v8079_v24 = vld [vmem:[%s11581_s1 + $0xb4c] ss:$16 sps:$4 sm:$0xff]  }
 0x175   :  { %5013 = vmatprep.subr.bf16.mxu0 %v7998_v49  ;;  %v8076_v49 = vld [vmem:[%s11581_s1 + $0xf44] ss:$16 sps:$4 sm:$0xff]  }
 0x177   :  { %5444 = vmatpush1.bf16.msra.mxu1 %v7999_v51  ;;  %v8077_v51 = vld [vmem:[%s11581_s1 + $0xb48] ss:$16 sps:$4 sm:$0xff]  }
 0x178   :  { %5014 = vmatpush1.bf16.msra.mxu0 %v7996_v50  ;;  %5445 = vmatprep.subr.bf16.mxu1 %v8007_v32  ;;  %v8074_v50 = vld [vmem:[%s11581_s1 + $0xf40] ss:$16 sps:$4 sm:$0xff]   ;;  %v8085_v32 = vld [vmem:[%s11581_s1 + $0xb6c] ss:$16 sps:$4 sm:$0xff]  }
 0x179   :  { %5015 = vmatprep.subr.bf16.mxu0 %v8004_v52  ;;  %v8082_v52 = vld [vmem:[%s11581_s1 + $0xf64] ss:$16 sps:$4 sm:$0xff]  }
 0x17b   :  { %5446 = vmatpush1.bf16.msra.mxu1 %v8005_v56  ;;  %v8083_v56 = vld [vmem:[%s11581_s1 + $0xb68] ss:$16 sps:$4 sm:$0xff]  }
 0x17c   :  { %5016 = vmatpush1.bf16.msra.mxu0 %v8002_v54  ;;  %5447 = vmatprep.subr.bf16.mxu1 %v8013_v58  ;;  %v8080_v54 = vld [vmem:[%s11581_s1 + $0xf60] ss:$16 sps:$4 sm:$0xff]   ;;  %v8091_v58 = vld [vmem:[%s11581_s1 + $0xb8c] ss:$16 sps:$4 sm:$0xff]  }
 0x17d   :  { %5017 = vmatprep.subr.bf16.mxu0 %v8010_v57  ;;  %v8088_v57 = vld [vmem:[%s11581_s1 + $0xf84] ss:$16 sps:$4 sm:$0xff]  }
 0x17f   :  { %5448 = vmatpush1.bf16.msra.mxu1 %v8011_v61  ;;  %v8089_v61 = vld [vmem:[%s11581_s1 + $0xb88] ss:$16 sps:$4 sm:$0xff]  }
 0x180   :  { %5018 = vmatpush1.bf16.msra.mxu0 %v8008_v60  ;;  %5460 = vmatprep.subr.bf16.mxu1 %v8019_v33  ;;  %v8086_v60 = vld [vmem:[%s11581_s1 + $0xf80] ss:$16 sps:$4 sm:$0xff]   ;;  %v8097_v33 = vld [vmem:[%s11581_s1 + $0xbac] ss:$16 sps:$4 sm:$0xff]  }
 0x181   :  { %5030 = vmatprep.subr.bf16.mxu0 %v8016_v62  ;;  %v8094_v62 = vld [vmem:[%s11581_s1 + $0xfa4] ss:$16 sps:$4 sm:$0xff]  }
 0x182   :  { %5450 = vmatmul.mubr.bf16.vlgmr.msra.gmra.mrb[4].mxu1 %v9622_v41  ;;  %v8031_v41 = vld [vmem:[%s11581_s1 + $0xa4c] ss:$16 sps:$4 sm:$0xff]  }
 0x183   :  { %5020 = vmatmul.mubr.bf16.vlgmr.msra.gmra.mrb[0].mxu0 %v10054_v4  ;;  %5461 = vmatpush1.bf16.msra.mxu1 %v8017_v8  ;;  %v8101_v8 = vld [vmem:[%s11581_s1 + $0xbc8] ss:$16 sps:$4 sm:$0xff]  }
 0x184   :  { %5031 = vmatpush1.bf16.msra.mxu0 %v8014_v6  ;;  %5462 = vmatprep.subr.bf16.mxu1 %v8025_v10  ;;  %v8098_v6 = vld [vmem:[%s11581_s1 + $0xfc0] ss:$16 sps:$4 sm:$0xff]   ;;  %v8109_v10 = vld [vmem:[%s11581_s1 + $0xbec] ss:$16 sps:$4 sm:$0xff]  }
 0x185   :  { %5032 = vmatprep.subr.bf16.mxu0 %v8022_v9  ;;  %5062 = vmatprep.mubr.bf16.mxu0 %v10068_v11  ;;  %v8106_v9 = vld [vmem:[%s11581_s1 + $0xfe4] ss:$16 sps:$4 sm:$0xff]  }
 0x186   :  { %5492 = vmatprep.mubr.bf16.mxu1 %v9636_v46  ;;  %v8037_v46 = vld [vmem:[%s11581_s1 + $0xa6c] ss:$16 sps:$4 sm:$0xff]  }
 0x187   :  { %5463 = vmatpush1.bf16.msra.mxu1 %v8023_v14  ;;  %v8107_v14 = vld [vmem:[%s11581_s1 + $0xbe8] ss:$16 sps:$4 sm:$0xff]  }
 0x188   :  { %5033 = vmatpush1.bf16.msra.mxu0 %v8020_v13  ;;  %5464 = vmatprep.subr.bf16.mxu1 %v8031_v41  ;;  %v8104_v13 = vld [vmem:[%s11581_s1 + $0xfe0] ss:$16 sps:$4 sm:$0xff]   ;;  %v8115_v41 = vld [vmem:[%s11581_s1 + $0xc0c] ss:$16 sps:$4 sm:$0xff]  }
 0x189   :  { %5034 = vmatprep.subr.bf16.mxu0 %v8028_v16  ;;  %v8112_v16 = vld [vmem:[%s11581_s1 + $0x1004] ss:$16 sps:$4 sm:$0xff]  }
 0x18b   :  { %5465 = vmatpush1.bf16.msra.mxu1 %v8029_v18  ;;  %v65_v18 = vld [vmem:[%s11582_s0 + $0x130] sm:$0xff] }
 0x18c   :  { %5035 = vmatpush1.bf16.msra.mxu0 %v8026_v17  ;;  %5466 = vmatprep.subr.bf16.mxu1 %v8037_v46  ;;  %v41_v17 = vld [vmem:[%s11582_s0 + $0x70] sm:$0xff]  ;;  %v68_v46 = vld [vmem:[%s11582_s0 + $0x148] sm:$0xff] }
 0x18d   :  { %5036 = vmatprep.subr.bf16.mxu0 %v8034_v19  ;;  %v44_v19 = vld [vmem:[%s11582_s0 + $0x88] sm:$0xff] }
 0x18f   :  { %5467 = vmatpush1.bf16.msra.mxu1 %v8035_v21  ;;  %v8110_v21 = vld [vmem:[%s11581_s1 + $0x1000] ss:$16 sps:$4 sm:$0xff]  }
 0x190   :  { %5037 = vmatpush1.bf16.msra.mxu0 %v8032_v20  ;;  %5468 = vmatprep.subr.bf16.mxu1 %v8043_v23  ;;  %v10266_v20 = vpack.c.bf16 %v65_v18, %v41_v17  ;;  %v8118_v23 = vld [vmem:[%s11581_s1 + $0x1024] ss:$16 sps:$4 sm:$0xff]   ;;  %v8188_v17 = vld [vmem:[%s11581_s1 + $0x11a0] ss:$16 sps:$4 sm:$0xff]   ;;  %v8191_v18 = vld [vmem:[%s11581_s1 + $0xda8] ss:$16 sps:$4 sm:$0xff]  }
 0x191   :  { %5038 = vmatprep.subr.bf16.mxu0 %v8040_v22  ;;  %v8113_v22 = vld [vmem:[%s11581_s1 + $0xc08] ss:$16 sps:$4 sm:$0xff]  }
 0x193   :  { %5469 = vmatpush1.bf16.msra.mxu1 %v8041_v26  ;;  %v10280_v26 = vpack.c.bf16 %v68_v46, %v44_v19  ;;  %v8196_v19 = vld [vmem:[%s11581_s1 + $0x11c4] ss:$16 sps:$4 sm:$0xff]   ;;  %v8199_v46 = vld [vmem:[%s11581_s1 + $0xdcc] ss:$16 sps:$4 sm:$0xff]  }
 0x194   :  { %5039 = vmatpush1.bf16.msra.mxu0 %v8038_v25  ;;  %5470 = vmatprep.subr.bf16.mxu1 %v8049_v28  ;;  %v8121_v25 = vld [vmem:[%s11581_s1 + $0xc2c] ss:$16 sps:$4 sm:$0xff]   ;;  %v8119_v28 = vld [vmem:[%s11581_s1 + $0xc28] ss:$16 sps:$4 sm:$0xff]  }
 0x195   :  { %5040 = vmatprep.subr.bf16.mxu0 %v8046_v27  ;;  %v8116_v27 = vld [vmem:[%s11581_s1 + $0x1020] ss:$16 sps:$4 sm:$0xff]  }
 0x197   :  { %5471 = vmatpush1.bf16.msra.mxu1 %v8047_v30  ;;  %v8122_v30 = vld [vmem:[%s11581_s1 + $0x1040] ss:$16 sps:$4 sm:$0xff]  }
 0x198   :  { %5041 = vmatpush1.bf16.msra.mxu0 %v8044_v29  ;;  %5472 = vmatprep.subr.bf16.mxu1 %v8055_v31  ;;  %v8124_v29 = vld [vmem:[%s11581_s1 + $0x1044] ss:$16 sps:$4 sm:$0xff]  }
 0x199   :  { %5042 = vmatprep.subr.bf16.mxu0 %v8052_v12  ;;  %v8125_v12 = vld [vmem:[%s11581_s1 + $0xc48] ss:$16 sps:$4 sm:$0xff]   ;;  %v8130_v31 = vld [vmem:[%s11581_s1 + $0x1064] ss:$16 sps:$4 sm:$0xff]  }
 0x19b   :  { %5473 = vmatpush1.bf16.msra.mxu1 %v8053_v35  ;;  %v8131_v35 = vld [vmem:[%s11581_s1 + $0xc68] ss:$16 sps:$4 sm:$0xff]  }
 0x19c   :  { %5043 = vmatpush1.bf16.msra.mxu0 %v8050_v34  ;;  %5474 = vmatprep.subr.bf16.mxu1 %v8061_v36  ;;  %v8128_v34 = vld [vmem:[%s11581_s1 + $0x1060] ss:$16 sps:$4 sm:$0xff]   ;;  %v8139_v36 = vld [vmem:[%s11581_s1 + $0xc8c] ss:$16 sps:$4 sm:$0xff]  }
 0x19d   :  { %5044 = vmatprep.subr.bf16.mxu0 %v8058_v55  ;;  %v8136_v55 = vld [vmem:[%s11581_s1 + $0x1084] ss:$16 sps:$4 sm:$0xff]  }
 0x19f   :  { %5475 = vmatpush1.bf16.msra.mxu1 %v8059_v39  ;;  %v8137_v39 = vld [vmem:[%s11581_s1 + $0xc88] ss:$16 sps:$4 sm:$0xff]  }
 0x1a0   :  { %5045 = vmatpush1.bf16.msra.mxu0 %v8056_v38  ;;  %5476 = vmatprep.subr.bf16.mxu1 %v8067_v15  ;;  %v8134_v38 = vld [vmem:[%s11581_s1 + $0x1080] ss:$16 sps:$4 sm:$0xff]   ;;  %v8145_v15 = vld [vmem:[%s11581_s1 + $0xcac] ss:$16 sps:$4 sm:$0xff]  }
 0x1a1   :  { %5046 = vmatprep.subr.bf16.mxu0 %v8064_v40  ;;  %v8142_v40 = vld [vmem:[%s11581_s1 + $0x10a4] ss:$16 sps:$4 sm:$0xff]  }
 0x1a3   :  { %5477 = vmatpush1.bf16.msra.mxu1 %v8065_v43  ;;  %v8143_v43 = vld [vmem:[%s11581_s1 + $0xca8] ss:$16 sps:$4 sm:$0xff]  }
 0x1a4   :  { %5047 = vmatpush1.bf16.msra.mxu0 %v8062_v42  ;;  %5478 = vmatprep.subr.bf16.mxu1 %v8073_v45  ;;  %v8140_v42 = vld [vmem:[%s11581_s1 + $0x10a0] ss:$16 sps:$4 sm:$0xff]   ;;  %v8151_v45 = vld [vmem:[%s11581_s1 + $0xccc] ss:$16 sps:$4 sm:$0xff]  }
 0x1a5   :  { %5048 = vmatprep.subr.bf16.mxu0 %v8070_v44  ;;  %v8148_v44 = vld [vmem:[%s11581_s1 + $0x10c4] ss:$16 sps:$4 sm:$0xff]  }
 0x1a7   :  { %5479 = vmatpush1.bf16.msra.mxu1 %v8071_v48  ;;  %v8149_v48 = vld [vmem:[%s11581_s1 + $0xcc8] ss:$16 sps:$4 sm:$0xff]  }
 0x1a8   :  { %5049 = vmatpush1.bf16.msra.mxu0 %v8068_v47  ;;  %5480 = vmatprep.subr.bf16.mxu1 %v8079_v24  ;;  %v8146_v47 = vld [vmem:[%s11581_s1 + $0x10c0] ss:$16 sps:$4 sm:$0xff]   ;;  %v8157_v24 = vld [vmem:[%s11581_s1 + $0xcec] ss:$16 sps:$4 sm:$0xff]  }
 0x1a9   :  { %5050 = vmatprep.subr.bf16.mxu0 %v8076_v49  ;;  %v8154_v49 = vld [vmem:[%s11581_s1 + $0x10e4] ss:$16 sps:$4 sm:$0xff]  }
 0x1ab   :  { %5481 = vmatpush1.bf16.msra.mxu1 %v8077_v51  ;;  %v8155_v51 = vld [vmem:[%s11581_s1 + $0xce8] ss:$16 sps:$4 sm:$0xff]  }
 0x1ac   :  { %5051 = vmatpush1.bf16.msra.mxu0 %v8074_v50  ;;  %5482 = vmatprep.subr.bf16.mxu1 %v8085_v32  ;;  %v8152_v50 = vld [vmem:[%s11581_s1 + $0x10e0] ss:$16 sps:$4 sm:$0xff]   ;;  %v8163_v32 = vld [vmem:[%s11581_s1 + $0xd0c] ss:$16 sps:$4 sm:$0xff]  }
 0x1ad   :  { %5052 = vmatprep.subr.bf16.mxu0 %v8082_v52  ;;  %v8160_v52 = vld [vmem:[%s11581_s1 + $0x1104] ss:$16 sps:$4 sm:$0xff]  }
 0x1af   :  { %5483 = vmatpush1.bf16.msra.mxu1 %v8083_v56  ;;  %v8161_v56 = vld [vmem:[%s11581_s1 + $0xd08] ss:$16 sps:$4 sm:$0xff]  }
 0x1b0   :  { %5053 = vmatpush1.bf16.msra.mxu0 %v8080_v54  ;;  %5484 = vmatprep.subr.bf16.mxu1 %v8091_v58  ;;  %v8158_v54 = vld [vmem:[%s11581_s1 + $0x1100] ss:$16 sps:$4 sm:$0xff]   ;;  %v8169_v58 = vld [vmem:[%s11581_s1 + $0xd2c] ss:$16 sps:$4 sm:$0xff]  }
 0x1b1   :  { %5054 = vmatprep.subr.bf16.mxu0 %v8088_v57  ;;  %v8166_v57 = vld [vmem:[%s11581_s1 + $0x1124] ss:$16 sps:$4 sm:$0xff]  }
 0x1b3   :  { %5485 = vmatpush1.bf16.msra.mxu1 %v8089_v61  ;;  %v8167_v61 = vld [vmem:[%s11581_s1 + $0xd28] ss:$16 sps:$4 sm:$0xff]  }
 0x1b4   :  { %5055 = vmatpush1.bf16.msra.mxu0 %v8086_v60  ;;  %5486 = vmatprep.subr.bf16.mxu1 %v8097_v33  ;;  %v8164_v60 = vld [vmem:[%s11581_s1 + $0x1120] ss:$16 sps:$4 sm:$0xff]   ;;  %v8175_v33 = vld [vmem:[%s11581_s1 + $0xd4c] ss:$16 sps:$4 sm:$0xff]  }
 0x1b5   :  { %5056 = vmatprep.subr.bf16.mxu0 %v8094_v62  ;;  %v8172_v62 = vld [vmem:[%s11581_s1 + $0x1144] ss:$16 sps:$4 sm:$0xff]  }
 0x1b7   :  { %5487 = vmatpush1.bf16.msra.mxu1 %v8095_v0  ;;  %v8173_v0 = vld [vmem:[%s11581_s1 + $0xd48] ss:$16 sps:$4 sm:$0xff]  }
 0x1b8   :  { %5057 = vmatpush1.bf16.msra.mxu0 %v8092_v63  ;;  %5488 = vmatprep.subr.bf16.mxu1 %v8103_v37  ;;  %v8170_v63 = vld [vmem:[%s11581_s1 + $0x1140] ss:$16 sps:$4 sm:$0xff]   ;;  %v8181_v37 = vld [vmem:[%s11581_s1 + $0xd6c] ss:$16 sps:$4 sm:$0xff]  }
 0x1b9   :  { %5058 = vmatprep.subr.bf16.mxu0 %v8100_v1  ;;  %v8178_v1 = vld [vmem:[%s11581_s1 + $0x1164] ss:$16 sps:$4 sm:$0xff]  }
 0x1bb   :  { %5489 = vmatpush1.bf16.msra.mxu1 %v8101_v8  ;;  %v8179_v8 = vld [vmem:[%s11581_s1 + $0xd68] ss:$16 sps:$4 sm:$0xff]  }
 0x1bc   :  { %5059 = vmatpush1.bf16.msra.mxu0 %v8098_v6  ;;  %5490 = vmatprep.subr.bf16.mxu1 %v8109_v10  ;;  %v8176_v6 = vld [vmem:[%s11581_s1 + $0x1160] ss:$16 sps:$4 sm:$0xff]   ;;  %v8187_v10 = vld [vmem:[%s11581_s1 + $0xd8c] ss:$16 sps:$4 sm:$0xff]  }
 0x1bd   :  { %5060 = vmatprep.subr.bf16.mxu0 %v8106_v9  ;;  %v8184_v9 = vld [vmem:[%s11581_s1 + $0x1184] ss:$16 sps:$4 sm:$0xff]  }
 0x1bf   :  { %5491 = vmatpush1.bf16.msra.mxu1 %v8107_v14  ;;  %v8185_v14 = vld [vmem:[%s11581_s1 + $0xd88] ss:$16 sps:$4 sm:$0xff]  }
 0x1c0   :  { %5061 = vmatpush1.bf16.msra.mxu0 %v8104_v13  ;;  %5503 = vmatprep.subr.bf16.mxu1 %v8115_v41  ;;  %v8182_v13 = vld [vmem:[%s11581_s1 + $0x1180] ss:$16 sps:$4 sm:$0xff]   ;;  %v8193_v41 = vld [vmem:[%s11581_s1 + $0xdac] ss:$16 sps:$4 sm:$0xff]  }
 0x1c1   :  { %5073 = vmatprep.subr.bf16.mxu0 %v8112_v16  ;;  %v8190_v16 = vld [vmem:[%s11581_s1 + $0x11a4] ss:$16 sps:$4 sm:$0xff]  }
 0x1c2   :  { %5493 = vmatmul.mubr.bf16.vlgmr.msra.gmra.mrb[4].mxu1 %v9842_v53  ;;  %v8127_v53 = vld [vmem:[%s11581_s1 + $0xc4c] ss:$16 sps:$4 sm:$0xff]  }
 0x1c3   :  { %5063 = vmatmul.mubr.bf16.vlgmr.msra.gmra.mrb[0].mxu0 %v10266_v20  ;;  %5504 = vmatpush1.bf16.msra.mxu1 %v8113_v22  ;;  %v8197_v22 = vld [vmem:[%s11581_s1 + $0xdc8] ss:$16 sps:$4 sm:$0xff]  }
 0x1c4   :  { %5074 = vmatpush1.bf16.msra.mxu0 %v8110_v21  ;;  %5505 = vmatprep.subr.bf16.mxu1 %v8121_v25  ;;  %v8194_v21 = vld [vmem:[%s11581_s1 + $0x11c0] ss:$16 sps:$4 sm:$0xff]   ;;  %v8205_v25 = vld [vmem:[%s11581_s1 + $0xdec] ss:$16 sps:$4 sm:$0xff]  }
 0x1c5   :  { %5075 = vmatprep.subr.bf16.mxu0 %v8118_v23  ;;  %5105 = vmatprep.mubr.bf16.mxu0 %v10280_v26  ;;  %v8202_v23 = vld [vmem:[%s11581_s1 + $0x11e4] ss:$16 sps:$4 sm:$0xff]  }
 0x1c6   :  { %5535 = vmatprep.mubr.bf16.mxu1 %v9856_v59  ;;  %v8133_v59 = vld [vmem:[%s11581_s1 + $0xc6c] ss:$16 sps:$4 sm:$0xff]  }
 0x1c7   :  { %5506 = vmatpush1.bf16.msra.mxu1 %v8119_v28  ;;  %v8203_v28 = vld [vmem:[%s11581_s1 + $0xde8] ss:$16 sps:$4 sm:$0xff]  }
 0x1c8   :  { %5076 = vmatpush1.bf16.msra.mxu0 %v8116_v27  ;;  %5507 = vmatprep.subr.bf16.mxu1 %v8127_v53  ;;  %v8200_v27 = vld [vmem:[%s11581_s1 + $0x11e0] ss:$16 sps:$4 sm:$0xff]  }
 0x1c9   :  { %5077 = vmatprep.subr.bf16.mxu0 %v8124_v29  ;;  %v43_v29 = vld [vmem:[%s11582_s0 + $0x80] sm:$0xff] }
 0x1ca   :  { %v67_v53 = vld [vmem:[%s11582_s0 + $0x140] sm:$0xff] }
 0x1cb   :  { %5508 = vmatpush1.bf16.msra.mxu1 %v8125_v12  ;;  %v8211_v12 = vld [vmem:[%s11581_s1 + $0xe0c] ss:$16 sps:$4 sm:$0xff]  }
 0x1cc   :  { %5078 = vmatpush1.bf16.msra.mxu0 %v8122_v30  ;;  %5509 = vmatprep.subr.bf16.mxu1 %v8133_v59  ;;  %v8208_v30 = vld [vmem:[%s11581_s1 + $0x1204] ss:$16 sps:$4 sm:$0xff]   ;;  %v46_v59 = vld [vmem:[%s11582_s0 + $0x98] sm:$0xff] }
 0x1cd   :  { %5079 = vmatprep.subr.bf16.mxu0 %v8130_v31  ;;  %v10472_v31 = vpack.c.bf16 %v67_v53, %v43_v29  ;;  %v8286_v29 = vld [vmem:[%s11581_s1 + $0x13a4] ss:$16 sps:$4 sm:$0xff]   ;;  %v8289_v53 = vld [vmem:[%s11581_s1 + $0xfac] ss:$16 sps:$4 sm:$0xff]  }
 0x1cf   :  { %5510 = vmatpush1.bf16.msra.mxu1 %v8131_v35  ;;  %v8206_v35 = vld [vmem:[%s11581_s1 + $0x1200] ss:$16 sps:$4 sm:$0xff]  }
 0x1d0   :  { %5080 = vmatpush1.bf16.msra.mxu0 %v8128_v34  ;;  %5511 = vmatprep.subr.bf16.mxu1 %v8139_v36  ;;  %v70_v34 = vld [vmem:[%s11582_s0 + $0x158] sm:$0xff]  ;;  %v8214_v36 = vld [vmem:[%s11581_s1 + $0x1224] ss:$16 sps:$4 sm:$0xff]  }
 0x1d1   :  { %5081 = vmatprep.subr.bf16.mxu0 %v8136_v55  ;;  %v8209_v55 = vld [vmem:[%s11581_s1 + $0xe08] ss:$16 sps:$4 sm:$0xff]  }
 0x1d3   :  { %5512 = vmatpush1.bf16.msra.mxu1 %v8137_v39  ;;  %v10492_v39 = vpack.c.bf16 %v70_v34, %v46_v59  ;;  %v8292_v59 = vld [vmem:[%s11581_s1 + $0x13c4] ss:$16 sps:$4 sm:$0xff]   ;;  %v8295_v34 = vld [vmem:[%s11581_s1 + $0xfcc] ss:$16 sps:$4 sm:$0xff]  }
 0x1d4   :  { %5082 = vmatpush1.bf16.msra.mxu0 %v8134_v38  ;;  %5513 = vmatprep.subr.bf16.mxu1 %v8145_v15  ;;  %v8217_v38 = vld [vmem:[%s11581_s1 + $0xe2c] ss:$16 sps:$4 sm:$0xff]   ;;  %v8215_v15 = vld [vmem:[%s11581_s1 + $0xe28] ss:$16 sps:$4 sm:$0xff]  }
 0x1d5   :  { %5083 = vmatprep.subr.bf16.mxu0 %v8142_v40  ;;  %v8212_v40 = vld [vmem:[%s11581_s1 + $0x1220] ss:$16 sps:$4 sm:$0xff]  }
 0x1d7   :  { %5514 = vmatpush1.bf16.msra.mxu1 %v8143_v43  ;;  %v8218_v43 = vld [vmem:[%s11581_s1 + $0x1240] ss:$16 sps:$4 sm:$0xff]  }
 0x1d8   :  { %5084 = vmatpush1.bf16.msra.mxu0 %v8140_v42  ;;  %5515 = vmatprep.subr.bf16.mxu1 %v8151_v45  ;;  %v8220_v42 = vld [vmem:[%s11581_s1 + $0x1244] ss:$16 sps:$4 sm:$0xff]  }
 0x1d9   :  { %5085 = vmatprep.subr.bf16.mxu0 %v8148_v44  ;;  %v8221_v44 = vld [vmem:[%s11581_s1 + $0xe48] ss:$16 sps:$4 sm:$0xff]   ;;  %v8226_v45 = vld [vmem:[%s11581_s1 + $0x1264] ss:$16 sps:$4 sm:$0xff]  }
 0x1db   :  { %5516 = vmatpush1.bf16.msra.mxu1 %v8149_v48  ;;  %v8227_v48 = vld [vmem:[%s11581_s1 + $0xe68] ss:$16 sps:$4 sm:$0xff]  }
 0x1dc   :  { %5086 = vmatpush1.bf16.msra.mxu0 %v8146_v47  ;;  %5517 = vmatprep.subr.bf16.mxu1 %v8157_v24  ;;  %v8224_v47 = vld [vmem:[%s11581_s1 + $0x1260] ss:$16 sps:$4 sm:$0xff]   ;;  %v8235_v24 = vld [vmem:[%s11581_s1 + $0xe8c] ss:$16 sps:$4 sm:$0xff]  }
 0x1dd   :  { %5087 = vmatprep.subr.bf16.mxu0 %v8154_v49  ;;  %v8232_v49 = vld [vmem:[%s11581_s1 + $0x1284] ss:$16 sps:$4 sm:$0xff]  }
 0x1df   :  { %5518 = vmatpush1.bf16.msra.mxu1 %v8155_v51  ;;  %v8233_v51 = vld [vmem:[%s11581_s1 + $0xe88] ss:$16 sps:$4 sm:$0xff]  }
 0x1e0   :  { %5088 = vmatpush1.bf16.msra.mxu0 %v8152_v50  ;;  %5519 = vmatprep.subr.bf16.mxu1 %v8163_v32  ;;  %v8230_v50 = vld [vmem:[%s11581_s1 + $0x1280] ss:$16 sps:$4 sm:$0xff]   ;;  %v8241_v32 = vld [vmem:[%s11581_s1 + $0xeac] ss:$16 sps:$4 sm:$0xff]  }
 0x1e1   :  { %5089 = vmatprep.subr.bf16.mxu0 %v8160_v52  ;;  %v8238_v52 = vld [vmem:[%s11581_s1 + $0x12a4] ss:$16 sps:$4 sm:$0xff]  }
 0x1e3   :  { %5520 = vmatpush1.bf16.msra.mxu1 %v8161_v56  ;;  %v8239_v56 = vld [vmem:[%s11581_s1 + $0xea8] ss:$16 sps:$4 sm:$0xff]  }
 0x1e4   :  { %5090 = vmatpush1.bf16.msra.mxu0 %v8158_v54  ;;  %5521 = vmatprep.subr.bf16.mxu1 %v8169_v58  ;;  %v8236_v54 = vld [vmem:[%s11581_s1 + $0x12a0] ss:$16 sps:$4 sm:$0xff]   ;;  %v8247_v58 = vld [vmem:[%s11581_s1 + $0xecc] ss:$16 sps:$4 sm:$0xff]  }
 0x1e5   :  { %5091 = vmatprep.subr.bf16.mxu0 %v8166_v57  ;;  %v8244_v57 = vld [vmem:[%s11581_s1 + $0x12c4] ss:$16 sps:$4 sm:$0xff]  }
 0x1e7   :  { %5522 = vmatpush1.bf16.msra.mxu1 %v8167_v61  ;;  %v8245_v61 = vld [vmem:[%s11581_s1 + $0xec8] ss:$16 sps:$4 sm:$0xff]  }
 0x1e8   :  { %5092 = vmatpush1.bf16.msra.mxu0 %v8164_v60  ;;  %5523 = vmatprep.subr.bf16.mxu1 %v8175_v33  ;;  %v8242_v60 = vld [vmem:[%s11581_s1 + $0x12c0] ss:$16 sps:$4 sm:$0xff]   ;;  %v8253_v33 = vld [vmem:[%s11581_s1 + $0xeec] ss:$16 sps:$4 sm:$0xff]  }
 0x1e9   :  { %5093 = vmatprep.subr.bf16.mxu0 %v8172_v62  ;;  %v8250_v62 = vld [vmem:[%s11581_s1 + $0x12e4] ss:$16 sps:$4 sm:$0xff]  }
 0x1eb   :  { %5524 = vmatpush1.bf16.msra.mxu1 %v8173_v0  ;;  %v8251_v0 = vld [vmem:[%s11581_s1 + $0xee8] ss:$16 sps:$4 sm:$0xff]  }
 0x1ec   :  { %5094 = vmatpush1.bf16.msra.mxu0 %v8170_v63  ;;  %5525 = vmatprep.subr.bf16.mxu1 %v8181_v37  ;;  %v8248_v63 = vld [vmem:[%s11581_s1 + $0x12e0] ss:$16 sps:$4 sm:$0xff]   ;;  %v8259_v37 = vld [vmem:[%s11581_s1 + $0xf0c] ss:$16 sps:$4 sm:$0xff]  }
 0x1ed   :  { %5095 = vmatprep.subr.bf16.mxu0 %v8178_v1  ;;  %v8256_v1 = vld [vmem:[%s11581_s1 + $0x1304] ss:$16 sps:$4 sm:$0xff]  }
 0x1ef   :  { %5526 = vmatpush1.bf16.msra.mxu1 %v8179_v8  ;;  %v8257_v8 = vld [vmem:[%s11581_s1 + $0xf08] ss:$16 sps:$4 sm:$0xff]  }
 0x1f0   :  { %5096 = vmatpush1.bf16.msra.mxu0 %v8176_v6  ;;  %5527 = vmatprep.subr.bf16.mxu1 %v8187_v10  ;;  %v8254_v6 = vld [vmem:[%s11581_s1 + $0x1300] ss:$16 sps:$4 sm:$0xff]   ;;  %v8265_v10 = vld [vmem:[%s11581_s1 + $0xf2c] ss:$16 sps:$4 sm:$0xff]  }
 0x1f1   :  { %5097 = vmatprep.subr.bf16.mxu0 %v8184_v9  ;;  %v8262_v9 = vld [vmem:[%s11581_s1 + $0x1324] ss:$16 sps:$4 sm:$0xff]  }
 0x1f3   :  { %5528 = vmatpush1.bf16.msra.mxu1 %v8185_v14  ;;  %v8263_v14 = vld [vmem:[%s11581_s1 + $0xf28] ss:$16 sps:$4 sm:$0xff]  }
 0x1f4   :  { %5098 = vmatpush1.bf16.msra.mxu0 %v8182_v13  ;;  %5529 = vmatprep.subr.bf16.mxu1 %v8193_v41  ;;  %v8260_v13 = vld [vmem:[%s11581_s1 + $0x1320] ss:$16 sps:$4 sm:$0xff]   ;;  %v8271_v41 = vld [vmem:[%s11581_s1 + $0xf4c] ss:$16 sps:$4 sm:$0xff]  }
 0x1f5   :  { %5099 = vmatprep.subr.bf16.mxu0 %v8190_v16  ;;  %v8268_v16 = vld [vmem:[%s11581_s1 + $0x1344] ss:$16 sps:$4 sm:$0xff]  }
 0x1f7   :  { %5530 = vmatpush1.bf16.msra.mxu1 %v8191_v18  ;;  %v8269_v18 = vld [vmem:[%s11581_s1 + $0xf48] ss:$16 sps:$4 sm:$0xff]  }
 0x1f8   :  { %5100 = vmatpush1.bf16.msra.mxu0 %v8188_v17  ;;  %5531 = vmatprep.subr.bf16.mxu1 %v8199_v46  ;;  %v8266_v17 = vld [vmem:[%s11581_s1 + $0x1340] ss:$16 sps:$4 sm:$0xff]   ;;  %v8277_v46 = vld [vmem:[%s11581_s1 + $0xf6c] ss:$16 sps:$4 sm:$0xff]  }
 0x1f9   :  { %5101 = vmatprep.subr.bf16.mxu0 %v8196_v19  ;;  %v8274_v19 = vld [vmem:[%s11581_s1 + $0x1364] ss:$16 sps:$4 sm:$0xff]  }
 0x1fb   :  { %5532 = vmatpush1.bf16.msra.mxu1 %v8197_v22  ;;  %v8275_v22 = vld [vmem:[%s11581_s1 + $0xf68] ss:$16 sps:$4 sm:$0xff]  }
 0x1fc   :  { %5102 = vmatpush1.bf16.msra.mxu0 %v8194_v21  ;;  %5533 = vmatprep.subr.bf16.mxu1 %v8205_v25  ;;  %v8272_v21 = vld [vmem:[%s11581_s1 + $0x1360] ss:$16 sps:$4 sm:$0xff]   ;;  %v8283_v25 = vld [vmem:[%s11581_s1 + $0xf8c] ss:$16 sps:$4 sm:$0xff]  }
 0x1fd   :  { %5103 = vmatprep.subr.bf16.mxu0 %v8202_v23  ;;  %v8280_v23 = vld [vmem:[%s11581_s1 + $0x1384] ss:$16 sps:$4 sm:$0xff]  }
 0x1ff   :  { %5534 = vmatpush1.bf16.msra.mxu1 %v8203_v28  ;;  %v8281_v28 = vld [vmem:[%s11581_s1 + $0xf88] ss:$16 sps:$4 sm:$0xff]  }
 0x200   :  { %5104 = vmatpush1.bf16.msra.mxu0 %v8200_v27  ;;  %5546 = vmatprep.subr.bf16.mxu1 %v8211_v12  ;;  %v8278_v27 = vld [vmem:[%s11581_s1 + $0x1380] ss:$16 sps:$4 sm:$0xff]   ;;  %v8287_v12 = vld [vmem:[%s11581_s1 + $0xfa8] ss:$16 sps:$4 sm:$0xff]  }
 0x201   :  { %5116 = vmatprep.subr.bf16.mxu0 %v8208_v30  ;;  %v8284_v30 = vld [vmem:[%s11581_s1 + $0x13a0] ss:$16 sps:$4 sm:$0xff]  }
 0x202   :  { %5536 = vmatmul.mubr.bf16.vlgmr.msra.gmra.mrb[4].mxu1 %v10054_v4  ;;  %v8223_v4 = vld [vmem:[%s11581_s1 + $0xe4c] ss:$16 sps:$4 sm:$0xff]  }
 0x203   :  { %5106 = vmatmul.mubr.bf16.vlgmr.msra.gmra.mrb[0].mxu0 %v10472_v31  ;;  %5547 = vmatpush1.bf16.msra.mxu1 %v8209_v55  ;;  %v8293_v55 = vld [vmem:[%s11581_s1 + $0xfc8] ss:$16 sps:$4 sm:$0xff]  }
 0x204   :  { %5117 = vmatpush1.bf16.msra.mxu0 %v8206_v35  ;;  %5548 = vmatprep.subr.bf16.mxu1 %v8217_v38  ;;  %v8290_v35 = vld [vmem:[%s11581_s1 + $0x13c0] ss:$16 sps:$4 sm:$0xff]   ;;  %v8301_v38 = vld [vmem:[%s11581_s1 + $0xfec] ss:$16 sps:$4 sm:$0xff]  }
 0x205   :  { %5118 = vmatprep.subr.bf16.mxu0 %v8214_v36  ;;  %5148 = vmatprep.mubr.bf16.mxu0 %v10492_v39  ;;  %v8298_v36 = vld [vmem:[%s11581_s1 + $0x13e4] ss:$16 sps:$4 sm:$0xff]  }
 0x206   :  { %5578 = vmatprep.mubr.bf16.mxu1 %v10068_v11  ;;  %v8229_v11 = vld [vmem:[%s11581_s1 + $0xe6c] ss:$16 sps:$4 sm:$0xff]  }
 0x207   :  { %5549 = vmatpush1.bf16.msra.mxu1 %v8215_v15  ;;  %v8299_v15 = vld [vmem:[%s11581_s1 + $0xfe8] ss:$16 sps:$4 sm:$0xff]  }
 0x208   :  { %5119 = vmatpush1.bf16.msra.mxu0 %v8212_v40  ;;  %5550 = vmatprep.subr.bf16.mxu1 %v8223_v4  ;;  %v8296_v40 = vld [vmem:[%s11581_s1 + $0x13e0] ss:$16 sps:$4 sm:$0xff]  }
 0x209   :  { %5120 = vmatprep.subr.bf16.mxu0 %v8220_v42  ;;  %v45_v42 = vld [vmem:[%s11582_s0 + $0x90] sm:$0xff] }
 0x20a   :  { %v69_v4 = vld [vmem:[%s11582_s0 + $0x150] sm:$0xff] }
 0x20b   :  { %5551 = vmatpush1.bf16.msra.mxu1 %v8221_v44  ;;  %v8307_v44 = vld [vmem:[%s11581_s1 + $0x100c] ss:$16 sps:$4 sm:$0xff]  }
 0x20c   :  { %5121 = vmatpush1.bf16.msra.mxu0 %v8218_v43  ;;  %5552 = vmatprep.subr.bf16.mxu1 %v8229_v11  ;;  %v8304_v43 = vld [vmem:[%s11581_s1 + $0x1404] ss:$16 sps:$4 sm:$0xff]   ;;  %v48_v11 = vld [vmem:[%s11582_s0 + $0xa8] sm:$0xff] }
 0x20d   :  { %5122 = vmatprep.subr.bf16.mxu0 %v8226_v45  ;;  %v10684_v45 = vpack.c.bf16 %v69_v4, %v45_v42  ;;  %v8382_v42 = vld [vmem:[%s11581_s1 + $0x15a4] ss:$16 sps:$4 sm:$0xff]   ;;  %v8385_v4 = vld [vmem:[%s11581_s1 + $0x11ac] ss:$16 sps:$4 sm:$0xff]  }
 0x20f   :  { %5553 = vmatpush1.bf16.msra.mxu1 %v8227_v48  ;;  %v8302_v48 = vld [vmem:[%s11581_s1 + $0x1400] ss:$16 sps:$4 sm:$0xff]  }
 0x210   :  { %5123 = vmatpush1.bf16.msra.mxu0 %v8224_v47  ;;  %5554 = vmatprep.subr.bf16.mxu1 %v8235_v24  ;;  %v72_v47 = vld [vmem:[%s11582_s0 + $0x168] sm:$0xff]  ;;  %v8310_v24 = vld [vmem:[%s11581_s1 + $0x1424] ss:$16 sps:$4 sm:$0xff]  }
 0x211   :  { %5124 = vmatprep.subr.bf16.mxu0 %v8232_v49  ;;  %v8305_v49 = vld [vmem:[%s11581_s1 + $0x1008] ss:$16 sps:$4 sm:$0xff]  }
 0x213   :  { %5555 = vmatpush1.bf16.msra.mxu1 %v8233_v51  ;;  %v10704_v51 = vpack.c.bf16 %v72_v47, %v48_v11  ;;  %v8388_v11 = vld [vmem:[%s11581_s1 + $0x15c4] ss:$16 sps:$4 sm:$0xff]   ;;  %v8391_v47 = vld [vmem:[%s11581_s1 + $0x11cc] ss:$16 sps:$4 sm:$0xff]  }
 0x214   :  { %5125 = vmatpush1.bf16.msra.mxu0 %v8230_v50  ;;  %5556 = vmatprep.subr.bf16.mxu1 %v8241_v32  ;;  %v8313_v50 = vld [vmem:[%s11581_s1 + $0x102c] ss:$16 sps:$4 sm:$0xff]   ;;  %v8311_v32 = vld [vmem:[%s11581_s1 + $0x1028] ss:$16 sps:$4 sm:$0xff]  }
 0x215   :  { %5126 = vmatprep.subr.bf16.mxu0 %v8238_v52  ;;  %v8308_v52 = vld [vmem:[%s11581_s1 + $0x1420] ss:$16 sps:$4 sm:$0xff]  }
 0x217   :  { %5557 = vmatpush1.bf16.msra.mxu1 %v8239_v56  ;;  %v8314_v56 = vld [vmem:[%s11581_s1 + $0x1440] ss:$16 sps:$4 sm:$0xff]  }
 0x218   :  { %5127 = vmatpush1.bf16.msra.mxu0 %v8236_v54  ;;  %5558 = vmatprep.subr.bf16.mxu1 %v8247_v58  ;;  %v8316_v54 = vld [vmem:[%s11581_s1 + $0x1444] ss:$16 sps:$4 sm:$0xff]  }
 0x219   :  { %5128 = vmatprep.subr.bf16.mxu0 %v8244_v57  ;;  %v8317_v57 = vld [vmem:[%s11581_s1 + $0x1048] ss:$16 sps:$4 sm:$0xff]   ;;  %v8322_v58 = vld [vmem:[%s11581_s1 + $0x1464] ss:$16 sps:$4 sm:$0xff]  }
 0x21b   :  { %5559 = vmatpush1.bf16.msra.mxu1 %v8245_v61  ;;  %v8323_v61 = vld [vmem:[%s11581_s1 + $0x1068] ss:$16 sps:$4 sm:$0xff]  }
 0x21c   :  { %5129 = vmatpush1.bf16.msra.mxu0 %v8242_v60  ;;  %5560 = vmatprep.subr.bf16.mxu1 %v8253_v33  ;;  %v8320_v60 = vld [vmem:[%s11581_s1 + $0x1460] ss:$16 sps:$4 sm:$0xff]   ;;  %v8331_v33 = vld [vmem:[%s11581_s1 + $0x108c] ss:$16 sps:$4 sm:$0xff]  }
 0x21d   :  { %5130 = vmatprep.subr.bf16.mxu0 %v8250_v62  ;;  %v8328_v62 = vld [vmem:[%s11581_s1 + $0x1484] ss:$16 sps:$4 sm:$0xff]  }
 0x21f   :  { %5561 = vmatpush1.bf16.msra.mxu1 %v8251_v0  ;;  %v8329_v0 = vld [vmem:[%s11581_s1 + $0x1088] ss:$16 sps:$4 sm:$0xff]  }
 0x220   :  { %5131 = vmatpush1.bf16.msra.mxu0 %v8248_v63  ;;  %5562 = vmatprep.subr.bf16.mxu1 %v8259_v37  ;;  %v8326_v63 = vld [vmem:[%s11581_s1 + $0x1480] ss:$16 sps:$4 sm:$0xff]   ;;  %v8337_v37 = vld [vmem:[%s11581_s1 + $0x10ac] ss:$16 sps:$4 sm:$0xff]  }
 0x221   :  { %5132 = vmatprep.subr.bf16.mxu0 %v8256_v1  ;;  %v8334_v1 = vld [vmem:[%s11581_s1 + $0x14a4] ss:$16 sps:$4 sm:$0xff]  }
 0x223   :  { %5563 = vmatpush1.bf16.msra.mxu1 %v8257_v8  ;;  %v8335_v8 = vld [vmem:[%s11581_s1 + $0x10a8] ss:$16 sps:$4 sm:$0xff]  }
 0x224   :  { %5133 = vmatpush1.bf16.msra.mxu0 %v8254_v6  ;;  %5564 = vmatprep.subr.bf16.mxu1 %v8265_v10  ;;  %v8332_v6 = vld [vmem:[%s11581_s1 + $0x14a0] ss:$16 sps:$4 sm:$0xff]   ;;  %v8343_v10 = vld [vmem:[%s11581_s1 + $0x10cc] ss:$16 sps:$4 sm:$0xff]  }
 0x225   :  { %5134 = vmatprep.subr.bf16.mxu0 %v8262_v9  ;;  %v8340_v9 = vld [vmem:[%s11581_s1 + $0x14c4] ss:$16 sps:$4 sm:$0xff]  }
 0x227   :  { %5565 = vmatpush1.bf16.msra.mxu1 %v8263_v14  ;;  %v8341_v14 = vld [vmem:[%s11581_s1 + $0x10c8] ss:$16 sps:$4 sm:$0xff]  }
 0x228   :  { %5135 = vmatpush1.bf16.msra.mxu0 %v8260_v13  ;;  %5566 = vmatprep.subr.bf16.mxu1 %v8271_v41  ;;  %v8338_v13 = vld [vmem:[%s11581_s1 + $0x14c0] ss:$16 sps:$4 sm:$0xff]   ;;  %v8349_v41 = vld [vmem:[%s11581_s1 + $0x10ec] ss:$16 sps:$4 sm:$0xff]  }
 0x229   :  { %5136 = vmatprep.subr.bf16.mxu0 %v8268_v16  ;;  %v8346_v16 = vld [vmem:[%s11581_s1 + $0x14e4] ss:$16 sps:$4 sm:$0xff]  }
 0x22b   :  { %5567 = vmatpush1.bf16.msra.mxu1 %v8269_v18  ;;  %v8347_v18 = vld [vmem:[%s11581_s1 + $0x10e8] ss:$16 sps:$4 sm:$0xff]  }
 0x22c   :  { %5137 = vmatpush1.bf16.msra.mxu0 %v8266_v17  ;;  %5568 = vmatprep.subr.bf16.mxu1 %v8277_v46  ;;  %v8344_v17 = vld [vmem:[%s11581_s1 + $0x14e0] ss:$16 sps:$4 sm:$0xff]   ;;  %v8355_v46 = vld [vmem:[%s11581_s1 + $0x110c] ss:$16 sps:$4 sm:$0xff]  }
 0x22d   :  { %5138 = vmatprep.subr.bf16.mxu0 %v8274_v19  ;;  %v8352_v19 = vld [vmem:[%s11581_s1 + $0x1504] ss:$16 sps:$4 sm:$0xff]  }
 0x22f   :  { %5569 = vmatpush1.bf16.msra.mxu1 %v8275_v22  ;;  %v8353_v22 = vld [vmem:[%s11581_s1 + $0x1108] ss:$16 sps:$4 sm:$0xff]  }
 0x230   :  { %5139 = vmatpush1.bf16.msra.mxu0 %v8272_v21  ;;  %5570 = vmatprep.subr.bf16.mxu1 %v8283_v25  ;;  %v8350_v21 = vld [vmem:[%s11581_s1 + $0x1500] ss:$16 sps:$4 sm:$0xff]   ;;  %v8361_v25 = vld [vmem:[%s11581_s1 + $0x112c] ss:$16 sps:$4 sm:$0xff]  }
 0x231   :  { %5140 = vmatprep.subr.bf16.mxu0 %v8280_v23  ;;  %v8358_v23 = vld [vmem:[%s11581_s1 + $0x1524] ss:$16 sps:$4 sm:$0xff]  }
 0x233   :  { %5571 = vmatpush1.bf16.msra.mxu1 %v8281_v28  ;;  %v8359_v28 = vld [vmem:[%s11581_s1 + $0x1128] ss:$16 sps:$4 sm:$0xff]  }
 0x234   :  { %5141 = vmatpush1.bf16.msra.mxu0 %v8278_v27  ;;  %5572 = vmatprep.subr.bf16.mxu1 %v8289_v53  ;;  %v8356_v27 = vld [vmem:[%s11581_s1 + $0x1520] ss:$16 sps:$4 sm:$0xff]   ;;  %v8367_v53 = vld [vmem:[%s11581_s1 + $0x114c] ss:$16 sps:$4 sm:$0xff]  }
 0x235   :  { %5142 = vmatprep.subr.bf16.mxu0 %v8286_v29  ;;  %v8364_v29 = vld [vmem:[%s11581_s1 + $0x1544] ss:$16 sps:$4 sm:$0xff]  }
 0x237   :  { %5573 = vmatpush1.bf16.msra.mxu1 %v8287_v12  ;;  %v8365_v12 = vld [vmem:[%s11581_s1 + $0x1148] ss:$16 sps:$4 sm:$0xff]  }
 0x238   :  { %5143 = vmatpush1.bf16.msra.mxu0 %v8284_v30  ;;  %5574 = vmatprep.subr.bf16.mxu1 %v8295_v34  ;;  %v8362_v30 = vld [vmem:[%s11581_s1 + $0x1540] ss:$16 sps:$4 sm:$0xff]   ;;  %v8373_v34 = vld [vmem:[%s11581_s1 + $0x116c] ss:$16 sps:$4 sm:$0xff]  }
 0x239   :  { %5144 = vmatprep.subr.bf16.mxu0 %v8292_v59  ;;  %v8370_v59 = vld [vmem:[%s11581_s1 + $0x1564] ss:$16 sps:$4 sm:$0xff]  }
 0x23b   :  { %5575 = vmatpush1.bf16.msra.mxu1 %v8293_v55  ;;  %v8371_v55 = vld [vmem:[%s11581_s1 + $0x1168] ss:$16 sps:$4 sm:$0xff]  }
 0x23c   :  { %5145 = vmatpush1.bf16.msra.mxu0 %v8290_v35  ;;  %5576 = vmatprep.subr.bf16.mxu1 %v8301_v38  ;;  %v8368_v35 = vld [vmem:[%s11581_s1 + $0x1560] ss:$16 sps:$4 sm:$0xff]   ;;  %v8379_v38 = vld [vmem:[%s11581_s1 + $0x118c] ss:$16 sps:$4 sm:$0xff]  }
 0x23d   :  { %5146 = vmatprep.subr.bf16.mxu0 %v8298_v36  ;;  %v8376_v36 = vld [vmem:[%s11581_s1 + $0x1584] ss:$16 sps:$4 sm:$0xff]  }
 0x23f   :  { %5577 = vmatpush1.bf16.msra.mxu1 %v8299_v15  ;;  %v8377_v15 = vld [vmem:[%s11581_s1 + $0x1188] ss:$16 sps:$4 sm:$0xff]  }
 0x240   :  { %5147 = vmatpush1.bf16.msra.mxu0 %v8296_v40  ;;  %5589 = vmatprep.subr.bf16.mxu1 %v8307_v44  ;;  %v8374_v40 = vld [vmem:[%s11581_s1 + $0x1580] ss:$16 sps:$4 sm:$0xff]   ;;  %v8383_v44 = vld [vmem:[%s11581_s1 + $0x11a8] ss:$16 sps:$4 sm:$0xff]  }
 0x241   :  { %5159 = vmatprep.subr.bf16.mxu0 %v8304_v43  ;;  %v8380_v43 = vld [vmem:[%s11581_s1 + $0x15a0] ss:$16 sps:$4 sm:$0xff]  }
 0x242   :  { %5579 = vmatmul.mubr.bf16.vlgmr.msra.gmra.mrb[4].mxu1 %v10266_v20  ;;  %v8319_v20 = vld [vmem:[%s11581_s1 + $0x104c] ss:$16 sps:$4 sm:$0xff]  }
 0x243   :  { %5149 = vmatmul.mubr.bf16.vlgmr.msra.gmra.mrb[0].mxu0 %v10684_v45  ;;  %5590 = vmatpush1.bf16.msra.mxu1 %v8305_v49  ;;  %v8389_v49 = vld [vmem:[%s11581_s1 + $0x11c8] ss:$16 sps:$4 sm:$0xff]  }
 0x244   :  { %5160 = vmatpush1.bf16.msra.mxu0 %v8302_v48  ;;  %5591 = vmatprep.subr.bf16.mxu1 %v8313_v50  ;;  %v8386_v48 = vld [vmem:[%s11581_s1 + $0x15c0] ss:$16 sps:$4 sm:$0xff]   ;;  %v8397_v50 = vld [vmem:[%s11581_s1 + $0x11ec] ss:$16 sps:$4 sm:$0xff]  }
 0x245   :  { %5161 = vmatprep.subr.bf16.mxu0 %v8310_v24  ;;  %5191 = vmatprep.mubr.bf16.mxu0 %v10704_v51  ;;  %v8394_v24 = vld [vmem:[%s11581_s1 + $0x15e4] ss:$16 sps:$4 sm:$0xff]  }
 0x246   :  { %5621 = vmatprep.mubr.bf16.mxu1 %v10280_v26  ;;  %v8325_v26 = vld [vmem:[%s11581_s1 + $0x106c] ss:$16 sps:$4 sm:$0xff]  }
 0x247   :  { %5592 = vmatpush1.bf16.msra.mxu1 %v8311_v32  ;;  %v8395_v32 = vld [vmem:[%s11581_s1 + $0x11e8] ss:$16 sps:$4 sm:$0xff]  }
 0x248   :  { %5162 = vmatpush1.bf16.msra.mxu0 %v8308_v52  ;;  %5593 = vmatprep.subr.bf16.mxu1 %v8319_v20  ;;  %v8392_v52 = vld [vmem:[%s11581_s1 + $0x15e0] ss:$16 sps:$4 sm:$0xff]  }
 0x249   :  { %5163 = vmatprep.subr.bf16.mxu0 %v8316_v54  ;;  %v47_v54 = vld [vmem:[%s11582_s0 + $0xa0] sm:$0xff] }
 0x24a   :  { %v71_v20 = vld [vmem:[%s11582_s0 + $0x160] sm:$0xff] }
 0x24b   :  { %5594 = vmatpush1.bf16.msra.mxu1 %v8317_v57  ;;  %v8403_v57 = vld [vmem:[%s11581_s1 + $0x120c] ss:$16 sps:$4 sm:$0xff]  }
 0x24c   :  { %5164 = vmatpush1.bf16.msra.mxu0 %v8314_v56  ;;  %5595 = vmatprep.subr.bf16.mxu1 %v8325_v26  ;;  %v8400_v56 = vld [vmem:[%s11581_s1 + $0x1604] ss:$16 sps:$4 sm:$0xff]   ;;  %v50_v26 = vld [vmem:[%s11582_s0 + $0xb8] sm:$0xff] }
 0x24d   :  { %5165 = vmatprep.subr.bf16.mxu0 %v8322_v58  ;;  %v10896_v58 = vpack.c.bf16 %v71_v20, %v47_v54  ;;  %v8478_v54 = vld [vmem:[%s11581_s1 + $0x17a4] ss:$16 sps:$4 sm:$0xff]   ;;  %v8481_v20 = vld [vmem:[%s11581_s1 + $0x13ac] ss:$16 sps:$4 sm:$0xff]  }
 0x24f   :  { %5596 = vmatpush1.bf16.msra.mxu1 %v8323_v61  ;;  %v8398_v61 = vld [vmem:[%s11581_s1 + $0x1600] ss:$16 sps:$4 sm:$0xff]  }
 0x250   :  { %5166 = vmatpush1.bf16.msra.mxu0 %v8320_v60  ;;  %5597 = vmatprep.subr.bf16.mxu1 %v8331_v33  ;;  %v74_v60 = vld [vmem:[%s11582_s0 + $0x178] sm:$0xff]  ;;  %v8406_v33 = vld [vmem:[%s11581_s1 + $0x1624] ss:$16 sps:$4 sm:$0xff]  }
 0x251   :  { %5167 = vmatprep.subr.bf16.mxu0 %v8328_v62  ;;  %v8401_v62 = vld [vmem:[%s11581_s1 + $0x1208] ss:$16 sps:$4 sm:$0xff]  }
 0x253   :  { %5598 = vmatpush1.bf16.msra.mxu1 %v8329_v0  ;;  %v10916_v0 = vpack.c.bf16 %v74_v60, %v50_v26  ;;  %v8484_v26 = vld [vmem:[%s11581_s1 + $0x17c4] ss:$16 sps:$4 sm:$0xff]   ;;  %v8487_v60 = vld [vmem:[%s11581_s1 + $0x13cc] ss:$16 sps:$4 sm:$0xff]  }
 0x254   :  { %5168 = vmatpush1.bf16.msra.mxu0 %v8326_v63  ;;  %5599 = vmatprep.subr.bf16.mxu1 %v8337_v37  ;;  %v8409_v63 = vld [vmem:[%s11581_s1 + $0x122c] ss:$16 sps:$4 sm:$0xff]   ;;  %v8407_v37 = vld [vmem:[%s11581_s1 + $0x1228] ss:$16 sps:$4 sm:$0xff]  }
 0x255   :  { %5169 = vmatprep.subr.bf16.mxu0 %v8334_v1  ;;  %v8404_v1 = vld [vmem:[%s11581_s1 + $0x1620] ss:$16 sps:$4 sm:$0xff]  }
 0x257   :  { %5600 = vmatpush1.bf16.msra.mxu1 %v8335_v8  ;;  %v8410_v8 = vld [vmem:[%s11581_s1 + $0x1640] ss:$16 sps:$4 sm:$0xff]  }
 0x258   :  { %5170 = vmatpush1.bf16.msra.mxu0 %v8332_v6  ;;  %5601 = vmatprep.subr.bf16.mxu1 %v8343_v10  ;;  %v8412_v6 = vld [vmem:[%s11581_s1 + $0x1644] ss:$16 sps:$4 sm:$0xff]  }
 0x259   :  { %5171 = vmatprep.subr.bf16.mxu0 %v8340_v9  ;;  %v8413_v9 = vld [vmem:[%s11581_s1 + $0x1248] ss:$16 sps:$4 sm:$0xff]   ;;  %v8418_v10 = vld [vmem:[%s11581_s1 + $0x1664] ss:$16 sps:$4 sm:$0xff]  }
 0x25b   :  { %5602 = vmatpush1.bf16.msra.mxu1 %v8341_v14  ;;  %v8419_v14 = vld [vmem:[%s11581_s1 + $0x1268] ss:$16 sps:$4 sm:$0xff]  }
 0x25c   :  { %5172 = vmatpush1.bf16.msra.mxu0 %v8338_v13  ;;  %5603 = vmatprep.subr.bf16.mxu1 %v8349_v41  ;;  %v8416_v13 = vld [vmem:[%s11581_s1 + $0x1660] ss:$16 sps:$4 sm:$0xff]   ;;  %v8427_v41 = vld [vmem:[%s11581_s1 + $0x128c] ss:$16 sps:$4 sm:$0xff]  }
 0x25d   :  { %5173 = vmatprep.subr.bf16.mxu0 %v8346_v16  ;;  %v8424_v16 = vld [vmem:[%s11581_s1 + $0x1684] ss:$16 sps:$4 sm:$0xff]  }
 0x25f   :  { %5604 = vmatpush1.bf16.msra.mxu1 %v8347_v18  ;;  %v8425_v18 = vld [vmem:[%s11581_s1 + $0x1288] ss:$16 sps:$4 sm:$0xff]  }
 0x260   :  { %5174 = vmatpush1.bf16.msra.mxu0 %v8344_v17  ;;  %5605 = vmatprep.subr.bf16.mxu1 %v8355_v46  ;;  %v8422_v17 = vld [vmem:[%s11581_s1 + $0x1680] ss:$16 sps:$4 sm:$0xff]   ;;  %v8433_v46 = vld [vmem:[%s11581_s1 + $0x12ac] ss:$16 sps:$4 sm:$0xff]  }
 0x261   :  { %5175 = vmatprep.subr.bf16.mxu0 %v8352_v19  ;;  %v8430_v19 = vld [vmem:[%s11581_s1 + $0x16a4] ss:$16 sps:$4 sm:$0xff]  }
 0x263   :  { %5606 = vmatpush1.bf16.msra.mxu1 %v8353_v22  ;;  %v8431_v22 = vld [vmem:[%s11581_s1 + $0x12a8] ss:$16 sps:$4 sm:$0xff]  }
 0x264   :  { %5176 = vmatpush1.bf16.msra.mxu0 %v8350_v21  ;;  %5607 = vmatprep.subr.bf16.mxu1 %v8361_v25  ;;  %v8428_v21 = vld [vmem:[%s11581_s1 + $0x16a0] ss:$16 sps:$4 sm:$0xff]   ;;  %v8439_v25 = vld [vmem:[%s11581_s1 + $0x12cc] ss:$16 sps:$4 sm:$0xff]  }
 0x265   :  { %5177 = vmatprep.subr.bf16.mxu0 %v8358_v23  ;;  %v8436_v23 = vld [vmem:[%s11581_s1 + $0x16c4] ss:$16 sps:$4 sm:$0xff]  }
 0x267   :  { %5608 = vmatpush1.bf16.msra.mxu1 %v8359_v28  ;;  %v8437_v28 = vld [vmem:[%s11581_s1 + $0x12c8] ss:$16 sps:$4 sm:$0xff]  }
 0x268   :  { %5178 = vmatpush1.bf16.msra.mxu0 %v8356_v27  ;;  %5609 = vmatprep.subr.bf16.mxu1 %v8367_v53  ;;  %v8434_v27 = vld [vmem:[%s11581_s1 + $0x16c0] ss:$16 sps:$4 sm:$0xff]   ;;  %v8445_v53 = vld [vmem:[%s11581_s1 + $0x12ec] ss:$16 sps:$4 sm:$0xff]  }
 0x269   :  { %5179 = vmatprep.subr.bf16.mxu0 %v8364_v29  ;;  %v8442_v29 = vld [vmem:[%s11581_s1 + $0x16e4] ss:$16 sps:$4 sm:$0xff]  }
 0x26b   :  { %5610 = vmatpush1.bf16.msra.mxu1 %v8365_v12  ;;  %v8443_v12 = vld [vmem:[%s11581_s1 + $0x12e8] ss:$16 sps:$4 sm:$0xff]  }
 0x26c   :  { %5180 = vmatpush1.bf16.msra.mxu0 %v8362_v30  ;;  %5611 = vmatprep.subr.bf16.mxu1 %v8373_v34  ;;  %v8440_v30 = vld [vmem:[%s11581_s1 + $0x16e0] ss:$16 sps:$4 sm:$0xff]   ;;  %v8451_v34 = vld [vmem:[%s11581_s1 + $0x130c] ss:$16 sps:$4 sm:$0xff]  }
 0x26d   :  { %5181 = vmatprep.subr.bf16.mxu0 %v8370_v59  ;;  %v8448_v59 = vld [vmem:[%s11581_s1 + $0x1704] ss:$16 sps:$4 sm:$0xff]  }
 0x26f   :  { %5612 = vmatpush1.bf16.msra.mxu1 %v8371_v55  ;;  %v8449_v55 = vld [vmem:[%s11581_s1 + $0x1308] ss:$16 sps:$4 sm:$0xff]  }
 0x270   :  { %5182 = vmatpush1.bf16.msra.mxu0 %v8368_v35  ;;  %5613 = vmatprep.subr.bf16.mxu1 %v8379_v38  ;;  %v8446_v35 = vld [vmem:[%s11581_s1 + $0x1700] ss:$16 sps:$4 sm:$0xff]   ;;  %v8457_v38 = vld [vmem:[%s11581_s1 + $0x132c] ss:$16 sps:$4 sm:$0xff]  }
 0x271   :  { %5183 = vmatprep.subr.bf16.mxu0 %v8376_v36  ;;  %v8454_v36 = vld [vmem:[%s11581_s1 + $0x1724] ss:$16 sps:$4 sm:$0xff]  }
 0x273   :  { %5614 = vmatpush1.bf16.msra.mxu1 %v8377_v15  ;;  %v8455_v15 = vld [vmem:[%s11581_s1 + $0x1328] ss:$16 sps:$4 sm:$0xff]  }
 0x274   :  { %5184 = vmatpush1.bf16.msra.mxu0 %v8374_v40  ;;  %5615 = vmatprep.subr.bf16.mxu1 %v8385_v4  ;;  %v8452_v40 = vld [vmem:[%s11581_s1 + $0x1720] ss:$16 sps:$4 sm:$0xff]   ;;  %v8463_v4 = vld [vmem:[%s11581_s1 + $0x134c] ss:$16 sps:$4 sm:$0xff]  }
 0x275   :  { %5185 = vmatprep.subr.bf16.mxu0 %v8382_v42  ;;  %v8460_v42 = vld [vmem:[%s11581_s1 + $0x1744] ss:$16 sps:$4 sm:$0xff]  }
 0x277   :  { %5616 = vmatpush1.bf16.msra.mxu1 %v8383_v44  ;;  %v8461_v44 = vld [vmem:[%s11581_s1 + $0x1348] ss:$16 sps:$4 sm:$0xff]  }
 0x278   :  { %5186 = vmatpush1.bf16.msra.mxu0 %v8380_v43  ;;  %5617 = vmatprep.subr.bf16.mxu1 %v8391_v47  ;;  %v8458_v43 = vld [vmem:[%s11581_s1 + $0x1740] ss:$16 sps:$4 sm:$0xff]   ;;  %v8469_v47 = vld [vmem:[%s11581_s1 + $0x136c] ss:$16 sps:$4 sm:$0xff]  }
 0x279   :  { %5187 = vmatprep.subr.bf16.mxu0 %v8388_v11  ;;  %v8466_v11 = vld [vmem:[%s11581_s1 + $0x1764] ss:$16 sps:$4 sm:$0xff]  }
 0x27b   :  { %5618 = vmatpush1.bf16.msra.mxu1 %v8389_v49  ;;  %v8467_v49 = vld [vmem:[%s11581_s1 + $0x1368] ss:$16 sps:$4 sm:$0xff]  }
 0x27c   :  { %5188 = vmatpush1.bf16.msra.mxu0 %v8386_v48  ;;  %5619 = vmatprep.subr.bf16.mxu1 %v8397_v50  ;;  %v8464_v48 = vld [vmem:[%s11581_s1 + $0x1760] ss:$16 sps:$4 sm:$0xff]   ;;  %v8475_v50 = vld [vmem:[%s11581_s1 + $0x138c] ss:$16 sps:$4 sm:$0xff]  }
 0x27d   :  { %5189 = vmatprep.subr.bf16.mxu0 %v8394_v24  ;;  %v8472_v24 = vld [vmem:[%s11581_s1 + $0x1784] ss:$16 sps:$4 sm:$0xff]  }
 0x27f   :  { %5620 = vmatpush1.bf16.msra.mxu1 %v8395_v32  ;;  %v8473_v32 = vld [vmem:[%s11581_s1 + $0x1388] ss:$16 sps:$4 sm:$0xff]  }
 0x280   :  { %5190 = vmatpush1.bf16.msra.mxu0 %v8392_v52  ;;  %5632 = vmatprep.subr.bf16.mxu1 %v8403_v57  ;;  %v8470_v52 = vld [vmem:[%s11581_s1 + $0x1780] ss:$16 sps:$4 sm:$0xff]   ;;  %v8479_v57 = vld [vmem:[%s11581_s1 + $0x13a8] ss:$16 sps:$4 sm:$0xff]  }
 0x281   :  { %5202 = vmatprep.subr.bf16.mxu0 %v8400_v56  ;;  %v8476_v56 = vld [vmem:[%s11581_s1 + $0x17a0] ss:$16 sps:$4 sm:$0xff]  }
 0x282   :  { %5622 = vmatmul.mubr.bf16.vlgmr.msra.gmra.mrb[4].mxu1 %v10472_v31  ;;  %v8415_v31 = vld [vmem:[%s11581_s1 + $0x124c] ss:$16 sps:$4 sm:$0xff]  }
 0x283   :  { %5192 = vmatmul.mubr.bf16.vlgmr.msra.gmra.mrb[0].mxu0 %v10896_v58  ;;  %5633 = vmatpush1.bf16.msra.mxu1 %v8401_v62  ;;  %v8485_v62 = vld [vmem:[%s11581_s1 + $0x13c8] ss:$16 sps:$4 sm:$0xff]  }
 0x284   :  { %5203 = vmatpush1.bf16.msra.mxu0 %v8398_v61  ;;  %5634 = vmatprep.subr.bf16.mxu1 %v8409_v63  ;;  %v8482_v61 = vld [vmem:[%s11581_s1 + $0x17c0] ss:$16 sps:$4 sm:$0xff]   ;;  %v8493_v63 = vld [vmem:[%s11581_s1 + $0x13ec] ss:$16 sps:$4 sm:$0xff]  }
 0x285   :  { %5204 = vmatprep.subr.bf16.mxu0 %v8406_v33  ;;  %5234 = vmatprep.mubr.bf16.mxu0 %v10916_v0  ;;  %v8490_v33 = vld [vmem:[%s11581_s1 + $0x17e4] ss:$16 sps:$4 sm:$0xff]  }
 0x286   :  { %5664 = vmatprep.mubr.bf16.mxu1 %v10492_v39  ;;  %v8421_v39 = vld [vmem:[%s11581_s1 + $0x126c] ss:$16 sps:$4 sm:$0xff]  }
 0x287   :  { %5635 = vmatpush1.bf16.msra.mxu1 %v8407_v37  ;;  %v8491_v37 = vld [vmem:[%s11581_s1 + $0x13e8] ss:$16 sps:$4 sm:$0xff]  }
 0x288   :  { %5205 = vmatpush1.bf16.msra.mxu0 %v8404_v1  ;;  %5636 = vmatprep.subr.bf16.mxu1 %v8415_v31  ;;  %v8488_v1 = vld [vmem:[%s11581_s1 + $0x17e0] ss:$16 sps:$4 sm:$0xff]  }
 0x289   :  { %5206 = vmatprep.subr.bf16.mxu0 %v8412_v6  ;;  %v49_v6 = vld [vmem:[%s11582_s0 + $0xb0] sm:$0xff] }
 0x28a   :  { %v73_v31 = vld [vmem:[%s11582_s0 + $0x170] sm:$0xff] }
 0x28b   :  { %5637 = vmatpush1.bf16.msra.mxu1 %v8413_v9  ;;  %v11105_v9 = vpack.c.bf16 %v73_v31, %v49_v6  ;;  %v8631_v6 = vld [vmem:[%s11583_s3 + $0xd4] ss:$8 sps:$4 sm:$0xff]   ;;  %v8536_v31 = vld [vmem:[%s11581_s1 + $0x15c8] ss:$16 sps:$4 sm:$0xff]  }
 0x28c   :  { %5207 = vmatpush1.bf16.msra.mxu0 %v8410_v8  ;;  %5638 = vmatprep.subr.bf16.mxu1 %v8421_v39  ;;  %v8496_v8 = vld [vmem:[%s11581_s1 + $0x140c] ss:$16 sps:$4 sm:$0xff]  }
 0x28d   :  { %5208 = vmatprep.subr.bf16.mxu0 %v8418_v10  ;;  %v8494_v10 = vld [vmem:[%s11581_s1 + $0x1408] ss:$16 sps:$4 sm:$0xff]   ;;  %v8499_v39 = vld [vmem:[%s11581_s1 + $0x142c] ss:$16 sps:$4 sm:$0xff]  }
 0x28f   :  { %5639 = vmatpush1.bf16.msra.mxu1 %v8419_v14  ;;  %v8502_v14 = vld [vmem:[%s11581_s1 + $0x144c] ss:$16 sps:$4 sm:$0xff]  }
 0x290   :  { %5209 = vmatpush1.bf16.msra.mxu0 %v8416_v13  ;;  %5640 = vmatprep.subr.bf16.mxu1 %v8427_v41  ;;  %v8497_v13 = vld [vmem:[%s11581_s1 + $0x1428] ss:$16 sps:$4 sm:$0xff]   ;;  %v8595_v41 = vld [vmem:[%s11583_s3 + $0x14] ss:$8 sps:$4 sm:$0xff]  }
 0x291   :  { %5210 = vmatprep.subr.bf16.mxu0 %v8424_v16  ;;  %v8590_v16 = vld [vmem:[%s11583_s3] ss:$8 sps:$4 sm:$0xff]  }
 0x293   :  { %5641 = vmatpush1.bf16.msra.mxu1 %v8425_v18  ;;  %v8593_v18 = vld [vmem:[%s11583_s3 + $0x10] ss:$8 sps:$4 sm:$0xff]  }
 0x294   :  { %5211 = vmatpush1.bf16.msra.mxu0 %v8422_v17  ;;  %5642 = vmatprep.subr.bf16.mxu1 %v8433_v46  ;;  %v8500_v17 = vld [vmem:[%s11581_s1 + $0x1448] ss:$16 sps:$4 sm:$0xff]  }
 0x295   :  { %5212 = vmatprep.subr.bf16.mxu0 %v8430_v19  ;;  %v8598_v19 = vld [vmem:[%s11583_s3 + $0x24] ss:$8 sps:$4 sm:$0xff]   ;;  %v8503_v46 = vld [vmem:[%s11581_s1 + $0x1468] ss:$16 sps:$4 sm:$0xff]  }
 0x297   :  { %5643 = vmatpush1.bf16.msra.mxu1 %v8431_v22  ;;  %v8596_v22 = vld [vmem:[%s11583_s3 + $0x20] ss:$8 sps:$4 sm:$0xff]  }
 0x298   :  { %5213 = vmatpush1.bf16.msra.mxu0 %v8428_v21  ;;  %5644 = vmatprep.subr.bf16.mxu1 %v8439_v25  ;;  %v8508_v21 = vld [vmem:[%s11581_s1 + $0x148c] ss:$16 sps:$4 sm:$0xff]   ;;  %v8506_v25 = vld [vmem:[%s11581_s1 + $0x1488] ss:$16 sps:$4 sm:$0xff]  }
 0x299   :  { %5214 = vmatprep.subr.bf16.mxu0 %v8436_v23  ;;  %v8601_v23 = vld [vmem:[%s11583_s3 + $0x34] ss:$8 sps:$4 sm:$0xff]  }
 0x29b   :  { %5645 = vmatpush1.bf16.msra.mxu1 %v8437_v28  ;;  %v8599_v28 = vld [vmem:[%s11583_s3 + $0x30] ss:$8 sps:$4 sm:$0xff]  }
 0x29c   :  { %5215 = vmatpush1.bf16.msra.mxu0 %v8434_v27  ;;  %5646 = vmatprep.subr.bf16.mxu1 %v8445_v53  ;;  %v8511_v27 = vld [vmem:[%s11581_s1 + $0x14ac] ss:$16 sps:$4 sm:$0xff]   ;;  %v8509_v53 = vld [vmem:[%s11581_s1 + $0x14a8] ss:$16 sps:$4 sm:$0xff]  }
 0x29d   :  { %5216 = vmatprep.subr.bf16.mxu0 %v8442_v29  ;;  %v8604_v29 = vld [vmem:[%s11583_s3 + $0x44] ss:$8 sps:$4 sm:$0xff]  }
 0x29f   :  { %5647 = vmatpush1.bf16.msra.mxu1 %v8443_v12  ;;  %v8602_v12 = vld [vmem:[%s11583_s3 + $0x40] ss:$8 sps:$4 sm:$0xff]  }
 0x2a0   :  { %5217 = vmatpush1.bf16.msra.mxu0 %v8440_v30  ;;  %5648 = vmatprep.subr.bf16.mxu1 %v8451_v34  ;;  %v8514_v30 = vld [vmem:[%s11581_s1 + $0x14cc] ss:$16 sps:$4 sm:$0xff]   ;;  %v8512_v34 = vld [vmem:[%s11581_s1 + $0x14c8] ss:$16 sps:$4 sm:$0xff]  }
 0x2a1   :  { %5218 = vmatprep.subr.bf16.mxu0 %v8448_v59  ;;  %v8607_v59 = vld [vmem:[%s11583_s3 + $0x54] ss:$8 sps:$4 sm:$0xff]  }
 0x2a3   :  { %5649 = vmatpush1.bf16.msra.mxu1 %v8449_v55  ;;  %v8517_v55 = vld [vmem:[%s11581_s1 + $0x14ec] ss:$16 sps:$4 sm:$0xff]  }
 0x2a4   :  { %5219 = vmatpush1.bf16.msra.mxu0 %v8446_v35  ;;  %5650 = vmatprep.subr.bf16.mxu1 %v8457_v38  ;;  %v8605_v35 = vld [vmem:[%s11583_s3 + $0x50] ss:$8 sps:$4 sm:$0xff]  }
 0x2a5   :  { %5220 = vmatprep.subr.bf16.mxu0 %v8454_v36  ;;  %v8610_v36 = vld [vmem:[%s11583_s3 + $0x64] ss:$8 sps:$4 sm:$0xff]   ;;  %v8515_v38 = vld [vmem:[%s11581_s1 + $0x14e8] ss:$16 sps:$4 sm:$0xff]  }
 0x2a7   :  { %5651 = vmatpush1.bf16.msra.mxu1 %v8455_v15  ;;  %v8520_v15 = vld [vmem:[%s11581_s1 + $0x150c] ss:$16 sps:$4 sm:$0xff]  }
 0x2a8   :  { %5221 = vmatpush1.bf16.msra.mxu0 %v8452_v40  ;;  %5652 = vmatprep.subr.bf16.mxu1 %v8463_v4  ;;  %v8608_v40 = vld [vmem:[%s11583_s3 + $0x60] ss:$8 sps:$4 sm:$0xff]  }
 0x2a9   :  { %5222 = vmatprep.subr.bf16.mxu0 %v8460_v42  ;;  %v8613_v42 = vld [vmem:[%s11583_s3 + $0x74] ss:$8 sps:$4 sm:$0xff]   ;;  %v8518_v4 = vld [vmem:[%s11581_s1 + $0x1508] ss:$16 sps:$4 sm:$0xff]  }
 0x2ab   :  { %5653 = vmatpush1.bf16.msra.mxu1 %v8461_v44  ;;  %v8523_v44 = vld [vmem:[%s11581_s1 + $0x152c] ss:$16 sps:$4 sm:$0xff]  }
 0x2ac   :  { %5223 = vmatpush1.bf16.msra.mxu0 %v8458_v43  ;;  %5654 = vmatprep.subr.bf16.mxu1 %v8469_v47  ;;  %v8611_v43 = vld [vmem:[%s11583_s3 + $0x70] ss:$8 sps:$4 sm:$0xff]  }
 0x2ad   :  { %5224 = vmatprep.subr.bf16.mxu0 %v8466_v11  ;;  %v8616_v11 = vld [vmem:[%s11583_s3 + $0x84] ss:$8 sps:$4 sm:$0xff]   ;;  %v8521_v47 = vld [vmem:[%s11581_s1 + $0x1528] ss:$16 sps:$4 sm:$0xff]  }
 0x2af   :  { %5655 = vmatpush1.bf16.msra.mxu1 %v8467_v49  ;;  %v8526_v49 = vld [vmem:[%s11581_s1 + $0x154c] ss:$16 sps:$4 sm:$0xff]  }
 0x2b0   :  { %5225 = vmatpush1.bf16.msra.mxu0 %v8464_v48  ;;  %5656 = vmatprep.subr.bf16.mxu1 %v8475_v50  ;;  %v8614_v48 = vld [vmem:[%s11583_s3 + $0x80] ss:$8 sps:$4 sm:$0xff]  }
 0x2b1   :  { %5226 = vmatprep.subr.bf16.mxu0 %v8472_v24  ;;  %v8619_v24 = vld [vmem:[%s11583_s3 + $0x94] ss:$8 sps:$4 sm:$0xff]   ;;  %v8524_v50 = vld [vmem:[%s11581_s1 + $0x1548] ss:$16 sps:$4 sm:$0xff]  }
 0x2b3   :  { %5657 = vmatpush1.bf16.msra.mxu1 %v8473_v32  ;;  %v8529_v32 = vld [vmem:[%s11581_s1 + $0x156c] ss:$16 sps:$4 sm:$0xff]  }
 0x2b4   :  { %5227 = vmatpush1.bf16.msra.mxu0 %v8470_v52  ;;  %5658 = vmatprep.subr.bf16.mxu1 %v8481_v20  ;;  %v8617_v52 = vld [vmem:[%s11583_s3 + $0x90] ss:$8 sps:$4 sm:$0xff]  }
 0x2b5   :  { %5228 = vmatprep.subr.bf16.mxu0 %v8478_v54  ;;  %v8622_v54 = vld [vmem:[%s11583_s3 + $0xa4] ss:$8 sps:$4 sm:$0xff]   ;;  %v8527_v20 = vld [vmem:[%s11581_s1 + $0x1568] ss:$16 sps:$4 sm:$0xff]  }
 0x2b7   :  { %5659 = vmatpush1.bf16.msra.mxu1 %v8479_v57  ;;  %v8532_v57 = vld [vmem:[%s11581_s1 + $0x158c] ss:$16 sps:$4 sm:$0xff]  }
 0x2b8   :  { %5229 = vmatpush1.bf16.msra.mxu0 %v8476_v56  ;;  %5660 = vmatprep.subr.bf16.mxu1 %v8487_v60  ;;  %v8620_v56 = vld [vmem:[%s11583_s3 + $0xa0] ss:$8 sps:$4 sm:$0xff]  }
 0x2b9   :  { %5230 = vmatprep.subr.bf16.mxu0 %v8484_v26  ;;  %v8625_v26 = vld [vmem:[%s11583_s3 + $0xb4] ss:$8 sps:$4 sm:$0xff]   ;;  %v8530_v60 = vld [vmem:[%s11581_s1 + $0x1588] ss:$16 sps:$4 sm:$0xff]  }
 0x2bb   :  { %5661 = vmatpush1.bf16.msra.mxu1 %v8485_v62  ;;  %v8535_v62 = vld [vmem:[%s11581_s1 + $0x15ac] ss:$16 sps:$4 sm:$0xff]  }
 0x2bc   :  { %5231 = vmatpush1.bf16.msra.mxu0 %v8482_v61  ;;  %5662 = vmatprep.subr.bf16.mxu1 %v8493_v63  ;;  %v8623_v61 = vld [vmem:[%s11583_s3 + $0xb0] ss:$8 sps:$4 sm:$0xff]  }
 0x2bd   :  { %5232 = vmatprep.subr.bf16.mxu0 %v8490_v33  ;;  %v8628_v33 = vld [vmem:[%s11583_s3 + $0xc4] ss:$8 sps:$4 sm:$0xff]   ;;  %v8533_v63 = vld [vmem:[%s11581_s1 + $0x15a8] ss:$16 sps:$4 sm:$0xff]  }
 0x2bf   :  { %5663 = vmatpush1.bf16.msra.mxu1 %v8491_v37  ;;  %v8538_v37 = vld [vmem:[%s11581_s1 + $0x15cc] ss:$16 sps:$4 sm:$0xff]  }
 0x2c0   :  { %5233 = vmatpush1.bf16.msra.mxu0 %v8488_v1  ;;  %5675 = vmatprep.subr.bf16.mxu1 %v8496_v8  ;;  %v8626_v1 = vld [vmem:[%s11583_s3 + $0xc0] ss:$8 sps:$4 sm:$0xff]   ;;  %v8629_v8 = vld [vmem:[%s11583_s3 + $0xd0] ss:$8 sps:$4 sm:$0xff]  }
 0x2c2   :  { %5665 = vmatmul.mubr.bf16.vlgmr.msra.gmra.mrb[4].mxu1 %v10684_v45  ;;  %v8592_v45 = vld [vmem:[%s11583_s3 + $0x4] ss:$8 sps:$4 sm:$0xff]  }
 0x2c3   :  { %5235 = vmatmul.mubr.bf16.vlgmr.msra.gmra.mrb[0].mxu0 %v11105_v9  ;;  %5676 = vmatpush1.bf16.msra.mxu1 %v8494_v10  ;;  %v8541_v10 = vld [vmem:[%s11581_s1 + $0x15ec] ss:$16 sps:$4 sm:$0xff]  }
 0x2c4   :  { %5707 = vmatprep.mubr.bf16.mxu1 %v10704_v51  ;;  %5677 = vmatprep.subr.bf16.mxu1 %v8499_v39  ;;  %v8505_v51 = vld [vmem:[%s11581_s1 + $0x146c] ss:$16 sps:$4 sm:$0xff]   ;;  %v8539_v39 = vld [vmem:[%s11581_s1 + $0x15e8] ss:$16 sps:$4 sm:$0xff]  }
 0x2c5   :  { %6169 = vmatprep.subr.bf16.mxu0 %v8592_v45  ;;  %v8545_v45 = vld [vmem:[%s11581_s1 + $0x1628] ss:$16 sps:$4 sm:$0xff]  }
 0x2c6   :  { %6170 = vmatpush1.bf16.msra.mxu0 %v8590_v16  ;;  %v8547_v16 = vld [vmem:[%s11581_s1 + $0x162c] ss:$16 sps:$4 sm:$0xff]  }
 0x2c7   :  { %5678 = vmatpush1.bf16.msra.mxu1 %v8497_v13  ;;  %6171 = vmatprep.subr.bf16.mxu0 %v8595_v41  ;;  %v8544_v13 = vld [vmem:[%s11581_s1 + $0x160c] ss:$16 sps:$4 sm:$0xff]  }
 0x2c8   :  { %5679 = vmatprep.subr.bf16.mxu1 %v8502_v14  ;;  %v8542_v14 = vld [vmem:[%s11581_s1 + $0x1608] ss:$16 sps:$4 sm:$0xff]   ;;  %v8550_v41 = vld [vmem:[%s11581_s1 + $0x164c] ss:$16 sps:$4 sm:$0xff]  }
 0x2ca   :  { %6172 = vmatpush1.bf16.msra.mxu0 %v8593_v18  ;;  %v8554_v18 = vld [vmem:[%s11581_s1 + $0x1688] ss:$16 sps:$4 sm:$0xff]  }
 0x2cb   :  { %5680 = vmatpush1.bf16.msra.mxu1 %v8500_v17  ;;  %6173 = vmatprep.subr.bf16.mxu0 %v8598_v19  ;;  %v8548_v17 = vld [vmem:[%s11581_s1 + $0x1648] ss:$16 sps:$4 sm:$0xff]   ;;  %v8559_v19 = vld [vmem:[%s11581_s1 + $0x16ac] ss:$16 sps:$4 sm:$0xff]  }
 0x2cc   :  { %5681 = vmatprep.subr.bf16.mxu1 %v8505_v51  ;;  %v8556_v51 = vld [vmem:[%s11581_s1 + $0x168c] ss:$16 sps:$4 sm:$0xff]  }
 0x2ce   :  { %6174 = vmatpush1.bf16.msra.mxu0 %v8596_v22  ;;  %v8634_v22 = vld [vmem:[%s11583_s3 + $0xe4] ss:$8 sps:$4 sm:$0xff]  }
 0x2cf   :  { %5682 = vmatpush1.bf16.msra.mxu1 %v8503_v46  ;;  %6175 = vmatprep.subr.bf16.mxu0 %v8601_v23  ;;  %v8557_v46 = vld [vmem:[%s11581_s1 + $0x16a8] ss:$16 sps:$4 sm:$0xff]  }
 0x2d0   :  { %5683 = vmatprep.subr.bf16.mxu1 %v8508_v21  ;;  %v8562_v21 = vld [vmem:[%s11581_s1 + $0x16cc] ss:$16 sps:$4 sm:$0xff]   ;;  %v8560_v23 = vld [vmem:[%s11581_s1 + $0x16c8] ss:$16 sps:$4 sm:$0xff]  }
 0x2d2   :  { %6176 = vmatpush1.bf16.msra.mxu0 %v8599_v28  ;;  %v8637_v28 = vld [vmem:[%s11583_s3 + $0xf4] ss:$8 sps:$4 sm:$0xff]  }
 0x2d3   :  { %5684 = vmatpush1.bf16.msra.mxu1 %v8506_v25  ;;  %6177 = vmatprep.subr.bf16.mxu0 %v8604_v29  ;;  %v8632_v25 = vld [vmem:[%s11583_s3 + $0xe0] ss:$8 sps:$4 sm:$0xff]  }
 0x2d4   :  { %5685 = vmatprep.subr.bf16.mxu1 %v8511_v27  ;;  %v8565_v27 = vld [vmem:[%s11581_s1 + $0x16ec] ss:$16 sps:$4 sm:$0xff]   ;;  %v8563_v29 = vld [vmem:[%s11581_s1 + $0x16e8] ss:$16 sps:$4 sm:$0xff]  }
 0x2d6   :  { %6178 = vmatpush1.bf16.msra.mxu0 %v8602_v12  ;;  %v8566_v12 = vld [vmem:[%s11581_s1 + $0x1708] ss:$16 sps:$4 sm:$0xff]  }
 0x2d7   :  { %5686 = vmatpush1.bf16.msra.mxu1 %v8509_v53  ;;  %6179 = vmatprep.subr.bf16.mxu0 %v8607_v59  ;;  %v8635_v53 = vld [vmem:[%s11583_s3 + $0xf0] ss:$8 sps:$4 sm:$0xff]   ;;  %v8571_v59 = vld [vmem:[%s11581_s1 + $0x172c] ss:$16 sps:$4 sm:$0xff]  }
 0x2d8   :  { %5687 = vmatprep.subr.bf16.mxu1 %v8514_v30  ;;  %v8568_v30 = vld [vmem:[%s11581_s1 + $0x170c] ss:$16 sps:$4 sm:$0xff]  }
 0x2da   :  { %6180 = vmatpush1.bf16.msra.mxu0 %v8605_v35  ;;  %v8569_v35 = vld [vmem:[%s11581_s1 + $0x1728] ss:$16 sps:$4 sm:$0xff]  }
 0x2db   :  { %5688 = vmatpush1.bf16.msra.mxu1 %v8512_v34  ;;  %6181 = vmatprep.subr.bf16.mxu0 %v8610_v36  ;;  %v8640_v34 = vld [vmem:[%s11583_s3 + $0x104] ss:$8 sps:$4 sm:$0xff]   ;;  %v8572_v36 = vld [vmem:[%s11581_s1 + $0x1748] ss:$16 sps:$4 sm:$0xff]  }
 0x2dc   :  { %5689 = vmatprep.subr.bf16.mxu1 %v8517_v55  ;;  %v8574_v55 = vld [vmem:[%s11581_s1 + $0x174c] ss:$16 sps:$4 sm:$0xff]  }
 0x2de   :  { %6182 = vmatpush1.bf16.msra.mxu0 %v8608_v40  ;;  %v8575_v40 = vld [vmem:[%s11581_s1 + $0x1768] ss:$16 sps:$4 sm:$0xff]  }
 0x2df   :  { %5690 = vmatpush1.bf16.msra.mxu1 %v8515_v38  ;;  %6183 = vmatprep.subr.bf16.mxu0 %v8613_v42  ;;  %v8577_v38 = vld [vmem:[%s11581_s1 + $0x176c] ss:$16 sps:$4 sm:$0xff]   ;;  %v8578_v42 = vld [vmem:[%s11581_s1 + $0x1788] ss:$16 sps:$4 sm:$0xff]  }
 0x2e0   :  { %5691 = vmatprep.subr.bf16.mxu1 %v8520_v15  ;;  %v8580_v15 = vld [vmem:[%s11581_s1 + $0x178c] ss:$16 sps:$4 sm:$0xff]  }
 0x2e2   :  { %6184 = vmatpush1.bf16.msra.mxu0 %v8611_v43  ;;  %v8581_v43 = vld [vmem:[%s11581_s1 + $0x17a8] ss:$16 sps:$4 sm:$0xff]  }
 0x2e3   :  { %5692 = vmatpush1.bf16.msra.mxu1 %v8518_v4  ;;  %6185 = vmatprep.subr.bf16.mxu0 %v8616_v11  ;;  %v8583_v4 = vld [vmem:[%s11581_s1 + $0x17ac] ss:$16 sps:$4 sm:$0xff]   ;;  %v8584_v11 = vld [vmem:[%s11581_s1 + $0x17c8] ss:$16 sps:$4 sm:$0xff]  }
 0x2e4   :  { %5693 = vmatprep.subr.bf16.mxu1 %v8523_v44  ;;  %v8586_v44 = vld [vmem:[%s11581_s1 + $0x17cc] ss:$16 sps:$4 sm:$0xff]  }
 0x2e6   :  { %6186 = vmatpush1.bf16.msra.mxu0 %v8614_v48  ;;  %v8587_v48 = vld [vmem:[%s11581_s1 + $0x17e8] ss:$16 sps:$4 sm:$0xff]  }
 0x2e7   :  { %5694 = vmatpush1.bf16.msra.mxu1 %v8521_v47  ;;  %6187 = vmatprep.subr.bf16.mxu0 %v8619_v24  ;;  %v8589_v47 = vld [vmem:[%s11581_s1 + $0x17ec] ss:$16 sps:$4 sm:$0xff]  }
 0x2e8   :  { %5695 = vmatprep.subr.bf16.mxu1 %v8526_v49  ;;  %v869_v49 = vlaneseq }
 0x2ea   :  { %6188 = vmatpush1.bf16.msra.mxu0 %v8617_v52  ;;  %v11401_v24 = vshrl.u32 %v869_v49, 7  ;;  %v11407_v52 = vld [vmem:[%s11584_s2] sm:$0xf] }
 0x2eb   :  { %5696 = vmatpush1.bf16.msra.mxu1 %v8524_v50  ;;  %6189 = vmatprep.subr.bf16.mxu0 %v8622_v54  ;;  %v8680_v49 = vld [vmem:[%s11583_s3 + $0x1e0] ss:$8 sps:$4 sm:$0xff]  }
 0x2ec   :  { %5697 = vmatprep.subr.bf16.mxu1 %v8529_v32  ;;  %v871_v50 = vsub.s32 0, %v11401_v24  ;;  %v875_v32 = vsub.s32 1, %v11401_v24 }
 0x2ee   :  { %6190 = vmatpush1.bf16.msra.mxu0 %v8620_v56  ;;  %v872_v54 = vrot.slane %v11407_v52, %v871_v50 }
 0x2ef   :  { %5698 = vmatpush1.bf16.msra.mxu1 %v8527_v20  ;;  %6191 = vmatprep.subr.bf16.mxu0 %v8625_v26 }
 0x2f0   :  { %5699 = vmatprep.subr.bf16.mxu1 %v8532_v57  ;;  %v4764_v20 = vadd.f32 %v9702_v2, %v872_v54  ;;  %v4768_v26 = vadd.f32 %v9709_v5, %v872_v54  ;;  %v8643_v5 = vld [vmem:[%s11583_s3 + $0x114] ss:$8 sps:$4 sm:$0xff]  }
 0x2f1   :  { %v8685_v54 = vld [vmem:[%s11583_s3 + $0x1f4] ss:$8 sps:$4 sm:$0xff]  }
 0x2f2   :  { %6192 = vmatpush1.bf16.msra.mxu0 %v8623_v61 }
 0x2f3   :  { %5700 = vmatpush1.bf16.msra.mxu1 %v8530_v60  ;;  %6193 = vmatprep.subr.bf16.mxu0 %v8628_v33 }
 0x2f4   :  { %5701 = vmatprep.subr.bf16.mxu1 %v8535_v62 }
 0x2f6   :  { %6194 = vmatpush1.bf16.msra.mxu0 %v8626_v1 }
 0x2f7   :  { %5702 = vmatpush1.bf16.msra.mxu1 %v8533_v63  ;;  %6195 = vmatprep.subr.bf16.mxu0 %v8631_v6 }
 0x2f8   :  { %5703 = vmatprep.subr.bf16.mxu1 %v8538_v37 }
 0x2fa   :  { %6196 = vmatpush1.bf16.msra.mxu0 %v8629_v8 }
 0x2fb   :  { %5704 = vmatpush1.bf16.msra.mxu1 %v8536_v31  ;;  %6197 = vmatprep.subr.bf16.mxu0 %v8634_v22  ;;  %v8650_v22 = vld [vmem:[%s11583_s3 + $0x140] ss:$8 sps:$4 sm:$0xff]  }
 0x2fc   :  { %5705 = vmatprep.subr.bf16.mxu1 %v8541_v10 }
 0x2fe   :  { %6198 = vmatpush1.bf16.msra.mxu0 %v8632_v25  ;;  %v8655_v25 = vld [vmem:[%s11583_s3 + $0x154] ss:$8 sps:$4 sm:$0xff]  }
 0x2ff   :  { %5706 = vmatpush1.bf16.msra.mxu1 %v8539_v39  ;;  %6199 = vmatprep.subr.bf16.mxu0 %v8637_v28  ;;  %v8695_v28 = vld [vmem:[%s11585_s5 + $0x20] sm:$0xff]  }
 0x300   :  { %5718 = vmatprep.subr.bf16.mxu1 %v8544_v13 }
 0x302   :  { %5708 = vmatmul.mubr.bf16.vlgmr.msra.gmra.mrb[4].mxu1 %v10896_v58  ;;  %v8553_v58 = vld [vmem:[%s11581_s1 + $0x166c] ss:$16 sps:$4 sm:$0xff]   ;;  %6200 = vmatpush1.bf16.msra.mxu0 %v8635_v53 }
 0x303   :  { %5719 = vmatpush1.bf16.msra.mxu1 %v8542_v14  ;;  %5750 = vmatprep.mubr.bf16.mxu1 %v10916_v0  ;;  %v8551_v0 = vld [vmem:[%s11581_s1 + $0x1668] ss:$16 sps:$4 sm:$0xff]   ;;  %v8646_v14 = vld [vmem:[%s11583_s3 + $0x124] ss:$8 sps:$4 sm:$0xff]  }
 0x304   :  { %5720 = vmatprep.subr.bf16.mxu1 %v8547_v16  ;;  %6212 = vmatprep.subr.bf16.mxu0 %v8640_v34  ;;  %v8686_v16 = vld [vmem:[%s11585_s5 + $0x40] sm:$0xff]   ;;  %v8696_v53 = vld [vmem:[%s11585_s5 + $0x68] sm:$0xff]   ;;  %v8659_v34 = vld [vmem:[%s11583_s3 + $0x170] ss:$8 sps:$4 sm:$0xff]  }
 0x307   :  { %5721 = vmatpush1.bf16.msra.mxu1 %v8545_v45  ;;  %v8687_v45 = vld [vmem:[%s11585_s5] sm:$0xff]  }
 0x308   :  { %5722 = vmatprep.subr.bf16.mxu1 %v8550_v41  ;;  %v8644_v41 = vld [vmem:[%s11583_s3 + $0x120] ss:$8 sps:$4 sm:$0xff]  }
 0x30b   :  { %5723 = vmatpush1.bf16.msra.mxu1 %v8548_v17  ;;  %v8688_v17 = vld [vmem:[%s11585_s5 + $0x48] sm:$0xff]  }
 0x30c   :  { %5724 = vmatprep.subr.bf16.mxu1 %v8553_v58  ;;  %v8689_v58 = vld [vmem:[%s11585_s5 + $0x8] sm:$0xff]  }
 0x30f   :  { %5725 = vmatpush1.bf16.msra.mxu1 %v8551_v0  ;;  %v8690_v0 = vld [vmem:[%s11585_s5 + $0x50] sm:$0xff]  }
 0x310   :  { %5726 = vmatprep.subr.bf16.mxu1 %v8556_v51  ;;  %v8649_v51 = vld [vmem:[%s11583_s3 + $0x134] ss:$8 sps:$4 sm:$0xff]  }
 0x313   :  { %5727 = vmatpush1.bf16.msra.mxu1 %v8554_v18  ;;  %v8647_v18 = vld [vmem:[%s11583_s3 + $0x130] ss:$8 sps:$4 sm:$0xff]  }
 0x314   :  { %5728 = vmatprep.subr.bf16.mxu1 %v8559_v19  ;;  %v8691_v19 = vld [vmem:[%s11585_s5 + $0x10] sm:$0xff]  }
 0x317   :  { %5729 = vmatpush1.bf16.msra.mxu1 %v8557_v46  ;;  %v8692_v46 = vld [vmem:[%s11585_s5 + $0x58] sm:$0xff]  }
 0x318   :  { %5730 = vmatprep.subr.bf16.mxu1 %v8562_v21  ;;  %v8652_v21 = vld [vmem:[%s11583_s3 + $0x144] ss:$8 sps:$4 sm:$0xff]  }
 0x31b   :  { %5731 = vmatpush1.bf16.msra.mxu1 %v8560_v23  ;;  %v8693_v23 = vld [vmem:[%s11585_s5 + $0x18] sm:$0xff]  }
 0x31c   :  { %5732 = vmatprep.subr.bf16.mxu1 %v8565_v27  ;;  %v8694_v27 = vld [vmem:[%s11585_s5 + $0x60] sm:$0xff]  }
 0x31f   :  { %5733 = vmatpush1.bf16.msra.mxu1 %v8563_v29  ;;  %v8653_v29 = vld [vmem:[%s11583_s3 + $0x150] ss:$8 sps:$4 sm:$0xff]  }
 0x320   :  { %5734 = vmatprep.subr.bf16.mxu1 %v8568_v30  ;;  %v8658_v30 = vld [vmem:[%s11583_s3 + $0x164] ss:$8 sps:$4 sm:$0xff]  }
 0x323   :  { %5735 = vmatpush1.bf16.msra.mxu1 %v8566_v12  ;;  %v8656_v12 = vld [vmem:[%s11583_s3 + $0x160] ss:$8 sps:$4 sm:$0xff]  }
 0x324   :  { %5736 = vmatprep.subr.bf16.mxu1 %v8571_v59  ;;  %v8661_v59 = vld [vmem:[%s11583_s3 + $0x174] ss:$8 sps:$4 sm:$0xff]  }
 0x327   :  { %5737 = vmatpush1.bf16.msra.mxu1 %v8569_v35  ;;  %v8664_v35 = vld [vmem:[%s11583_s3 + $0x184] ss:$8 sps:$4 sm:$0xff]  }
 0x328   :  { %5738 = vmatprep.subr.bf16.mxu1 %v8574_v55  ;;  %v8662_v55 = vld [vmem:[%s11583_s3 + $0x180] ss:$8 sps:$4 sm:$0xff]  }
 0x32b   :  { %5739 = vmatpush1.bf16.msra.mxu1 %v8572_v36  ;;  %v8667_v36 = vld [vmem:[%s11583_s3 + $0x194] ss:$8 sps:$4 sm:$0xff]  }
 0x32c   :  { %5740 = vmatprep.subr.bf16.mxu1 %v8577_v38  ;;  %v8665_v38 = vld [vmem:[%s11583_s3 + $0x190] ss:$8 sps:$4 sm:$0xff]  }
 0x32f   :  { %5741 = vmatpush1.bf16.msra.mxu1 %v8575_v40  ;;  %v8670_v40 = vld [vmem:[%s11583_s3 + $0x1a4] ss:$8 sps:$4 sm:$0xff]  }
 0x330   :  { %5742 = vmatprep.subr.bf16.mxu1 %v8580_v15  ;;  %v8668_v15 = vld [vmem:[%s11583_s3 + $0x1a0] ss:$8 sps:$4 sm:$0xff]  }
 0x333   :  { %5743 = vmatpush1.bf16.msra.mxu1 %v8578_v42  ;;  %v8673_v42 = vld [vmem:[%s11583_s3 + $0x1b4] ss:$8 sps:$4 sm:$0xff]  }
 0x334   :  { %5744 = vmatprep.subr.bf16.mxu1 %v8583_v4  ;;  %v8671_v4 = vld [vmem:[%s11583_s3 + $0x1b0] ss:$8 sps:$4 sm:$0xff]  }
 0x337   :  { %5745 = vmatpush1.bf16.msra.mxu1 %v8581_v43  ;;  %v8676_v43 = vld [vmem:[%s11583_s3 + $0x1c4] ss:$8 sps:$4 sm:$0xff]  }
 0x338   :  { %5746 = vmatprep.subr.bf16.mxu1 %v8586_v44  ;;  %v8674_v44 = vld [vmem:[%s11583_s3 + $0x1c0] ss:$8 sps:$4 sm:$0xff]  }
 0x33b   :  { %5747 = vmatpush1.bf16.msra.mxu1 %v8584_v11  ;;  %v8679_v11 = vld [vmem:[%s11583_s3 + $0x1d4] ss:$8 sps:$4 sm:$0xff]  }
 0x33c   :  { %5748 = vmatprep.subr.bf16.mxu1 %v8589_v47  ;;  %v8677_v47 = vld [vmem:[%s11583_s3 + $0x1d0] ss:$8 sps:$4 sm:$0xff]  }
 0x33f   :  { %5749 = vmatpush1.bf16.msra.mxu1 %v8587_v48  ;;  %v8682_v48 = vld [vmem:[%s11583_s3 + $0x1e4] ss:$8 sps:$4 sm:$0xff]  }
 0x340   :  { %7312 = vmatprep.subr.bf16.mxu1 %v8686_v16  ;;  %v5837_v16 = vld [vmem:[%s11586_s4] sm:$0x3] }
 0x342   :  { %5751 = vmatmul.mubr.bf16.vlgmr.msra.gmra.mrb[4].mxu1 %v11105_v9  ;;  %v876_v9 = vrot.slane %v11407_v52, %v875_v32 }
 0x343   :  { %7313 = vmatpush3.bf16.msra.mxu1 %v8687_v45  ;;  %v5842_v45 = vrot.slane %v5837_v16, %v871_v50 }
 0x344   :  { %v4766_v56 = vadd.f32 %v9704_v3, %v876_v9  ;;  %v4770_v62 = vadd.f32 %v9714_v7, %v876_v9  ;;  %v8638_v3 = vld [vmem:[%s11583_s3 + $0x100] ss:$8 sps:$4 sm:$0xff]   ;;  %v8641_v7 = vld [vmem:[%s11583_s3 + $0x110] ss:$8 sps:$4 sm:$0xff]   ;;  %7314 = vmatprep.subr.bf16.mxu1 %v8688_v17 }
 0x345   :  { %v8683_v9 = vld [vmem:[%s11583_s3 + $0x1f0] ss:$8 sps:$4 sm:$0xff]  }
 0x347   :  { %7315 = vmatpush3.bf16.msra.mxu1 %v8689_v58 }
 0x348   :  { %7316 = vmatprep.subr.bf16.mxu1 %v8690_v0 }
 0x34b   :  { %7317 = vmatpush3.bf16.msra.mxu1 %v8691_v19 }
 0x34c   :  { %7318 = vmatprep.subr.bf16.mxu1 %v8692_v46 }
 0x34f   :  { %7319 = vmatpush3.bf16.msra.mxu1 %v8693_v23 }
 0x350   :  { %7320 = vmatprep.subr.bf16.mxu1 %v8694_v27 }
 0x353   :  { %7321 = vmatpush3.bf16.msra.mxu1 %v8695_v28 }
 0x354   :  { %7322 = vmatprep.subr.bf16.mxu1 %v8696_v53 }
 0x396   :  { %v5236_v57 = vpop.f32.mrb[0].mxu0 }
 0x397   :  { %v7335_v60 = vadd.f32 %v5236_v57, %v4764_v20  ;;  %v5238_v61 = vpop.f32.mrb[1].mxu0  ;;  %v879_v20 = vsub.s32 2, %v11401_v24 }
 0x398   :  { %v7337_v33 = vadd.f32 %v5238_v61, %v4766_v56  ;;  %v5240_v63 = vpop.f32.mrb[2].mxu0  ;;  %v883_v56 = vsub.s32 3, %v11401_v24  ;;  %v7295_v24 = vld [vmem:[%s11587_s6] ss:$0 sm:$0xff] }
 0x399   :  { %v7339_v1 = vadd.f32 %v5240_v63, %v4768_v26  ;;  %v5242_v37 = vpop.f32.mrb[3].mxu0  ;;  %v5761_v31 = vmax.f32 %v7335_v60, 0.0  ;;  %v880_v57 = vrot.slane %v11407_v52, %v879_v20 }
 0x39a   :  { %v7341_v6 = vadd.f32 %v5242_v37, %v4770_v62  ;;  %v5762_v10 = vmax.f32 %v7337_v33, 0.0  ;;  %v884_v26 = vrot.slane %v11407_v52, %v883_v56  ;;  %v8697_v52 = vld [vmem:[%s11585_s5 + $0x28] sm:$0xff]  }
 0x39b   :  { %v5765_v8 = vmax.f32 %v7339_v1, 0.0  ;;  %7323 = vmatpush3.bf16.msra.mxu1 %v8697_v52 }
 0x39c   :  { %v5766_v39 = vmax.f32 %v7341_v6, 0.0 }
 0x39d   :  { %v5769_v13 = vpack.c.bf16 %v5765_v8, %v5761_v31 }
 0x39e   :  { %v5770_v2 = vpack.c.bf16 %v5766_v39, %v5762_v10 }
 0x3a0   :  { %6201 = vmatprep.mubr.bf16.mxu0 %v5770_v2 }
 0x3a1   :  { %6202 = vmatmul.mubr.bf16.vlgmr.msra.gmra.mrb[4].mxu0 %v5769_v13 }
 0x3a2   :  { %6213 = vmatpush1.bf16.msra.mxu0 %v8638_v3  ;;  %v8698_v3 = vld [vmem:[%s11585_s5 + $0x70] sm:$0xff]  }
 0x3a3   :  { %6214 = vmatprep.subr.bf16.mxu0 %v8643_v5  ;;  %v8699_v5 = vld [vmem:[%s11585_s5 + $0x30] sm:$0xff]   ;;  %7324 = vmatprep.subr.bf16.mxu1 %v8698_v3 }
 0x3a4   :  { %7325 = vmatpush3.bf16.msra.mxu1 %v8699_v5 }
 0x3a6   :  { %6215 = vmatpush1.bf16.msra.mxu0 %v8641_v7  ;;  %v8700_v7 = vld [vmem:[%s11585_s5 + $0x78] sm:$0xff]  }
 0x3a7   :  { %6216 = vmatprep.subr.bf16.mxu0 %v8646_v14  ;;  %v8701_v14 = vld [vmem:[%s11585_s5 + $0x38] sm:$0xff]   ;;  %7326 = vmatprep.subr.bf16.mxu1 %v8700_v7 }
 0x3a8   :  { %7327 = vmatpush3.bf16.msra.mxu1 %v8701_v14 }
 0x3aa   :  { %6217 = vmatpush1.bf16.msra.mxu0 %v8644_v41  ;;  %v5846_v41 = vrot.slane %v5837_v16, %v875_v32 }
 0x3ab   :  { %6218 = vmatprep.subr.bf16.mxu0 %v8649_v51 }
 0x3ae   :  { %6219 = vmatpush1.bf16.msra.mxu0 %v8647_v18 }
 0x3af   :  { %6220 = vmatprep.subr.bf16.mxu0 %v8652_v21 }
 0x3b2   :  { %6221 = vmatpush1.bf16.msra.mxu0 %v8650_v22 }
 0x3b3   :  { %6222 = vmatprep.subr.bf16.mxu0 %v8655_v25 }
 0x3b6   :  { %6223 = vmatpush1.bf16.msra.mxu0 %v8653_v29 }
 0x3b7   :  { %6224 = vmatprep.subr.bf16.mxu0 %v8658_v30 }
 0x3ba   :  { %6225 = vmatpush1.bf16.msra.mxu0 %v8656_v12 }
 0x3bb   :  { %6226 = vmatprep.subr.bf16.mxu0 %v8661_v59 }
 0x3be   :  { %6227 = vmatpush1.bf16.msra.mxu0 %v8659_v34 }
 0x3bf   :  { %6228 = vmatprep.subr.bf16.mxu0 %v8664_v35 }
 0x3c2   :  { %6229 = vmatpush1.bf16.msra.mxu0 %v8662_v55 }
 0x3c3   :  { %6230 = vmatprep.subr.bf16.mxu0 %v8667_v36 }
 0x3c6   :  { %6231 = vmatpush1.bf16.msra.mxu0 %v8665_v38 }
 0x3c7   :  { %6232 = vmatprep.subr.bf16.mxu0 %v8670_v40 }
 0x3ca   :  { %6233 = vmatpush1.bf16.msra.mxu0 %v8668_v15 }
 0x3cb   :  { %6234 = vmatprep.subr.bf16.mxu0 %v8673_v42 }
 0x3ce   :  { %6235 = vmatpush1.bf16.msra.mxu0 %v8671_v4 }
 0x3cf   :  { %6236 = vmatprep.subr.bf16.mxu0 %v8676_v43 }
 0x3d2   :  { %6237 = vmatpush1.bf16.msra.mxu0 %v8674_v44 }
 0x3d3   :  { %6238 = vmatprep.subr.bf16.mxu0 %v8679_v11 }
 0x3d6   :  { %6239 = vmatpush1.bf16.msra.mxu0 %v8677_v47 }
 0x3d7   :  { %6240 = vmatprep.subr.bf16.mxu0 %v8682_v48 }
 0x3da   :  { %6241 = vmatpush1.bf16.msra.mxu0 %v8680_v49 }
 0x3db   :  { %6242 = vmatprep.subr.bf16.mxu0 %v8685_v54 }
 0x3de   :  { %6243 = vmatpush1.bf16.msra.mxu0 %v8683_v9 }
 0x415   :  { %v5752_v60 = vpop.f32.mrb[4].mxu1 }
 0x416   :  { %v7342_v61 = vadd.f32 %v5752_v60, %v880_v57  ;;  %v5754_v62 = vpop.f32.mrb[5].mxu1 }
 0x417   :  { %v7343_v33 = vadd.f32 %v5754_v62, %v884_v26  ;;  %v5756_v63 = vpop.f32.mrb[6].mxu1 }
 0x418   :  { %v7344_v1 = vadd.f32 %v5756_v63, %v880_v57  ;;  %v5758_v37 = vpop.f32.mrb[7].mxu1  ;;  %v5763_v31 = vmax.f32 %v7342_v61, 0.0 }
 0x419   :  { %v7345_v6 = vadd.f32 %v5758_v37, %v884_v26  ;;  %v5764_v10 = vmax.f32 %v7343_v33, 0.0 }
 0x41a   :  { %v5767_v8 = vmax.f32 %v7344_v1, 0.0 }
 0x41b   :  { %v5768_v39 = vmax.f32 %v7345_v6, 0.0 }
 0x41c   :  { %v5771_v13 = vpack.c.bf16 %v5767_v8, %v5763_v31 }
 0x41d   :  { %v5772_v2 = vpack.c.bf16 %v5768_v39, %v5764_v10 }
 0x41f   :  { %6244 = vmatprep.mubr.bf16.mxu0 %v5772_v2 }
 0x420   :  { %6245 = vmatmul.mubr.bf16.vlgmr.msra.gmra.mrb[4].mxu0 %v5771_v13 }
 0x4f3   :  { %v6246_v17 = vpop.f32.mrb[4].mxu0 }
 0x4f4   :  { %v7346_v58 = vadd.f32 %v6246_v17, %v5842_v45  ;;  %v6248_v0 = vpop.f32.mrb[5].mxu0 }
 0x4f5   :  { %v7347_v51 = vadd.f32 %v6248_v0, %v5846_v41  ;;  %v6250_v18 = vpop.f32.mrb[6].mxu0 }
 0x4f6   :  { %v7348_v19 = vadd.f32 %v6250_v18, %v5842_v45  ;;  %v6252_v46 = vpop.f32.mrb[7].mxu0  ;;  %v6255_v22 = vmax.f32 %v7346_v58, 0.0 }
 0x4f7   :  { %v7349_v21 = vadd.f32 %v6252_v46, %v5846_v41  ;;  %v6256_v25 = vmax.f32 %v7347_v51, 0.0 }
 0x4f8   :  { %v6257_v23 = vmax.f32 %v7348_v19, 0.0 }
 0x4f9   :  { %v6258_v27 = vmax.f32 %v7349_v21, 0.0 }
 0x4fa   :  { %v6259_v28 = vpack.c.bf16 %v6257_v23, %v6255_v22 }
 0x4fb   :  { %v6260_v29 = vpack.c.bf16 %v6258_v27, %v6256_v25 }
 0x4fd   :  { %6428 = vmatprep.mubr.bf16.mxu1 %v6260_v29 }
 0x4fe   :  { %6429 = vmatmul.mubr.bf16.vlgmr.msra.gmra.mrb[8].mxu1 %v6259_v28 }
 0x5d1   :  { %v7328_v50 = vpop.f32.mrb[8].mxu1 }
 0x5d2   :  { %v7329_v53 = vpop.f32.mrb[9].mxu1 }
 0x5d3   :  { %v7330_v32 = vadd.f32 %v7329_v53, %v7328_v50  ;;  %v7331_v30 = vpop.f32.mrb[10].mxu1 }
 0x5d4   :  { %v7332_v12 = vpop.f32.mrb[11].mxu1 }
 0x5d5   :  { %v7333_v59 = vadd.f32 %v7332_v12, %v7331_v30  ;;  %v6431_v34 = vadd.f32 %v7330_v32, %v7295_v24 }
 0x5d7   :  { %6437 = vmax.xlane.f32.xlu0 %v6431_v34  ;;  %v6434_v35 = vadd.f32 %v7333_v59, %v7295_v24 }
 0x5db   :  { %6439 = vmax.xlane.f32.xlu0 %v6434_v35 }
 0x664   :  { %v6438_v55 = vpop.xlane.xlu0 %6437 }
 0x665   :  { %v6441_v36 = vsub.f32 %v6431_v34, %v6438_v55 }
 0x667   :  { %v6443_v38 = vmul.f32 1.442695, %v6441_v36 }
 0x668   :  { %v6440_v40 = vpop.xlane.xlu0 %6439 }
 0x669   :  { %v6442_v15 = vsub.f32 %v6434_v35, %v6440_v40  ;;  %8702 = vpow2.f32 %v6443_v38 }
 0x66b   :  { %v6445_v42 = vmul.f32 1.442695, %v6442_v15 }
 0x66d   :  { %8704 = vpow2.f32 %v6445_v42 }
 0x673   :  { %v8703_v4 = vpop.eup %8702 }
 0x674   :  { %6447 = vadd.xlane.f32.xlu1 %v8703_v4 }
 0x677   :  { %v8705_v43 = vpop.eup %8704 }
 0x678   :  { %6449 = vadd.xlane.f32.xlu1 %v8705_v43 }
 0x701   :  { %v6448_v44 = vpop.xlane.xlu1 %6447 }
 0x702   :  { %8706 = vlog2.f32 %v6448_v44 }
 0x705   :  { %v6450_v11 = vpop.xlane.xlu1 %6449 }
 0x706   :  { %8708 = vlog2.f32 %v6450_v11 }
 0x70c   :  { %v8707_v47 = vpop.eup %8706 }
 0x70d   :  { %v6452_v48 = vmul.f32 0.6931472, %v8707_v47 }
 0x70f   :  { %v6455_v49 = vsub.f32 %v6441_v36, %v6452_v48 }
 0x710   :  { %v8709_v54 = vpop.eup %8708 }
 0x711   :  { %6457 = vst [vmem:[%s11588_s7] sm:$0xff] %v6455_v49  ;;  %v6454_v9 = vmul.f32 0.6931472, %v8709_v54 }
 0x713   :  { %v6456_v20 = vsub.f32 %v6442_v15, %v6454_v9 }
 0x715   :  { %6458 = vst [vmem:[%s11588_s7 + $0x8] sm:$0xff] %v6456_v20 }

</bundles_post_ra>
